<compile_context>
chip_gen: v5e
topology: v5e:2x2
jax: 0.10.0
libtpu: 0.0.40
codegen_flags: <defaults>
</compile_context>

<pallas_src>
from functools import partial

import jax
import jax.numpy as jnp
from jax.experimental import pallas as pl
from jax.experimental.pallas import tpu as pltpu


# ---------------------------------------------------------------------------
# tiling helper
# ---------------------------------------------------------------------------

def _pick_tile(dim, target, align):
    """Largest tile <= target that divides dim and is `align`-aligned; else full dim."""
    if dim <= target:
        return dim
    t = target - (target % align)
    while t >= align:
        if dim % t == 0:
            return t
        t -= align
    return dim


# ---------------------------------------------------------------------------
# plain tiled matmul (+bias, optional fused residual add)
# ---------------------------------------------------------------------------

def _linear_kernel(x_ref, w_ref, b_ref, o_ref, acc_ref):
    @pl.when(pl.program_id(2) == 0)
    def _init():
        acc_ref[...] = jnp.zeros_like(acc_ref)

    acc_ref[...] += jnp.dot(x_ref[...].astype(jnp.bfloat16), w_ref[...],
                            preferred_element_type=jnp.float32)

    @pl.when(pl.program_id(2) == pl.num_programs(2) - 1)
    def _fin():
        o_ref[...] = (acc_ref[...] + b_ref[...]).astype(o_ref.dtype)


def _linear_add_kernel(x_ref, w_ref, b_ref, r_ref, o_ref, acc_ref):
    @pl.when(pl.program_id(2) == 0)
    def _init():
        acc_ref[...] = jnp.zeros_like(acc_ref)

    acc_ref[...] += jnp.dot(x_ref[...].astype(jnp.bfloat16), w_ref[...],
                            preferred_element_type=jnp.float32)

    @pl.when(pl.program_id(2) == pl.num_programs(2) - 1)
    def _fin():
        o_ref[...] = (acc_ref[...] + b_ref[...]
                      + r_ref[...].astype(jnp.float32)).astype(o_ref.dtype)


def linear(x2d, w_t, b, residual=None, *, tm_target=256, tn_target=256, tk_target=512):
    """y = x @ w_t + b (+ residual).  w_t is (K, N) bf16; output f32 (residual carrier)."""
    M, K = x2d.shape
    N = w_t.shape[1]
    tm = _pick_tile(M, tm_target, 16)
    tn = _pick_tile(N, tn_target, 128)
    tk = _pick_tile(K, tk_target, 128)
    grid = (M // tm, N // tn, K // tk)

    # TODO(synk): on v5e, if profiling shows exposed weight DMA in the k-loop, add
    # pipeline_mode=pl.Buffered(3) on the weight BlockSpec.
    in_specs = [pl.BlockSpec((tm, tk), lambda i, j, k: (i, k)),
                pl.BlockSpec((tk, tn), lambda i, j, k: (k, j)),
                pl.BlockSpec((1, tn), lambda i, j, k: (0, j))]
    args = [x2d, w_t, b.reshape(1, N)]
    if residual is None:
        kern = _linear_kernel
    else:
        kern = _linear_add_kernel
        in_specs.append(pl.BlockSpec((tm, tn), lambda i, j, k: (i, j)))
        args.append(residual)

    return pl.pallas_call(
        kern,
        out_shape=jax.ShapeDtypeStruct((M, N), jnp.float32),
        grid=grid,
        in_specs=in_specs,
        out_specs=pl.BlockSpec((tm, tn), lambda i, j, k: (i, j)),
        scratch_shapes=[pltpu.VMEM((tm, tn), jnp.float32)],
        compiler_params=pltpu.CompilerParams(
            dimension_semantics=("parallel", "parallel", "arbitrary")),
    )(*args)


# ---------------------------------------------------------------------------
# fused LayerNorm(mean/var only) + matmul; gamma/beta are pre-folded into w/b.
# Normalized row tile is cached in VMEM scratch across the N-tile loop.
# ---------------------------------------------------------------------------

def _ln_linear_kernel(x_ref, w_ref, b_ref, o_ref, xn_ref, *, eps):
    @pl.when(pl.program_id(1) == 0)
    def _norm():
        x = x_ref[...].astype(jnp.float32)                    # (tm, K)
        mu = jnp.mean(x, axis=-1, keepdims=True)
        xc = x - mu
        var = jnp.mean(xc * xc, axis=-1, keepdims=True)
        xn_ref[...] = (xc * jax.lax.rsqrt(var + eps)).astype(jnp.bfloat16)

    acc = jnp.dot(xn_ref[...], w_ref[...], preferred_element_type=jnp.float32)
    o_ref[...] = (acc + b_ref[...]).astype(o_ref.dtype)


def ln_linear(x2d, eps, w_t, b, *, out_dtype=jnp.float32,
              tm_target=256, tn_target=256):
    M, K = x2d.shape
    N = w_t.shape[1]
    tm = _pick_tile(M, tm_target, 16)
    tn = _pick_tile(N, tn_target, 128)
    return pl.pallas_call(
        partial(_ln_linear_kernel, eps=eps),
        out_shape=jax.ShapeDtypeStruct((M, N), out_dtype),
        grid=(M // tm, N // tn),
        in_specs=[pl.BlockSpec((tm, K), lambda i, j: (i, 0)),
                  pl.BlockSpec((K, tn), lambda i, j: (0, j)),
                  pl.BlockSpec((1, tn), lambda i, j: (0, j))],
        out_specs=pl.BlockSpec((tm, tn), lambda i, j: (i, j)),
        scratch_shapes=[pltpu.VMEM((tm, K), jnp.bfloat16)],
        compiler_params=pltpu.CompilerParams(
            dimension_semantics=("parallel", "arbitrary")),
    )(x2d, w_t, b.reshape(1, N))


# ---------------------------------------------------------------------------
# fused LayerNorm + kv projection -> two separate lane-dense bf16 outputs (k, v)
# ---------------------------------------------------------------------------

def _ln_linear_kv_kernel(x_ref, wk_ref, bk_ref, wv_ref, bv_ref,
                         k_ref, v_ref, xn_ref, *, eps):
    @pl.when(pl.program_id(1) == 0)
    def _norm():
        x = x_ref[...].astype(jnp.float32)
        mu = jnp.mean(x, axis=-1, keepdims=True)
        xc = x - mu
        var = jnp.mean(xc * xc, axis=-1, keepdims=True)
        xn_ref[...] = (xc * jax.lax.rsqrt(var + eps)).astype(jnp.bfloat16)

    xn = xn_ref[...]
    k_ref[...] = (jnp.dot(xn, wk_ref[...], preferred_element_type=jnp.float32)
                  + bk_ref[...]).astype(k_ref.dtype)
    v_ref[...] = (jnp.dot(xn, wv_ref[...], preferred_element_type=jnp.float32)
                  + bv_ref[...]).astype(v_ref.dtype)


def ln_linear_kv(x2d, eps, wk, bk, wv, bv, *, tm_target=256, tn_target=256):
    M, K = x2d.shape
    N = wk.shape[1]
    tm = _pick_tile(M, tm_target, 16)
    tn = _pick_tile(N, tn_target, 128)
    out_sds = jax.ShapeDtypeStruct((M, N), jnp.bfloat16)
    return pl.pallas_call(
        partial(_ln_linear_kv_kernel, eps=eps),
        out_shape=(out_sds, out_sds),
        grid=(M // tm, N // tn),
        in_specs=[pl.BlockSpec((tm, K), lambda i, j: (i, 0)),
                  pl.BlockSpec((K, tn), lambda i, j: (0, j)),
                  pl.BlockSpec((1, tn), lambda i, j: (0, j)),
                  pl.BlockSpec((K, tn), lambda i, j: (0, j)),
                  pl.BlockSpec((1, tn), lambda i, j: (0, j))],
        out_specs=(pl.BlockSpec((tm, tn), lambda i, j: (i, j)),
                   pl.BlockSpec((tm, tn), lambda i, j: (i, j))),
        scratch_shapes=[pltpu.VMEM((tm, K), jnp.bfloat16)],
        compiler_params=pltpu.CompilerParams(
            dimension_semantics=("parallel", "arbitrary")),
    )(x2d, wk, bk.reshape(1, N), wv, bv.reshape(1, N))


# ---------------------------------------------------------------------------
# spatial-reduction conv = patchify + per-chunk LayerNorm + tiled matmul
# (gamma/beta pre-folded into the conv weight; per-chunk stats via VPU slice sums)
# ---------------------------------------------------------------------------

def _chunkln_linear_kernel(x_ref, w_ref, b_ref, o_ref, acc_ref, *, eps, C, pk):
    @pl.when(pl.program_id(2) == 0)
    def _init():
        acc_ref[...] = jnp.zeros_like(acc_ref)

    x = x_ref[...].astype(jnp.float32)                        # (tm, pk*C)
    parts = []
    for p in range(pk):                                       # static per-chunk LN
        chunk = x[:, p * C:(p + 1) * C]
        mu = jnp.mean(chunk, axis=-1, keepdims=True)
        xc = chunk - mu
        var = jnp.mean(xc * xc, axis=-1, keepdims=True)
        parts.append((xc * jax.lax.rsqrt(var + eps)).astype(jnp.bfloat16))
    xn = parts[0] if pk == 1 else jnp.concatenate(parts, axis=-1)
    acc_ref[...] += jnp.dot(xn, w_ref[...], preferred_element_type=jnp.float32)

    @pl.when(pl.program_id(2) == pl.num_programs(2) - 1)
    def _fin():
        o_ref[...] = (acc_ref[...] + b_ref[...]).astype(o_ref.dtype)


def chunkln_linear(xp, eps, w_t, b, P, C, *, tm_target=256, tn_target=256):
    M, K = xp.shape                                           # K = P * C
    N = w_t.shape[1]
    tm = _pick_tile(M, tm_target, 16)
    tn = _pick_tile(N, tn_target, 128)
    # chunks per K tile: largest divisor of P keeping the f32 x tile narrow (<= ~1024)
    pk = 1
    for cand in range(1, P + 1):
        if P % cand == 0 and cand * C <= max(C, 1024):
            pk = cand
    tk = pk * C
    return pl.pallas_call(
        partial(_chunkln_linear_kernel, eps=eps, C=C, pk=pk),
        out_shape=jax.ShapeDtypeStruct((M, N), jnp.bfloat16),
        grid=(M // tm, N // tn, K // tk),
        in_specs=[pl.BlockSpec((tm, tk), lambda i, j, k: (i, k)),
                  pl.BlockSpec((tk, tn), lambda i, j, k: (k, j)),
                  pl.BlockSpec((1, tn), lambda i, j, k: (0, j))],
        out_specs=pl.BlockSpec((tm, tn), lambda i, j, k: (i, j)),
        scratch_shapes=[pltpu.VMEM((tm, tn), jnp.float32)],
        compiler_params=pltpu.CompilerParams(
            dimension_semantics=("parallel", "parallel", "arbitrary")),
    )(xp, w_t, b.reshape(1, N))


# ---------------------------------------------------------------------------
# attention: q-row tiled, heads packed in the channel dim; per-head slice stores
# (scale and norm1 gamma/beta are folded into the q projection weights)
# ---------------------------------------------------------------------------

def _attention_kernel(q_ref, k_ref, v_ref, o_ref, *, num_heads, dh):
    for hh in range(num_heads):                               # static unroll over heads
        sl = slice(hh * dh, (hh + 1) * dh)
        qh = q_ref[0, :, sl]                                  # (tq, dh) bf16
        kh = k_ref[0, :, sl]                                  # (Nk, dh) bf16
        s = jax.lax.dot_general(qh, kh, (((1,), (1,)), ((), ())),
                                preferred_element_type=jnp.float32)
        s = s - jnp.max(s, axis=-1, keepdims=True)
        p = jnp.exp(s)
        p = p * pl.reciprocal(jnp.sum(p, axis=-1, keepdims=True), approx=True)
        o_ref[0, :, sl] = jnp.dot(p.astype(jnp.bfloat16), v_ref[0, :, sl],
                                  preferred_element_type=jnp.float32
                                  ).astype(o_ref.dtype)


def attention(q, k, v, num_heads, *, tq_target=256):
    """q: (B, N, C) bf16; k, v: (B, Nk, C) bf16 -> (B, N, C) bf16, heads packed in C."""
    # TODO(synk): stream K/V tiles with online softmax for extreme Nk; Segformer's
    # spatial reduction keeps Nk small so full-KV per q-tile is used here.
    B, N, C = q.shape
    Nk = k.shape[1]
    dh = C // num_heads
    tq = _pick_tile(N, tq_target, 16)
    return pl.pallas_call(
        partial(_attention_kernel, num_heads=num_heads, dh=dh),
        out_shape=jax.ShapeDtypeStruct((B, N, C), jnp.bfloat16),
        grid=(B, N // tq),
        in_specs=[pl.BlockSpec((1, tq, C), lambda b, i: (b, i, 0)),
                  pl.BlockSpec((1, Nk, C), lambda b, i: (b, 0, 0)),
                  pl.BlockSpec((1, Nk, C), lambda b, i: (b, 0, 0))],
        out_specs=pl.BlockSpec((1, tq, C), lambda b, i: (b, i, 0)),
        compiler_params=pltpu.CompilerParams(
            dimension_semantics=("parallel", "parallel"),
            vmem_limit_bytes=32 * 1024 * 1024),
    )(q, k, v)


# ---------------------------------------------------------------------------
# depthwise 3x3 conv + exact GELU, row- and channel-tiled with in-kernel halos
# (no host-side padding of the full intermediate; bf16 output)
# ---------------------------------------------------------------------------

def _dwconv_gelu_kernel(xm_ref, xt_ref, xb_ref, w_ref, b_ref, o_ref, *, TR, W):
    i = pl.program_id(1)
    last = pl.num_programs(1) - 1
    x = xm_ref[0].astype(jnp.float32)                         # (TR, W, tc)
    top = jnp.where(i > 0, xt_ref[0].astype(jnp.float32), 0.0)      # (1, W, tc)
    bot = jnp.where(i < last, xb_ref[0].astype(jnp.float32), 0.0)   # (1, W, tc)
    xw = jnp.concatenate([top, x, bot], axis=0)               # (TR+2, W, tc)
    zc = jnp.zeros((TR + 2, 1, xw.shape[-1]), jnp.float32)
    xw = jnp.concatenate([zc, xw, zc], axis=1)                # (TR+2, W+2, tc)
    wts = w_ref[...].astype(jnp.float32)                      # (9, tc)
    acc = jnp.zeros((TR, W, xw.shape[-1]), jnp.float32)
    for dy in range(3):
        for dx in range(3):
            acc = acc + xw[dy:dy + TR, dx:dx + W, :] * wts[dy * 3 + dx]
    acc = acc + b_ref[...]
    # exact (erf) GELU to match F.gelu default
    o_ref[0] = (0.5 * acc * (1.0 + jax.lax.erf(acc * 0.7071067811865476))
                ).astype(o_ref.dtype)


def dwconv_gelu(x_nhwc, w9c, bias, *, tr_target=16, tc_target=128):
    B, H, W, C = x_nhwc.shape
    tc = _pick_tile(C, tc_target, 128)
    tr = _pick_tile(H, tr_target, 1)
    return pl.pallas_call(
        partial(_dwconv_gelu_kernel, TR=tr, W=W),
        out_shape=jax.ShapeDtypeStruct((B, H, W, C), jnp.bfloat16),
        grid=(B, H // tr, C // tc),
        in_specs=[
            pl.BlockSpec((1, tr, W, tc), lambda b, i, c: (b, i, 0, c)),
            # one-row halos above/below (row index clamped at edges; zeroed in-kernel)
            pl.BlockSpec((1, 1, W, tc),
                         lambda b, i, c: (b, jnp.maximum(i * tr - 1, 0), 0, c)),
            pl.BlockSpec((1, 1, W, tc),
                         lambda b, i, c: (b, jnp.minimum(i * tr + tr, H - 1), 0, c)),
            pl.BlockSpec((9, tc), lambda b, i, c: (0, c)),
            pl.BlockSpec((1, tc), lambda b, i, c: (0, c)),
        ],
        out_specs=pl.BlockSpec((1, tr, W, tc), lambda b, i, c: (b, i, 0, c)),
        compiler_params=pltpu.CompilerParams(
            dimension_semantics=("parallel", "parallel", "parallel")),
    )(x_nhwc, x_nhwc, x_nhwc, w9c, bias.reshape(1, C))


# ---------------------------------------------------------------------------
# transformer_block forward
# ---------------------------------------------------------------------------

def transformer_block_forward(x, h, w, p, num_heads, sr_ratio):
    B, N, C = x.shape
    x2d = x.reshape(B * N, C)

    # ---------------- attention branch ----------------
    # q = Linear(norm1(x)); norm1 gamma/beta and the attention scale are folded into q_w/q_b
    q2d = ln_linear(x2d, 1e-6, p["q_w"], p["q_b"], out_dtype=jnp.bfloat16)   # (B*N, C)

    if sr_ratio > 1:
        hs, ws = h // sr_ratio, w // sr_ratio
        Nk = hs * ws
        P = sr_ratio * sr_ratio
        # spatial-reduction conv (kernel=stride=sr) == patchify + per-token norm1 + matmul
        xp = x.reshape(B, hs, sr_ratio, ws, sr_ratio, C)
        xp = xp.transpose(0, 1, 3, 2, 4, 5).reshape(B * Nk, P * C)
        x_sr = chunkln_linear(xp, 1e-6, p["sr_w"], p["sr_b"], P, C)          # bf16 (B*Nk, C)
        kv_in, kv_eps = x_sr, 1e-5                                           # srnorm eps
    else:
        Nk = N
        kv_in, kv_eps = x2d, 1e-6                                            # norm1 eps

    k2d, v2d = ln_linear_kv(kv_in, kv_eps, p["kv_wk"], p["kv_bk"],
                            p["kv_wv"], p["kv_bv"])                          # bf16

    o = attention(q2d.reshape(B, N, C), k2d.reshape(B, Nk, C),
                  v2d.reshape(B, Nk, C), num_heads)                          # bf16 (B,N,C)

    # proj + residual fused; dropout/drop_path are identity in eval mode
    x_attn = linear(o.reshape(B * N, C), p["proj_w"], p["proj_b"],
                    residual=x2d)                                            # f32 (B*N, C)

    # ---------------- mix-FFN branch ----------------
    hid = p["fc1_w"].shape[1]
    h1 = ln_linear(x_attn, 1e-6, p["fc1_w"], p["fc1_b"],
                   out_dtype=jnp.bfloat16)                                   # bf16 (B*N, hid)
    hmap = dwconv_gelu(h1.reshape(B, h, w, hid), p["dw_w"], p["dw_b"])       # bf16 (B,h,w,hid)
    out2d = linear(hmap.reshape(B * N, hid), p["fc2_w"], p["fc2_b"],
                   residual=x_attn)                                          # f32
    return out2d.reshape(B, N, C)


# ---------------------------------------------------------------------------
# deterministic raw parameters (shapes follow the PyTorch __init__)
# ---------------------------------------------------------------------------

def init_params(key, dim, sr_ratio):
    hid = dim * 4
    ks = jax.random.split(key, 20)

    def wn(k, shape, scale=0.05):
        return (scale * jax.random.normal(k, shape)).astype(jnp.float32)

    r = {}
    r["norm1_g"] = 1.0 + wn(ks[0], (dim,)); r["norm1_b"] = wn(ks[1], (dim,))
    r["norm2_g"] = 1.0 + wn(ks[2], (dim,)); r["norm2_b"] = wn(ks[3], (dim,))
    if sr_ratio > 1:
        # sr conv (torch layout (co, ci, kh, kw)) -> flat (kh*kw*ci, co)
        sr_w_t = wn(ks[4], (dim, dim, sr_ratio, sr_ratio))
        r["sr_w"] = sr_w_t.transpose(2, 3, 1, 0).reshape(sr_ratio * sr_ratio * dim, dim)
        r["sr_b"] = wn(ks[5], (dim,))
        r["srnorm_g"] = 1.0 + wn(ks[6], (dim,)); r["srnorm_b"] = wn(ks[7], (dim,))
    # q / kv / proj linears, stored transposed (in, out)
    r["q_w"] = wn(ks[8], (dim, dim)); r["q_b"] = wn(ks[9], (dim,))
    r["kv_w"] = wn(ks[10], (dim, 2 * dim)); r["kv_b"] = wn(ks[11], (2 * dim,))
    r["proj_w"] = wn(ks[12], (dim, dim)); r["proj_b"] = wn(ks[13], (dim,))
    # FFN
    r["fc1_w"] = wn(ks[14], (dim, hid)); r["fc1_b"] = wn(ks[15], (hid,))
    r["fc2_w"] = wn(ks[16], (hid, dim)); r["fc2_b"] = wn(ks[17], (dim,))
    # depthwise conv (torch layout (hid, 1, 3, 3)) -> (9, hid), f32 (VPU path)
    dw_t = wn(ks[18], (hid, 1, 3, 3))
    r["dw_w"] = dw_t[:, 0].transpose(1, 2, 0).reshape(9, hid)
    r["dw_b"] = wn(ks[19], (hid,))
    return r


def fold_params(raw, dim, num_heads, sr_ratio):
    """Fold LayerNorm gamma/beta and the attention scale into the consumer matmul
    weights/biases (exact algebraic rewrite); cast matmul weights to bf16."""
    scale = float(dim // num_heads) ** -0.5
    g1, b1 = raw["norm1_g"], raw["norm1_b"]
    g2, b2 = raw["norm2_g"], raw["norm2_b"]
    p = {}

    qw = raw["q_w"]
    p["q_w"] = ((g1[:, None] * qw) * scale).astype(jnp.bfloat16)
    p["q_b"] = (raw["q_b"] + b1 @ qw) * scale

    if sr_ratio > 1:
        P = sr_ratio * sr_ratio
        srw = raw["sr_w"]                                       # (P*C, C)
        gP, bP = jnp.tile(g1, P), jnp.tile(b1, P)
        p["sr_w"] = (gP[:, None] * srw).astype(jnp.bfloat16)
        p["sr_b"] = raw["sr_b"] + bP @ srw
        gk, bk = raw["srnorm_g"], raw["srnorm_b"]
    else:
        gk, bk = g1, b1
    kvw = raw["kv_w"]                                           # (C, 2C)
    kvw_eff = gk[:, None] * kvw
    kvb_eff = raw["kv_b"] + bk @ kvw
    p["kv_wk"] = kvw_eff[:, :dim].astype(jnp.bfloat16); p["kv_bk"] = kvb_eff[:dim]
    p["kv_wv"] = kvw_eff[:, dim:].astype(jnp.bfloat16); p["kv_bv"] = kvb_eff[dim:]

    p["proj_w"] = raw["proj_w"].astype(jnp.bfloat16)
    p["proj_b"] = raw["proj_b"]

    f1w = raw["fc1_w"]
    p["fc1_w"] = (g2[:, None] * f1w).astype(jnp.bfloat16)
    p["fc1_b"] = raw["fc1_b"] + b2 @ f1w
    p["fc2_w"] = raw["fc2_w"].astype(jnp.bfloat16)
    p["fc2_b"] = raw["fc2_b"]

    p["dw_w"] = raw["dw_w"]
    p["dw_b"] = raw["dw_b"]
    return p


if __name__ == "__main__":
    B, dim, num_heads, sr_ratio = 2, 32, 2, 2
    h = w = 8
    N = h * w

    key = jax.random.PRNGKey(0)
    pkey, xkey = jax.random.split(key)
    raw = init_params(pkey, dim, sr_ratio)
    params = fold_params(raw, dim, num_heads, sr_ratio)
    x = jax.random.normal(xkey, (B, N, dim), dtype=jnp.float32)

    fwd = jax.jit(transformer_block_forward, static_argnums=(1, 2, 4, 5))
    out = fwd(x, h, w, params, num_heads, sr_ratio)
    out = jax.block_until_ready(out)

    assert out.shape == (B, N, dim), out.shape
    assert bool(jnp.all(jnp.isfinite(out)))
    print("KERNEL_OK")
</pallas_src>

<mosaic_0001>
module attributes {stable_mosaic.version = 11 : i64} {
  func.func @_ln_linear_kernel(%arg0: i32, %arg1: i32, %arg2: memref<128x32xf32, #tpu.memory_space<vmem>>, %arg3: memref<32x32xbf16, #tpu.memory_space<vmem>>, %arg4: memref<1x32xf32, #tpu.memory_space<vmem>>, %arg5: memref<128x32xbf16, #tpu.memory_space<vmem>>, %arg6: memref<128x32xbf16, #tpu.memory_space<vmem>>) attributes {dimension_semantics = [#tpu.dimension_semantics<parallel>, #tpu.dimension_semantics<arbitrary>], iteration_bounds = array<i64: 1, 1>, scalar_prefetch = 0 : i64, scratch_operands = 1 : i64, tpu.core_type = #tpu.core_type<tc>, window_params = [{transform_indices = @transform_0, window_bounds = array<i64: 128, 32>}, {transform_indices = @transform_1, window_bounds = array<i64: 32, 32>}, {transform_indices = @transform_2, window_bounds = array<i64: 1, 32>}, {transform_indices = @transform_3, window_bounds = array<i64: 128, 32>}]} {
    %c0_i32 = arith.constant 0 : i32
    %0 = arith.cmpi eq, %arg1, %c0_i32 : i32
    %1 = arith.extui %0 : i1 to i32
    %c0_i32_0 = arith.constant 0 : i32
    %2 = arith.cmpi ne, %1, %c0_i32_0 : i32
    scf.if %2 {
      %c0_8 = arith.constant 0 : index
      %c0_9 = arith.constant 0 : index
      %11 = vector.load %arg2[%c0_8, %c0_9] : memref<128x32xf32, #tpu.memory_space<vmem>>, vector<128x32xf32>
      %cst_10 = arith.constant dense<0.000000e+00> : vector<128xf32>
      %12 = vector.multi_reduction <add>, %11, %cst_10 [1] : vector<128x32xf32> to vector<128xf32>
      %13 = vector.shape_cast %12 : vector<128xf32> to vector<128x1xf32>
      %cst_11 = arith.constant 3.200000e+01 : f32
      %14 = vector.broadcast %cst_11 : f32 to vector<128x1xf32>
      %15 = arith.divf %13, %14 : vector<128x1xf32>
      %16 = vector.broadcast %15 : vector<128x1xf32> to vector<128x32xf32>
      %17 = arith.subf %11, %16 : vector<128x32xf32>
      %18 = arith.mulf %17, %17 : vector<128x32xf32>
      %cst_12 = arith.constant dense<0.000000e+00> : vector<128xf32>
      %19 = vector.multi_reduction <add>, %18, %cst_12 [1] : vector<128x32xf32> to vector<128xf32>
      %20 = vector.shape_cast %19 : vector<128xf32> to vector<128x1xf32>
      %cst_13 = arith.constant 3.200000e+01 : f32
      %21 = vector.broadcast %cst_13 : f32 to vector<128x1xf32>
      %22 = arith.divf %20, %21 : vector<128x1xf32>
      %cst_14 = arith.constant 9.99999997E-7 : f32
      %23 = vector.broadcast %cst_14 : f32 to vector<128x1xf32>
      %24 = arith.addf %22, %23 : vector<128x1xf32>
      %25 = math.rsqrt %24 : vector<128x1xf32>
      %26 = vector.broadcast %25 : vector<128x1xf32> to vector<128x32xf32>
      %27 = arith.mulf %17, %26 : vector<128x32xf32>
      %28 = arith.truncf %27 : vector<128x32xf32> to vector<128x32xbf16>
      %c0_15 = arith.constant 0 : index
      %c0_16 = arith.constant 0 : index
      %29 = vector.load %arg6[%c0_15, %c0_16] : memref<128x32xbf16, #tpu.memory_space<vmem>>, vector<128x32xbf16>
      tpu.vector_store %arg6[%c0_15, %c0_16], %28 {strides = array<i32>} : memref<128x32xbf16, #tpu.memory_space<vmem>>, vector<128x32xbf16>,
    } else {
    }
    %c0 = arith.constant 0 : index
    %c0_1 = arith.constant 0 : index
    %3 = vector.load %arg6[%c0, %c0_1] : memref<128x32xbf16, #tpu.memory_space<vmem>>, vector<128x32xbf16>
    %c0_2 = arith.constant 0 : index
    %c0_3 = arith.constant 0 : index
    %4 = vector.load %arg3[%c0_2, %c0_3] : memref<32x32xbf16, #tpu.memory_space<vmem>>, vector<32x32xbf16>
    %cst = arith.constant dense<0.000000e+00> : vector<128x32xf32>
    %5 = tpu.matmul %3, %4, %cst {dimension_numbers = #tpu.dot_dimension_numbers<[1], [0], [0], [1], [0, 0, 1, 1], [], []>} : vector<128x32xbf16>, vector<32x32xbf16>, vector<128x32xf32> -> vector<128x32xf32>
    %c0_4 = arith.constant 0 : index
    %c0_5 = arith.constant 0 : index
    %6 = vector.load %arg4[%c0_4, %c0_5] : memref<1x32xf32, #tpu.memory_space<vmem>>, vector<1x32xf32>
    %7 = vector.broadcast %6 : vector<1x32xf32> to vector<128x32xf32>
    %8 = arith.addf %5, %7 : vector<128x32xf32>
    %9 = arith.truncf %8 : vector<128x32xf32> to vector<128x32xbf16>
    %c0_6 = arith.constant 0 : index
    %c0_7 = arith.constant 0 : index
    %10 = vector.load %arg5[%c0_6, %c0_7] : memref<128x32xbf16, #tpu.memory_space<vmem>>, vector<128x32xbf16>
    tpu.vector_store %arg5[%c0_6, %c0_7], %9 {strides = array<i32>} : memref<128x32xbf16, #tpu.memory_space<vmem>>, vector<128x32xbf16>,
    return
  }
  func.func @transform_0(%arg0: i32, %arg1: i32) -> (i32, i32) {
    %c0_i32 = arith.constant 0 : i32
    %c0_i32_0 = arith.constant 0 : i32
    return %arg0, %c0_i32 : i32, i32
  }
  func.func @transform_1(%arg0: i32, %arg1: i32) -> (i32, i32) {
    %c0_i32 = arith.constant 0 : i32
    %c0_i32_0 = arith.constant 0 : i32
    return %c0_i32, %arg1 : i32, i32
  }
  func.func @transform_2(%arg0: i32, %arg1: i32) -> (i32, i32) {
    %c0_i32 = arith.constant 0 : i32
    %c0_i32_0 = arith.constant 0 : i32
    return %c0_i32, %arg1 : i32, i32
  }
  func.func @transform_3(%arg0: i32, %arg1: i32) -> (i32, i32) {
    %c0_i32 = arith.constant 0 : i32
    return %arg0, %arg1 : i32, i32
  }
}

module attributes {stable_mosaic.version = 11 : i64} {
  func.func @_ln_linear_kv_kernel(%arg0: i32, %arg1: i32, %arg2: memref<32x32xbf16, #tpu.memory_space<vmem>>, %arg3: memref<32x32xbf16, #tpu.memory_space<vmem>>, %arg4: memref<1x32xf32, #tpu.memory_space<vmem>>, %arg5: memref<32x32xbf16, #tpu.memory_space<vmem>>, %arg6: memref<1x32xf32, #tpu.memory_space<vmem>>, %arg7: memref<32x32xbf16, #tpu.memory_space<vmem>>, %arg8: memref<32x32xbf16, #tpu.memory_space<vmem>>, %arg9: memref<32x32xbf16, #tpu.memory_space<vmem>>) attributes {dimension_semantics = [#tpu.dimension_semantics<parallel>, #tpu.dimension_semantics<arbitrary>], iteration_bounds = array<i64: 1, 1>, scalar_prefetch = 0 : i64, scratch_operands = 1 : i64, tpu.core_type = #tpu.core_type<tc>, window_params = [{transform_indices = @transform_0, window_bounds = array<i64: 32, 32>}, {transform_indices = @transform_1, window_bounds = array<i64: 32, 32>}, {transform_indices = @transform_2, window_bounds = array<i64: 1, 32>}, {transform_indices = @transform_3, window_bounds = array<i64: 32, 32>}, {transform_indices = @transform_4, window_bounds = array<i64: 1, 32>}, {transform_indices = @transform_5, window_bounds = array<i64: 32, 32>}, {transform_indices = @transform_6, window_bounds = array<i64: 32, 32>}]} {
    %c0_i32 = arith.constant 0 : i32
    %0 = arith.cmpi eq, %arg1, %c0_i32 : i32
    %1 = arith.extui %0 : i1 to i32
    %c0_i32_0 = arith.constant 0 : i32
    %2 = arith.cmpi ne, %1, %c0_i32_0 : i32
    scf.if %2 {
      %c0_15 = arith.constant 0 : index
      %c0_16 = arith.constant 0 : index
      %18 = vector.load %arg2[%c0_15, %c0_16] : memref<32x32xbf16, #tpu.memory_space<vmem>>, vector<32x32xbf16>
      %19 = arith.extf %18 : vector<32x32xbf16> to vector<32x32xf32>
      %cst_17 = arith.constant dense<0.000000e+00> : vector<32xf32>
      %20 = vector.multi_reduction <add>, %19, %cst_17 [1] : vector<32x32xf32> to vector<32xf32>
      %21 = vector.shape_cast %20 : vector<32xf32> to vector<32x1xf32>
      %cst_18 = arith.constant 3.200000e+01 : f32
      %22 = vector.broadcast %cst_18 : f32 to vector<32x1xf32>
      %23 = arith.divf %21, %22 : vector<32x1xf32>
      %24 = vector.broadcast %23 : vector<32x1xf32> to vector<32x32xf32>
      %25 = arith.subf %19, %24 : vector<32x32xf32>
      %26 = arith.mulf %25, %25 : vector<32x32xf32>
      %cst_19 = arith.constant dense<0.000000e+00> : vector<32xf32>
      %27 = vector.multi_reduction <add>, %26, %cst_19 [1] : vector<32x32xf32> to vector<32xf32>
      %28 = vector.shape_cast %27 : vector<32xf32> to vector<32x1xf32>
      %cst_20 = arith.constant 3.200000e+01 : f32
      %29 = vector.broadcast %cst_20 : f32 to vector<32x1xf32>
      %30 = arith.divf %28, %29 : vector<32x1xf32>
      %cst_21 = arith.constant 9.99999974E-6 : f32
      %31 = vector.broadcast %cst_21 : f32 to vector<32x1xf32>
      %32 = arith.addf %30, %31 : vector<32x1xf32>
      %33 = math.rsqrt %32 : vector<32x1xf32>
      %34 = vector.broadcast %33 : vector<32x1xf32> to vector<32x32xf32>
      %35 = arith.mulf %25, %34 : vector<32x32xf32>
      %36 = arith.truncf %35 : vector<32x32xf32> to vector<32x32xbf16>
      %c0_22 = arith.constant 0 : index
      %c0_23 = arith.constant 0 : index
      %37 = vector.load %arg9[%c0_22, %c0_23] : memref<32x32xbf16, #tpu.memory_space<vmem>>, vector<32x32xbf16>
      tpu.vector_store %arg9[%c0_22, %c0_23], %36 {strides = array<i32>} : memref<32x32xbf16, #tpu.memory_space<vmem>>, vector<32x32xbf16>,
    } else {
    }
    %c0 = arith.constant 0 : index
    %c0_1 = arith.constant 0 : index
    %3 = vector.load %arg9[%c0, %c0_1] : memref<32x32xbf16, #tpu.memory_space<vmem>>, vector<32x32xbf16>
    %c0_2 = arith.constant 0 : index
    %c0_3 = arith.constant 0 : index
    %4 = vector.load %arg3[%c0_2, %c0_3] : memref<32x32xbf16, #tpu.memory_space<vmem>>, vector<32x32xbf16>
    %cst = arith.constant dense<0.000000e+00> : vector<32x32xf32>
    %5 = tpu.matmul %3, %4, %cst {dimension_numbers = #tpu.dot_dimension_numbers<[1], [0], [0], [1], [0, 0, 1, 1], [], []>} : vector<32x32xbf16>, vector<32x32xbf16>, vector<32x32xf32> -> vector<32x32xf32>
    %c0_4 = arith.constant 0 : index
    %c0_5 = arith.constant 0 : index
    %6 = vector.load %arg4[%c0_4, %c0_5] : memref<1x32xf32, #tpu.memory_space<vmem>>, vector<1x32xf32>
    %7 = vector.broadcast %6 : vector<1x32xf32> to vector<32x32xf32>
    %8 = arith.addf %5, %7 : vector<32x32xf32>
    %9 = arith.truncf %8 : vector<32x32xf32> to vector<32x32xbf16>
    %c0_6 = arith.constant 0 : index
    %c0_7 = arith.constant 0 : index
    %10 = vector.load %arg7[%c0_6, %c0_7] : memref<32x32xbf16, #tpu.memory_space<vmem>>, vector<32x32xbf16>
    tpu.vector_store %arg7[%c0_6, %c0_7], %9 {strides = array<i32>} : memref<32x32xbf16, #tpu.memory_space<vmem>>, vector<32x32xbf16>,
    %c0_8 = arith.constant 0 : index
    %c0_9 = arith.constant 0 : index
    %11 = vector.load %arg5[%c0_8, %c0_9] : memref<32x32xbf16, #tpu.memory_space<vmem>>, vector<32x32xbf16>
    %cst_10 = arith.constant dense<0.000000e+00> : vector<32x32xf32>
    %12 = tpu.matmul %3, %11, %cst_10 {dimension_numbers = #tpu.dot_dimension_numbers<[1], [0], [0], [1], [0, 0, 1, 1], [], []>} : vector<32x32xbf16>, vector<32x32xbf16>, vector<32x32xf32> -> vector<32x32xf32>
    %c0_11 = arith.constant 0 : index
    %c0_12 = arith.constant 0 : index
    %13 = vector.load %arg6[%c0_11, %c0_12] : memref<1x32xf32, #tpu.memory_space<vmem>>, vector<1x32xf32>
    %14 = vector.broadcast %13 : vector<1x32xf32> to vector<32x32xf32>
    %15 = arith.addf %12, %14 : vector<32x32xf32>
    %16 = arith.truncf %15 : vector<32x32xf32> to vector<32x32xbf16>
    %c0_13 = arith.constant 0 : index
    %c0_14 = arith.constant 0 : index
    %17 = vector.load %arg8[%c0_13, %c0_14] : memref<32x32xbf16, #tpu.memory_space<vmem>>, vector<32x32xbf16>
    tpu.vector_store %arg8[%c0_13, %c0_14], %16 {strides = array<i32>} : memref<32x32xbf16, #tpu.memory_space<vmem>>, vector<32x32xbf16>,
    return
  }
  func.func @transform_0(%arg0: i32, %arg1: i32) -> (i32, i32) {
    %c0_i32 = arith.constant 0 : i32
    %c0_i32_0 = arith.constant 0 : i32
    return %arg0, %c0_i32 : i32, i32
  }
  func.func @transform_1(%arg0: i32, %arg1: i32) -> (i32, i32) {
    %c0_i32 = arith.constant 0 : i32
    %c0_i32_0 = arith.constant 0 : i32
    return %c0_i32, %arg1 : i32, i32
  }
  func.func @transform_2(%arg0: i32, %arg1: i32) -> (i32, i32) {
    %c0_i32 = arith.constant 0 : i32
    %c0_i32_0 = arith.constant 0 : i32
    return %c0_i32, %arg1 : i32, i32
  }
  func.func @transform_3(%arg0: i32, %arg1: i32) -> (i32, i32) {
    %c0_i32 = arith.constant 0 : i32
    %c0_i32_0 = arith.constant 0 : i32
    return %c0_i32, %arg1 : i32, i32
  }
  func.func @transform_4(%arg0: i32, %arg1: i32) -> (i32, i32) {
    %c0_i32 = arith.constant 0 : i32
    %c0_i32_0 = arith.constant 0 : i32
    return %c0_i32, %arg1 : i32, i32
  }
  func.func @transform_5(%arg0: i32, %arg1: i32) -> (i32, i32) {
    %c0_i32 = arith.constant 0 : i32
    return %arg0, %arg1 : i32, i32
  }
  func.func @transform_6(%arg0: i32, %arg1: i32) -> (i32, i32) {
    %c0_i32 = arith.constant 0 : i32
    return %arg0, %arg1 : i32, i32
  }
}

module attributes {stable_mosaic.version = 11 : i64} {
  func.func @_chunkln_linear_kernel(%arg0: i32, %arg1: i32, %arg2: i32, %arg3: memref<32x128xf32, #tpu.memory_space<vmem>>, %arg4: memref<128x32xbf16, #tpu.memory_space<vmem>>, %arg5: memref<1x32xf32, #tpu.memory_space<vmem>>, %arg6: memref<32x32xbf16, #tpu.memory_space<vmem>>, %arg7: memref<32x32xf32, #tpu.memory_space<vmem>>) attributes {dimension_semantics = [#tpu.dimension_semantics<parallel>, #tpu.dimension_semantics<parallel>, #tpu.dimension_semantics<arbitrary>], iteration_bounds = array<i64: 1, 1, 1>, scalar_prefetch = 0 : i64, scratch_operands = 1 : i64, tpu.core_type = #tpu.core_type<tc>, window_params = [{transform_indices = @transform_0, window_bounds = array<i64: 32, 128>}, {transform_indices = @transform_1, window_bounds = array<i64: 128, 32>}, {transform_indices = @transform_2, window_bounds = array<i64: 1, 32>}, {transform_indices = @transform_3, window_bounds = array<i64: 32, 32>}]} {
    %c0_i32 = arith.constant 0 : i32
    %0 = arith.cmpi eq, %arg2, %c0_i32 : i32
    %1 = arith.extui %0 : i1 to i32
    %c0_i32_0 = arith.constant 0 : i32
    %2 = arith.cmpi ne, %1, %c0_i32_0 : i32
    scf.if %2 {
      %cst_30 = arith.constant 0.000000e+00 : f32
      %85 = vector.broadcast %cst_30 : f32 to vector<32x32xf32>
      %c0_31 = arith.constant 0 : index
      %c0_32 = arith.constant 0 : index
      %86 = vector.load %arg7[%c0_31, %c0_32] : memref<32x32xf32, #tpu.memory_space<vmem>>, vector<32x32xf32>
      tpu.vector_store %arg7[%c0_31, %c0_32], %85 {strides = array<i32>} : memref<32x32xf32, #tpu.memory_space<vmem>>, vector<32x32xf32>,
    } else {
    }
    %c0 = arith.constant 0 : index
    %c0_1 = arith.constant 0 : index
    %3 = vector.load %arg3[%c0, %c0_1] : memref<32x128xf32, #tpu.memory_space<vmem>>, vector<32x128xf32>
    %4 = vector.extract_strided_slice %3 {offsets = [0, 0], sizes = [32, 32], strides = [1, 1]} : vector<32x128xf32> to vector<32x32xf32>
    %cst = arith.constant dense<0.000000e+00> : vector<32xf32>
    %5 = vector.multi_reduction <add>, %4, %cst [1] : vector<32x32xf32> to vector<32xf32>
    %6 = vector.shape_cast %5 : vector<32xf32> to vector<32x1xf32>
    %cst_2 = arith.constant 3.200000e+01 : f32
    %7 = vector.broadcast %cst_2 : f32 to vector<32x1xf32>
    %8 = arith.divf %6, %7 : vector<32x1xf32>
    %9 = vector.broadcast %8 : vector<32x1xf32> to vector<32x32xf32>
    %10 = arith.subf %4, %9 : vector<32x32xf32>
    %11 = arith.mulf %10, %10 : vector<32x32xf32>
    %cst_3 = arith.constant dense<0.000000e+00> : vector<32xf32>
    %12 = vector.multi_reduction <add>, %11, %cst_3 [1] : vector<32x32xf32> to vector<32xf32>
    %13 = vector.shape_cast %12 : vector<32xf32> to vector<32x1xf32>
    %cst_4 = arith.constant 3.200000e+01 : f32
    %14 = vector.broadcast %cst_4 : f32 to vector<32x1xf32>
    %15 = arith.divf %13, %14 : vector<32x1xf32>
    %cst_5 = arith.constant 9.99999997E-7 : f32
    %16 = vector.broadcast %cst_5 : f32 to vector<32x1xf32>
    %17 = arith.addf %15, %16 : vector<32x1xf32>
    %18 = math.rsqrt %17 : vector<32x1xf32>
    %19 = vector.broadcast %18 : vector<32x1xf32> to vector<32x32xf32>
    %20 = arith.mulf %10, %19 : vector<32x32xf32>
    %21 = arith.truncf %20 : vector<32x32xf32> to vector<32x32xbf16>
    %22 = vector.extract_strided_slice %3 {offsets = [0, 32], sizes = [32, 32], strides = [1, 1]} : vector<32x128xf32> to vector<32x32xf32>
    %cst_6 = arith.constant dense<0.000000e+00> : vector<32xf32>
    %23 = vector.multi_reduction <add>, %22, %cst_6 [1] : vector<32x32xf32> to vector<32xf32>
    %24 = vector.shape_cast %23 : vector<32xf32> to vector<32x1xf32>
    %cst_7 = arith.constant 3.200000e+01 : f32
    %25 = vector.broadcast %cst_7 : f32 to vector<32x1xf32>
    %26 = arith.divf %24, %25 : vector<32x1xf32>
    %27 = vector.broadcast %26 : vector<32x1xf32> to vector<32x32xf32>
    %28 = arith.subf %22, %27 : vector<32x32xf32>
    %29 = arith.mulf %28, %28 : vector<32x32xf32>
    %cst_8 = arith.constant dense<0.000000e+00> : vector<32xf32>
    %30 = vector.multi_reduction <add>, %29, %cst_8 [1] : vector<32x32xf32> to vector<32xf32>
    %31 = vector.shape_cast %30 : vector<32xf32> to vector<32x1xf32>
    %cst_9 = arith.constant 3.200000e+01 : f32
    %32 = vector.broadcast %cst_9 : f32 to vector<32x1xf32>
    %33 = arith.divf %31, %32 : vector<32x1xf32>
    %cst_10 = arith.constant 9.99999997E-7 : f32
    %34 = vector.broadcast %cst_10 : f32 to vector<32x1xf32>
    %35 = arith.addf %33, %34 : vector<32x1xf32>
    %36 = math.rsqrt %35 : vector<32x1xf32>
    %37 = vector.broadcast %36 : vector<32x1xf32> to vector<32x32xf32>
    %38 = arith.mulf %28, %37 : vector<32x32xf32>
    %39 = arith.truncf %38 : vector<32x32xf32> to vector<32x32xbf16>
    %40 = vector.extract_strided_slice %3 {offsets = [0, 64], sizes = [32, 32], strides = [1, 1]} : vector<32x128xf32> to vector<32x32xf32>
    %cst_11 = arith.constant dense<0.000000e+00> : vector<32xf32>
    %41 = vector.multi_reduction <add>, %40, %cst_11 [1] : vector<32x32xf32> to vector<32xf32>
    %42 = vector.shape_cast %41 : vector<32xf32> to vector<32x1xf32>
    %cst_12 = arith.constant 3.200000e+01 : f32
    %43 = vector.broadcast %cst_12 : f32 to vector<32x1xf32>
    %44 = arith.divf %42, %43 : vector<32x1xf32>
    %45 = vector.broadcast %44 : vector<32x1xf32> to vector<32x32xf32>
    %46 = arith.subf %40, %45 : vector<32x32xf32>
    %47 = arith.mulf %46, %46 : vector<32x32xf32>
    %cst_13 = arith.constant dense<0.000000e+00> : vector<32xf32>
    %48 = vector.multi_reduction <add>, %47, %cst_13 [1] : vector<32x32xf32> to vector<32xf32>
    %49 = vector.shape_cast %48 : vector<32xf32> to vector<32x1xf32>
    %cst_14 = arith.constant 3.200000e+01 : f32
    %50 = vector.broadcast %cst_14 : f32 to vector<32x1xf32>
    %51 = arith.divf %49, %50 : vector<32x1xf32>
    %cst_15 = arith.constant 9.99999997E-7 : f32
    %52 = vector.broadcast %cst_15 : f32 to vector<32x1xf32>
    %53 = arith.addf %51, %52 : vector<32x1xf32>
    %54 = math.rsqrt %53 : vector<32x1xf32>
    %55 = vector.broadcast %54 : vector<32x1xf32> to vector<32x32xf32>
    %56 = arith.mulf %46, %55 : vector<32x32xf32>
    %57 = arith.truncf %56 : vector<32x32xf32> to vector<32x32xbf16>
    %58 = vector.extract_strided_slice %3 {offsets = [0, 96], sizes = [32, 32], strides = [1, 1]} : vector<32x128xf32> to vector<32x32xf32>
    %cst_16 = arith.constant dense<0.000000e+00> : vector<32xf32>
    %59 = vector.multi_reduction <add>, %58, %cst_16 [1] : vector<32x32xf32> to vector<32xf32>
    %60 = vector.shape_cast %59 : vector<32xf32> to vector<32x1xf32>
    %cst_17 = arith.constant 3.200000e+01 : f32
    %61 = vector.broadcast %cst_17 : f32 to vector<32x1xf32>
    %62 = arith.divf %60, %61 : vector<32x1xf32>
    %63 = vector.broadcast %62 : vector<32x1xf32> to vector<32x32xf32>
    %64 = arith.subf %58, %63 : vector<32x32xf32>
    %65 = arith.mulf %64, %64 : vector<32x32xf32>
    %cst_18 = arith.constant dense<0.000000e+00> : vector<32xf32>
    %66 = vector.multi_reduction <add>, %65, %cst_18 [1] : vector<32x32xf32> to vector<32xf32>
    %67 = vector.shape_cast %66 : vector<32xf32> to vector<32x1xf32>
    %cst_19 = arith.constant 3.200000e+01 : f32
    %68 = vector.broadcast %cst_19 : f32 to vector<32x1xf32>
    %69 = arith.divf %67, %68 : vector<32x1xf32>
    %cst_20 = arith.constant 9.99999997E-7 : f32
    %70 = vector.broadcast %cst_20 : f32 to vector<32x1xf32>
    %71 = arith.addf %69, %70 : vector<32x1xf32>
    %72 = math.rsqrt %71 : vector<32x1xf32>
    %73 = vector.broadcast %72 : vector<32x1xf32> to vector<32x32xf32>
    %74 = arith.mulf %64, %73 : vector<32x32xf32>
    %75 = arith.truncf %74 : vector<32x32xf32> to vector<32x32xbf16>
    %76 = tpu.concatenate %21, %39, %57, %75 in 1 : vector<32x32xbf16>, vector<32x32xbf16>, vector<32x32xbf16>, vector<32x32xbf16> -> vector<32x128xbf16>
    %c0_21 = arith.constant 0 : index
    %c0_22 = arith.constant 0 : index
    %77 = vector.load %arg7[%c0_21, %c0_22] : memref<32x32xf32, #tpu.memory_space<vmem>>, vector<32x32xf32>
    %c0_23 = arith.constant 0 : index
    %c0_24 = arith.constant 0 : index
    %78 = vector.load %arg4[%c0_23, %c0_24] : memref<128x32xbf16, #tpu.memory_space<vmem>>, vector<128x32xbf16>
    %cst_25 = arith.constant dense<0.000000e+00> : vector<32x32xf32>
    %79 = tpu.matmul %76, %78, %cst_25 {dimension_numbers = #tpu.dot_dimension_numbers<[1], [0], [0], [1], [0, 0, 1, 1], [], []>} : vector<32x128xbf16>, vector<128x32xbf16>, vector<32x32xf32> -> vector<32x32xf32>
    %80 = arith.addf %77, %79 : vector<32x32xf32>
    %c0_26 = arith.constant 0 : index
    %c0_27 = arith.constant 0 : index
    %81 = vector.load %arg7[%c0_26, %c0_27] : memref<32x32xf32, #tpu.memory_space<vmem>>, vector<32x32xf32>
    tpu.vector_store %arg7[%c0_26, %c0_27], %80 {strides = array<i32>} : memref<32x32xf32, #tpu.memory_space<vmem>>, vector<32x32xf32>,
    %c0_i32_28 = arith.constant 0 : i32
    %82 = arith.cmpi eq, %arg2, %c0_i32_28 : i32
    %83 = arith.extui %82 : i1 to i32
    %c0_i32_29 = arith.constant 0 : i32
    %84 = arith.cmpi ne, %83, %c0_i32_29 : i32
    scf.if %84 {
      %c0_30 = arith.constant 0 : index
      %c0_31 = arith.constant 0 : index
      %85 = vector.load %arg7[%c0_30, %c0_31] : memref<32x32xf32, #tpu.memory_space<vmem>>, vector<32x32xf32>
      %c0_32 = arith.constant 0 : index
      %c0_33 = arith.constant 0 : index
      %86 = vector.load %arg5[%c0_32, %c0_33] : memref<1x32xf32, #tpu.memory_space<vmem>>, vector<1x32xf32>
      %87 = vector.broadcast %86 : vector<1x32xf32> to vector<32x32xf32>
      %88 = arith.addf %85, %87 : vector<32x32xf32>
      %89 = arith.truncf %88 : vector<32x32xf32> to vector<32x32xbf16>
      %c0_34 = arith.constant 0 : index
      %c0_35 = arith.constant 0 : index
      %90 = vector.load %arg6[%c0_34, %c0_35] : memref<32x32xbf16, #tpu.memory_space<vmem>>, vector<32x32xbf16>
      tpu.vector_store %arg6[%c0_34, %c0_35], %89 {strides = array<i32>} : memref<32x32xbf16, #tpu.memory_space<vmem>>, vector<32x32xbf16>,
    } else {
    }
    return
  }
  func.func @transform_0(%arg0: i32, %arg1: i32, %arg2: i32) -> (i32, i32) {
    %c0_i32 = arith.constant 0 : i32
    return %arg0, %arg2 : i32, i32
  }
  func.func @transform_1(%arg0: i32, %arg1: i32, %arg2: i32) -> (i32, i32) {
    %c0_i32 = arith.constant 0 : i32
    return %arg2, %arg1 : i32, i32
  }
  func.func @transform_2(%arg0: i32, %arg1: i32, %arg2: i32) -> (i32, i32) {
    %c0_i32 = arith.constant 0 : i32
    %c0_i32_0 = arith.constant 0 : i32
    return %c0_i32, %arg1 : i32, i32
  }
  func.func @transform_3(%arg0: i32, %arg1: i32, %arg2: i32) -> (i32, i32) {
    %c0_i32 = arith.constant 0 : i32
    return %arg0, %arg1 : i32, i32
  }
}

module attributes {stable_mosaic.version = 11 : i64} {
  func.func @_attention_kernel(%arg0: i32, %arg1: i32, %arg2: memref<1x64x32xbf16, #tpu.memory_space<vmem>>, %arg3: memref<1x16x32xbf16, #tpu.memory_space<vmem>>, %arg4: memref<1x16x32xbf16, #tpu.memory_space<vmem>>, %arg5: memref<1x64x32xbf16, #tpu.memory_space<vmem>>) attributes {dimension_semantics = [#tpu.dimension_semantics<parallel>, #tpu.dimension_semantics<parallel>], iteration_bounds = array<i64: 2, 1>, scalar_prefetch = 0 : i64, scratch_operands = 0 : i64, tpu.core_type = #tpu.core_type<tc>, window_params = [{transform_indices = @transform_0, window_bounds = array<i64: 1, 64, 32>}, {transform_indices = @transform_1, window_bounds = array<i64: 1, 16, 32>}, {transform_indices = @transform_2, window_bounds = array<i64: 1, 16, 32>}, {transform_indices = @transform_3, window_bounds = array<i64: 1, 64, 32>}]} {
    %c0 = arith.constant 0 : index
    %c0_0 = arith.constant 0 : index
    %c0_1 = arith.constant 0 : index
    %0 = vector.load %arg2[%c0, %c0_0, %c0_1] : memref<1x64x32xbf16, #tpu.memory_space<vmem>>, vector<1x64x16xbf16>
    %1 = vector.shape_cast %0 : vector<1x64x16xbf16> to vector<64x16xbf16>
    %c0_2 = arith.constant 0 : index
    %c0_3 = arith.constant 0 : index
    %c0_4 = arith.constant 0 : index
    %2 = vector.load %arg3[%c0_2, %c0_3, %c0_4] : memref<1x16x32xbf16, #tpu.memory_space<vmem>>, vector<1x16x16xbf16>
    %3 = vector.shape_cast %2 : vector<1x16x16xbf16> to vector<16x16xbf16>
    %cst = arith.constant dense<0.000000e+00> : vector<64x16xf32>
    %4 = tpu.matmul %1, %3, %cst {dimension_numbers = #tpu.dot_dimension_numbers<[1], [1], [0], [0], [0, 0, 1, 0], [], []>} : vector<64x16xbf16>, vector<16x16xbf16>, vector<64x16xf32> -> vector<64x16xf32>
    %cst_5 = arith.constant dense<0xFF800000> : vector<64xf32>
    %5 = vector.multi_reduction <maximumf>, %4, %cst_5 [1] : vector<64x16xf32> to vector<64xf32>
    %6 = vector.shape_cast %5 : vector<64xf32> to vector<64x1xf32>
    %7 = vector.broadcast %6 : vector<64x1xf32> to vector<64x16xf32>
    %8 = arith.subf %4, %7 : vector<64x16xf32>
    %9 = math.exp %8 : vector<64x16xf32>
    %cst_6 = arith.constant dense<0.000000e+00> : vector<64xf32>
    %10 = vector.multi_reduction <add>, %9, %cst_6 [1] : vector<64x16xf32> to vector<64xf32>
    %11 = vector.shape_cast %10 : vector<64xf32> to vector<64x1xf32>
    %12 = tpu.reciprocal %11 {approx = true} : vector<64x1xf32> -> vector<64x1xf32>
    %13 = vector.broadcast %12 : vector<64x1xf32> to vector<64x16xf32>
    %14 = arith.mulf %9, %13 : vector<64x16xf32>
    %15 = arith.truncf %14 : vector<64x16xf32> to vector<64x16xbf16>
    %c0_7 = arith.constant 0 : index
    %c0_8 = arith.constant 0 : index
    %c0_9 = arith.constant 0 : index
    %16 = vector.load %arg4[%c0_7, %c0_8, %c0_9] : memref<1x16x32xbf16, #tpu.memory_space<vmem>>, vector<1x16x16xbf16>
    %17 = vector.shape_cast %16 : vector<1x16x16xbf16> to vector<16x16xbf16>
    %cst_10 = arith.constant dense<0.000000e+00> : vector<64x16xf32>
    %18 = tpu.matmul %15, %17, %cst_10 {dimension_numbers = #tpu.dot_dimension_numbers<[1], [0], [0], [1], [0, 0, 1, 1], [], []>} : vector<64x16xbf16>, vector<16x16xbf16>, vector<64x16xf32> -> vector<64x16xf32>
    %19 = arith.truncf %18 : vector<64x16xf32> to vector<64x16xbf16>
    %c0_11 = arith.constant 0 : index
    %c0_12 = arith.constant 0 : index
    %c0_13 = arith.constant 0 : index
    %20 = vector.load %arg5[%c0_11, %c0_12, %c0_13] : memref<1x64x32xbf16, #tpu.memory_space<vmem>>, vector<1x64x16xbf16>
    %21 = vector.shape_cast %20 : vector<1x64x16xbf16> to vector<64x16xbf16>
    %22 = vector.shape_cast %19 : vector<64x16xbf16> to vector<1x64x16xbf16>
    tpu.vector_store %arg5[%c0_11, %c0_12, %c0_13], %22 {strides = array<i32>} : memref<1x64x32xbf16, #tpu.memory_space<vmem>>, vector<1x64x16xbf16>,
    %c0_14 = arith.constant 0 : index
    %c0_15 = arith.constant 0 : index
    %c16 = arith.constant 16 : index
    %23 = vector.load %arg2[%c0_14, %c0_15, %c16] : memref<1x64x32xbf16, #tpu.memory_space<vmem>>, vector<1x64x16xbf16>
    %24 = vector.shape_cast %23 : vector<1x64x16xbf16> to vector<64x16xbf16>
    %c0_16 = arith.constant 0 : index
    %c0_17 = arith.constant 0 : index
    %c16_18 = arith.constant 16 : index
    %25 = vector.load %arg3[%c0_16, %c0_17, %c16_18] : memref<1x16x32xbf16, #tpu.memory_space<vmem>>, vector<1x16x16xbf16>
    %26 = vector.shape_cast %25 : vector<1x16x16xbf16> to vector<16x16xbf16>
    %cst_19 = arith.constant dense<0.000000e+00> : vector<64x16xf32>
    %27 = tpu.matmul %24, %26, %cst_19 {dimension_numbers = #tpu.dot_dimension_numbers<[1], [1], [0], [0], [0, 0, 1, 0], [], []>} : vector<64x16xbf16>, vector<16x16xbf16>, vector<64x16xf32> -> vector<64x16xf32>
    %cst_20 = arith.constant dense<0xFF800000> : vector<64xf32>
    %28 = vector.multi_reduction <maximumf>, %27, %cst_20 [1] : vector<64x16xf32> to vector<64xf32>
    %29 = vector.shape_cast %28 : vector<64xf32> to vector<64x1xf32>
    %30 = vector.broadcast %29 : vector<64x1xf32> to vector<64x16xf32>
    %31 = arith.subf %27, %30 : vector<64x16xf32>
    %32 = math.exp %31 : vector<64x16xf32>
    %cst_21 = arith.constant dense<0.000000e+00> : vector<64xf32>
    %33 = vector.multi_reduction <add>, %32, %cst_21 [1] : vector<64x16xf32> to vector<64xf32>
    %34 = vector.shape_cast %33 : vector<64xf32> to vector<64x1xf32>
    %35 = tpu.reciprocal %34 {approx = true} : vector<64x1xf32> -> vector<64x1xf32>
    %36 = vector.broadcast %35 : vector<64x1xf32> to vector<64x16xf32>
    %37 = arith.mulf %32, %36 : vector<64x16xf32>
    %38 = arith.truncf %37 : vector<64x16xf32> to vector<64x16xbf16>
    %c0_22 = arith.constant 0 : index
    %c0_23 = arith.constant 0 : index
    %c16_24 = arith.constant 16 : index
    %39 = vector.load %arg4[%c0_22, %c0_23, %c16_24] : memref<1x16x32xbf16, #tpu.memory_space<vmem>>, vector<1x16x16xbf16>
    %40 = vector.shape_cast %39 : vector<1x16x16xbf16> to vector<16x16xbf16>
    %cst_25 = arith.constant dense<0.000000e+00> : vector<64x16xf32>
    %41 = tpu.matmul %38, %40, %cst_25 {dimension_numbers = #tpu.dot_dimension_numbers<[1], [0], [0], [1], [0, 0, 1, 1], [], []>} : vector<64x16xbf16>, vector<16x16xbf16>, vector<64x16xf32> -> vector<64x16xf32>
    %42 = arith.truncf %41 : vector<64x16xf32> to vector<64x16xbf16>
    %c0_26 = arith.constant 0 : index
    %c0_27 = arith.constant 0 : index
    %c16_28 = arith.constant 16 : index
    %43 = vector.load %arg5[%c0_26, %c0_27, %c16_28] : memref<1x64x32xbf16, #tpu.memory_space<vmem>>, vector<1x64x16xbf16>
    %44 = vector.shape_cast %43 : vector<1x64x16xbf16> to vector<64x16xbf16>
    %45 = vector.shape_cast %42 : vector<64x16xbf16> to vector<1x64x16xbf16>
    tpu.vector_store %arg5[%c0_26, %c0_27, %c16_28], %45 {strides = array<i32>} : memref<1x64x32xbf16, #tpu.memory_space<vmem>>, vector<1x64x16xbf16>,
    return
  }
  func.func @transform_0(%arg0: i32, %arg1: i32) -> (i32, i32, i32) {
    %c0_i32 = arith.constant 0 : i32
    %c0_i32_0 = arith.constant 0 : i32
    return %arg0, %arg1, %c0_i32 : i32, i32, i32
  }
  func.func @transform_1(%arg0: i32, %arg1: i32) -> (i32, i32, i32) {
    %c0_i32 = arith.constant 0 : i32
    %c0_i32_0 = arith.constant 0 : i32
    %c0_i32_1 = arith.constant 0 : i32
    return %arg0, %c0_i32, %c0_i32_0 : i32, i32, i32
  }
  func.func @transform_2(%arg0: i32, %arg1: i32) -> (i32, i32, i32) {
    %c0_i32 = arith.constant 0 : i32
    %c0_i32_0 = arith.constant 0 : i32
    %c0_i32_1 = arith.constant 0 : i32
    return %arg0, %c0_i32, %c0_i32_0 : i32, i32, i32
  }
  func.func @transform_3(%arg0: i32, %arg1: i32) -> (i32, i32, i32) {
    %c0_i32 = arith.constant 0 : i32
    %c0_i32_0 = arith.constant 0 : i32
    return %arg0, %arg1, %c0_i32 : i32, i32, i32
  }
}

module attributes {stable_mosaic.version = 11 : i64} {
  func.func @_linear_add_kernel(%arg0: i32, %arg1: i32, %arg2: i32, %arg3: memref<128x32xbf16, #tpu.memory_space<vmem>>, %arg4: memref<32x32xbf16, #tpu.memory_space<vmem>>, %arg5: memref<1x32xf32, #tpu.memory_space<vmem>>, %arg6: memref<128x32xf32, #tpu.memory_space<vmem>>, %arg7: memref<128x32xf32, #tpu.memory_space<vmem>>, %arg8: memref<128x32xf32, #tpu.memory_space<vmem>>) attributes {dimension_semantics = [#tpu.dimension_semantics<parallel>, #tpu.dimension_semantics<parallel>, #tpu.dimension_semantics<arbitrary>], iteration_bounds = array<i64: 1, 1, 1>, scalar_prefetch = 0 : i64, scratch_operands = 1 : i64, tpu.core_type = #tpu.core_type<tc>, window_params = [{transform_indices = @transform_0, window_bounds = array<i64: 128, 32>}, {transform_indices = @transform_1, window_bounds = array<i64: 32, 32>}, {transform_indices = @transform_2, window_bounds = array<i64: 1, 32>}, {transform_indices = @transform_3, window_bounds = array<i64: 128, 32>}, {transform_indices = @transform_4, window_bounds = array<i64: 128, 32>}]} {
    %c0_i32 = arith.constant 0 : i32
    %0 = arith.cmpi eq, %arg2, %c0_i32 : i32
    %1 = arith.extui %0 : i1 to i32
    %c0_i32_0 = arith.constant 0 : i32
    %2 = arith.cmpi ne, %1, %c0_i32_0 : i32
    scf.if %2 {
      %cst_10 = arith.constant 0.000000e+00 : f32
      %12 = vector.broadcast %cst_10 : f32 to vector<128x32xf32>
      %c0_11 = arith.constant 0 : index
      %c0_12 = arith.constant 0 : index
      %13 = vector.load %arg8[%c0_11, %c0_12] : memref<128x32xf32, #tpu.memory_space<vmem>>, vector<128x32xf32>
      tpu.vector_store %arg8[%c0_11, %c0_12], %12 {strides = array<i32>} : memref<128x32xf32, #tpu.memory_space<vmem>>, vector<128x32xf32>,
    } else {
    }
    %c0 = arith.constant 0 : index
    %c0_1 = arith.constant 0 : index
    %3 = vector.load %arg8[%c0, %c0_1] : memref<128x32xf32, #tpu.memory_space<vmem>>, vector<128x32xf32>
    %c0_2 = arith.constant 0 : index
    %c0_3 = arith.constant 0 : index
    %4 = vector.load %arg3[%c0_2, %c0_3] : memref<128x32xbf16, #tpu.memory_space<vmem>>, vector<128x32xbf16>
    %c0_4 = arith.constant 0 : index
    %c0_5 = arith.constant 0 : index
    %5 = vector.load %arg4[%c0_4, %c0_5] : memref<32x32xbf16, #tpu.memory_space<vmem>>, vector<32x32xbf16>
    %cst = arith.constant dense<0.000000e+00> : vector<128x32xf32>
    %6 = tpu.matmul %4, %5, %cst {dimension_numbers = #tpu.dot_dimension_numbers<[1], [0], [0], [1], [0, 0, 1, 1], [], []>} : vector<128x32xbf16>, vector<32x32xbf16>, vector<128x32xf32> -> vector<128x32xf32>
    %7 = arith.addf %3, %6 : vector<128x32xf32>
    %c0_6 = arith.constant 0 : index
    %c0_7 = arith.constant 0 : index
    %8 = vector.load %arg8[%c0_6, %c0_7] : memref<128x32xf32, #tpu.memory_space<vmem>>, vector<128x32xf32>
    tpu.vector_store %arg8[%c0_6, %c0_7], %7 {strides = array<i32>} : memref<128x32xf32, #tpu.memory_space<vmem>>, vector<128x32xf32>,
    %c0_i32_8 = arith.constant 0 : i32
    %9 = arith.cmpi eq, %arg2, %c0_i32_8 : i32
    %10 = arith.extui %9 : i1 to i32
    %c0_i32_9 = arith.constant 0 : i32
    %11 = arith.cmpi ne, %10, %c0_i32_9 : i32
    scf.if %11 {
      %c0_10 = arith.constant 0 : index
      %c0_11 = arith.constant 0 : index
      %12 = vector.load %arg8[%c0_10, %c0_11] : memref<128x32xf32, #tpu.memory_space<vmem>>, vector<128x32xf32>
      %c0_12 = arith.constant 0 : index
      %c0_13 = arith.constant 0 : index
      %13 = vector.load %arg5[%c0_12, %c0_13] : memref<1x32xf32, #tpu.memory_space<vmem>>, vector<1x32xf32>
      %14 = vector.broadcast %13 : vector<1x32xf32> to vector<128x32xf32>
      %15 = arith.addf %12, %14 : vector<128x32xf32>
      %c0_14 = arith.constant 0 : index
      %c0_15 = arith.constant 0 : index
      %16 = vector.load %arg6[%c0_14, %c0_15] : memref<128x32xf32, #tpu.memory_space<vmem>>, vector<128x32xf32>
      %17 = arith.addf %15, %16 : vector<128x32xf32>
      %c0_16 = arith.constant 0 : index
      %c0_17 = arith.constant 0 : index
      %18 = vector.load %arg7[%c0_16, %c0_17] : memref<128x32xf32, #tpu.memory_space<vmem>>, vector<128x32xf32>
      tpu.vector_store %arg7[%c0_16, %c0_17], %17 {strides = array<i32>} : memref<128x32xf32, #tpu.memory_space<vmem>>, vector<128x32xf32>,
    } else {
    }
    return
  }
  func.func @transform_0(%arg0: i32, %arg1: i32, %arg2: i32) -> (i32, i32) {
    %c0_i32 = arith.constant 0 : i32
    return %arg0, %arg2 : i32, i32
  }
  func.func @transform_1(%arg0: i32, %arg1: i32, %arg2: i32) -> (i32, i32) {
    %c0_i32 = arith.constant 0 : i32
    return %arg2, %arg1 : i32, i32
  }
  func.func @transform_2(%arg0: i32, %arg1: i32, %arg2: i32) -> (i32, i32) {
    %c0_i32 = arith.constant 0 : i32
    %c0_i32_0 = arith.constant 0 : i32
    return %c0_i32, %arg1 : i32, i32
  }
  func.func @transform_3(%arg0: i32, %arg1: i32, %arg2: i32) -> (i32, i32) {
    %c0_i32 = arith.constant 0 : i32
    return %arg0, %arg1 : i32, i32
  }
  func.func @transform_4(%arg0: i32, %arg1: i32, %arg2: i32) -> (i32, i32) {
    %c0_i32 = arith.constant 0 : i32
    return %arg0, %arg1 : i32, i32
  }
}

module attributes {stable_mosaic.version = 11 : i64} {
  func.func @_ln_linear_kernel(%arg0: i32, %arg1: i32, %arg2: memref<128x32xf32, #tpu.memory_space<vmem>>, %arg3: memref<32x128xbf16, #tpu.memory_space<vmem>>, %arg4: memref<1x128xf32, #tpu.memory_space<vmem>>, %arg5: memref<128x128xbf16, #tpu.memory_space<vmem>>, %arg6: memref<128x32xbf16, #tpu.memory_space<vmem>>) attributes {dimension_semantics = [#tpu.dimension_semantics<parallel>, #tpu.dimension_semantics<arbitrary>], iteration_bounds = array<i64: 1, 1>, scalar_prefetch = 0 : i64, scratch_operands = 1 : i64, tpu.core_type = #tpu.core_type<tc>, window_params = [{transform_indices = @transform_0, window_bounds = array<i64: 128, 32>}, {transform_indices = @transform_1, window_bounds = array<i64: 32, 128>}, {transform_indices = @transform_2, window_bounds = array<i64: 1, 128>}, {transform_indices = @transform_3, window_bounds = array<i64: 128, 128>}]} {
    %c0_i32 = arith.constant 0 : i32
    %0 = arith.cmpi eq, %arg1, %c0_i32 : i32
    %1 = arith.extui %0 : i1 to i32
    %c0_i32_0 = arith.constant 0 : i32
    %2 = arith.cmpi ne, %1, %c0_i32_0 : i32
    scf.if %2 {
      %c0_8 = arith.constant 0 : index
      %c0_9 = arith.constant 0 : index
      %11 = vector.load %arg2[%c0_8, %c0_9] : memref<128x32xf32, #tpu.memory_space<vmem>>, vector<128x32xf32>
      %cst_10 = arith.constant dense<0.000000e+00> : vector<128xf32>
      %12 = vector.multi_reduction <add>, %11, %cst_10 [1] : vector<128x32xf32> to vector<128xf32>
      %13 = vector.shape_cast %12 : vector<128xf32> to vector<128x1xf32>
      %cst_11 = arith.constant 3.200000e+01 : f32
      %14 = vector.broadcast %cst_11 : f32 to vector<128x1xf32>
      %15 = arith.divf %13, %14 : vector<128x1xf32>
      %16 = vector.broadcast %15 : vector<128x1xf32> to vector<128x32xf32>
      %17 = arith.subf %11, %16 : vector<128x32xf32>
      %18 = arith.mulf %17, %17 : vector<128x32xf32>
      %cst_12 = arith.constant dense<0.000000e+00> : vector<128xf32>
      %19 = vector.multi_reduction <add>, %18, %cst_12 [1] : vector<128x32xf32> to vector<128xf32>
      %20 = vector.shape_cast %19 : vector<128xf32> to vector<128x1xf32>
      %cst_13 = arith.constant 3.200000e+01 : f32
      %21 = vector.broadcast %cst_13 : f32 to vector<128x1xf32>
      %22 = arith.divf %20, %21 : vector<128x1xf32>
      %cst_14 = arith.constant 9.99999997E-7 : f32
      %23 = vector.broadcast %cst_14 : f32 to vector<128x1xf32>
      %24 = arith.addf %22, %23 : vector<128x1xf32>
      %25 = math.rsqrt %24 : vector<128x1xf32>
      %26 = vector.broadcast %25 : vector<128x1xf32> to vector<128x32xf32>
      %27 = arith.mulf %17, %26 : vector<128x32xf32>
      %28 = arith.truncf %27 : vector<128x32xf32> to vector<128x32xbf16>
      %c0_15 = arith.constant 0 : index
      %c0_16 = arith.constant 0 : index
      %29 = vector.load %arg6[%c0_15, %c0_16] : memref<128x32xbf16, #tpu.memory_space<vmem>>, vector<128x32xbf16>
      tpu.vector_store %arg6[%c0_15, %c0_16], %28 {strides = array<i32>} : memref<128x32xbf16, #tpu.memory_space<vmem>>, vector<128x32xbf16>,
    } else {
    }
    %c0 = arith.constant 0 : index
    %c0_1 = arith.constant 0 : index
    %3 = vector.load %arg6[%c0, %c0_1] : memref<128x32xbf16, #tpu.memory_space<vmem>>, vector<128x32xbf16>
    %c0_2 = arith.constant 0 : index
    %c0_3 = arith.constant 0 : index
    %4 = vector.load %arg3[%c0_2, %c0_3] : memref<32x128xbf16, #tpu.memory_space<vmem>>, vector<32x128xbf16>
    %cst = arith.constant dense<0.000000e+00> : vector<128x128xf32>
    %5 = tpu.matmul %3, %4, %cst {dimension_numbers = #tpu.dot_dimension_numbers<[1], [0], [0], [1], [0, 0, 1, 1], [], []>} : vector<128x32xbf16>, vector<32x128xbf16>, vector<128x128xf32> -> vector<128x128xf32>
    %c0_4 = arith.constant 0 : index
    %c0_5 = arith.constant 0 : index
    %6 = vector.load %arg4[%c0_4, %c0_5] : memref<1x128xf32, #tpu.memory_space<vmem>>, vector<1x128xf32>
    %7 = vector.broadcast %6 : vector<1x128xf32> to vector<128x128xf32>
    %8 = arith.addf %5, %7 : vector<128x128xf32>
    %9 = arith.truncf %8 : vector<128x128xf32> to vector<128x128xbf16>
    %c0_6 = arith.constant 0 : index
    %c0_7 = arith.constant 0 : index
    %10 = vector.load %arg5[%c0_6, %c0_7] : memref<128x128xbf16, #tpu.memory_space<vmem>>, vector<128x128xbf16>
    tpu.vector_store %arg5[%c0_6, %c0_7], %9 {strides = array<i32>} : memref<128x128xbf16, #tpu.memory_space<vmem>>, vector<128x128xbf16>,
    return
  }
  func.func @transform_0(%arg0: i32, %arg1: i32) -> (i32, i32) {
    %c0_i32 = arith.constant 0 : i32
    %c0_i32_0 = arith.constant 0 : i32
    return %arg0, %c0_i32 : i32, i32
  }
  func.func @transform_1(%arg0: i32, %arg1: i32) -> (i32, i32) {
    %c0_i32 = arith.constant 0 : i32
    %c0_i32_0 = arith.constant 0 : i32
    return %c0_i32, %arg1 : i32, i32
  }
  func.func @transform_2(%arg0: i32, %arg1: i32) -> (i32, i32) {
    %c0_i32 = arith.constant 0 : i32
    %c0_i32_0 = arith.constant 0 : i32
    return %c0_i32, %arg1 : i32, i32
  }
  func.func @transform_3(%arg0: i32, %arg1: i32) -> (i32, i32) {
    %c0_i32 = arith.constant 0 : i32
    return %arg0, %arg1 : i32, i32
  }
}

module attributes {stable_mosaic.version = 11 : i64} {
  func.func @_linear_add_kernel(%arg0: i32, %arg1: i32, %arg2: i32, %arg3: memref<128x128xbf16, #tpu.memory_space<vmem>>, %arg4: memref<128x32xbf16, #tpu.memory_space<vmem>>, %arg5: memref<1x32xf32, #tpu.memory_space<vmem>>, %arg6: memref<128x32xf32, #tpu.memory_space<vmem>>, %arg7: memref<128x32xf32, #tpu.memory_space<vmem>>, %arg8: memref<128x32xf32, #tpu.memory_space<vmem>>) attributes {dimension_semantics = [#tpu.dimension_semantics<parallel>, #tpu.dimension_semantics<parallel>, #tpu.dimension_semantics<arbitrary>], iteration_bounds = array<i64: 1, 1, 1>, scalar_prefetch = 0 : i64, scratch_operands = 1 : i64, tpu.core_type = #tpu.core_type<tc>, window_params = [{transform_indices = @transform_0, window_bounds = array<i64: 128, 128>}, {transform_indices = @transform_1, window_bounds = array<i64: 128, 32>}, {transform_indices = @transform_2, window_bounds = array<i64: 1, 32>}, {transform_indices = @transform_3, window_bounds = array<i64: 128, 32>}, {transform_indices = @transform_4, window_bounds = array<i64: 128, 32>}]} {
    %c0_i32 = arith.constant 0 : i32
    %0 = arith.cmpi eq, %arg2, %c0_i32 : i32
    %1 = arith.extui %0 : i1 to i32
    %c0_i32_0 = arith.constant 0 : i32
    %2 = arith.cmpi ne, %1, %c0_i32_0 : i32
    scf.if %2 {
      %cst_10 = arith.constant 0.000000e+00 : f32
      %12 = vector.broadcast %cst_10 : f32 to vector<128x32xf32>
      %c0_11 = arith.constant 0 : index
      %c0_12 = arith.constant 0 : index
      %13 = vector.load %arg8[%c0_11, %c0_12] : memref<128x32xf32, #tpu.memory_space<vmem>>, vector<128x32xf32>
      tpu.vector_store %arg8[%c0_11, %c0_12], %12 {strides = array<i32>} : memref<128x32xf32, #tpu.memory_space<vmem>>, vector<128x32xf32>,
    } else {
    }
    %c0 = arith.constant 0 : index
    %c0_1 = arith.constant 0 : index
    %3 = vector.load %arg8[%c0, %c0_1] : memref<128x32xf32, #tpu.memory_space<vmem>>, vector<128x32xf32>
    %c0_2 = arith.constant 0 : index
    %c0_3 = arith.constant 0 : index
    %4 = vector.load %arg3[%c0_2, %c0_3] : memref<128x128xbf16, #tpu.memory_space<vmem>>, vector<128x128xbf16>
    %c0_4 = arith.constant 0 : index
    %c0_5 = arith.constant 0 : index
    %5 = vector.load %arg4[%c0_4, %c0_5] : memref<128x32xbf16, #tpu.memory_space<vmem>>, vector<128x32xbf16>
    %cst = arith.constant dense<0.000000e+00> : vector<128x32xf32>
    %6 = tpu.matmul %4, %5, %cst {dimension_numbers = #tpu.dot_dimension_numbers<[1], [0], [0], [1], [0, 0, 1, 1], [], []>} : vector<128x128xbf16>, vector<128x32xbf16>, vector<128x32xf32> -> vector<128x32xf32>
    %7 = arith.addf %3, %6 : vector<128x32xf32>
    %c0_6 = arith.constant 0 : index
    %c0_7 = arith.constant 0 : index
    %8 = vector.load %arg8[%c0_6, %c0_7] : memref<128x32xf32, #tpu.memory_space<vmem>>, vector<128x32xf32>
    tpu.vector_store %arg8[%c0_6, %c0_7], %7 {strides = array<i32>} : memref<128x32xf32, #tpu.memory_space<vmem>>, vector<128x32xf32>,
    %c0_i32_8 = arith.constant 0 : i32
    %9 = arith.cmpi eq, %arg2, %c0_i32_8 : i32
    %10 = arith.extui %9 : i1 to i32
    %c0_i32_9 = arith.constant 0 : i32
    %11 = arith.cmpi ne, %10, %c0_i32_9 : i32
    scf.if %11 {
      %c0_10 = arith.constant 0 : index
      %c0_11 = arith.constant 0 : index
      %12 = vector.load %arg8[%c0_10, %c0_11] : memref<128x32xf32, #tpu.memory_space<vmem>>, vector<128x32xf32>
      %c0_12 = arith.constant 0 : index
      %c0_13 = arith.constant 0 : index
      %13 = vector.load %arg5[%c0_12, %c0_13] : memref<1x32xf32, #tpu.memory_space<vmem>>, vector<1x32xf32>
      %14 = vector.broadcast %13 : vector<1x32xf32> to vector<128x32xf32>
      %15 = arith.addf %12, %14 : vector<128x32xf32>
      %c0_14 = arith.constant 0 : index
      %c0_15 = arith.constant 0 : index
      %16 = vector.load %arg6[%c0_14, %c0_15] : memref<128x32xf32, #tpu.memory_space<vmem>>, vector<128x32xf32>
      %17 = arith.addf %15, %16 : vector<128x32xf32>
      %c0_16 = arith.constant 0 : index
      %c0_17 = arith.constant 0 : index
      %18 = vector.load %arg7[%c0_16, %c0_17] : memref<128x32xf32, #tpu.memory_space<vmem>>, vector<128x32xf32>
      tpu.vector_store %arg7[%c0_16, %c0_17], %17 {strides = array<i32>} : memref<128x32xf32, #tpu.memory_space<vmem>>, vector<128x32xf32>,
    } else {
    }
    return
  }
  func.func @transform_0(%arg0: i32, %arg1: i32, %arg2: i32) -> (i32, i32) {
    %c0_i32 = arith.constant 0 : i32
    return %arg0, %arg2 : i32, i32
  }
  func.func @transform_1(%arg0: i32, %arg1: i32, %arg2: i32) -> (i32, i32) {
    %c0_i32 = arith.constant 0 : i32
    return %arg2, %arg1 : i32, i32
  }
  func.func @transform_2(%arg0: i32, %arg1: i32, %arg2: i32) -> (i32, i32) {
    %c0_i32 = arith.constant 0 : i32
    %c0_i32_0 = arith.constant 0 : i32
    return %c0_i32, %arg1 : i32, i32
  }
  func.func @transform_3(%arg0: i32, %arg1: i32, %arg2: i32) -> (i32, i32) {
    %c0_i32 = arith.constant 0 : i32
    return %arg0, %arg1 : i32, i32
  }
  func.func @transform_4(%arg0: i32, %arg1: i32, %arg2: i32) -> (i32, i32) {
    %c0_i32 = arith.constant 0 : i32
    return %arg0, %arg1 : i32, i32
  }
}

module attributes {stable_mosaic.version = 11 : i64} {
  func.func @_dwconv_gelu_kernel(%arg0: i32, %arg1: i32, %arg2: i32, %arg3: memref<1x8x8x128xbf16, #tpu.memory_space<vmem>>, %arg4: memref<1x1x8x128xbf16, #tpu.memory_space<vmem>>, %arg5: memref<1x1x8x128xbf16, #tpu.memory_space<vmem>>, %arg6: memref<9x128xf32, #tpu.memory_space<vmem>>, %arg7: memref<1x128xf32, #tpu.memory_space<vmem>>, %arg8: memref<1x8x8x128xbf16, #tpu.memory_space<vmem>>) attributes {dimension_semantics = [#tpu.dimension_semantics<parallel>, #tpu.dimension_semantics<parallel>, #tpu.dimension_semantics<parallel>], iteration_bounds = array<i64: 2, 1, 1>, scalar_prefetch = 0 : i64, scratch_operands = 0 : i64, tpu.core_type = #tpu.core_type<tc>, window_params = [{transform_indices = @transform_0, window_bounds = array<i64: 1, 8, 8, 128>}, {transform_indices = @transform_1, window_bounds = array<i64: 1, 1, 8, 128>}, {transform_indices = @transform_2, window_bounds = array<i64: 1, 1, 8, 128>}, {transform_indices = @transform_3, window_bounds = array<i64: 9, 128>}, {transform_indices = @transform_4, window_bounds = array<i64: 1, 128>}, {transform_indices = @transform_5, window_bounds = array<i64: 1, 8, 8, 128>}]} {
    %c0 = arith.constant 0 : index
    %c0_0 = arith.constant 0 : index
    %c0_1 = arith.constant 0 : index
    %c0_2 = arith.constant 0 : index
    %0 = vector.load %arg3[%c0, %c0_0, %c0_1, %c0_2] : memref<1x8x8x128xbf16, #tpu.memory_space<vmem>>, vector<1x8x8x128xbf16>
    %1 = vector.shape_cast %0 : vector<1x8x8x128xbf16> to vector<8x8x128xbf16>
    %2 = arith.extf %1 : vector<8x8x128xbf16> to vector<8x8x128xf32>
    %c0_i32 = arith.constant 0 : i32
    %3 = arith.cmpi sgt, %arg1, %c0_i32 : i32
    %c0_3 = arith.constant 0 : index
    %c0_4 = arith.constant 0 : index
    %c0_5 = arith.constant 0 : index
    %c0_6 = arith.constant 0 : index
    %4 = vector.load %arg4[%c0_3, %c0_4, %c0_5, %c0_6] : memref<1x1x8x128xbf16, #tpu.memory_space<vmem>>, vector<1x1x8x128xbf16>
    %5 = vector.shape_cast %4 : vector<1x1x8x128xbf16> to vector<1x8x128xbf16>
    %6 = arith.extf %5 : vector<1x8x128xbf16> to vector<1x8x128xf32>
    %cst = arith.constant 0.000000e+00 : f32
    %7 = vector.broadcast %cst : f32 to vector<1x8x128xf32>
    %8 = arith.select %3, %6, %7 : vector<1x8x128xf32>
    %c0_i32_7 = arith.constant 0 : i32
    %9 = arith.cmpi slt, %arg1, %c0_i32_7 : i32
    %c0_8 = arith.constant 0 : index
    %c0_9 = arith.constant 0 : index
    %c0_10 = arith.constant 0 : index
    %c0_11 = arith.constant 0 : index
    %10 = vector.load %arg5[%c0_8, %c0_9, %c0_10, %c0_11] : memref<1x1x8x128xbf16, #tpu.memory_space<vmem>>, vector<1x1x8x128xbf16>
    %11 = vector.shape_cast %10 : vector<1x1x8x128xbf16> to vector<1x8x128xbf16>
    %12 = arith.extf %11 : vector<1x8x128xbf16> to vector<1x8x128xf32>
    %cst_12 = arith.constant 0.000000e+00 : f32
    %13 = vector.broadcast %cst_12 : f32 to vector<1x8x128xf32>
    %14 = arith.select %9, %12, %13 : vector<1x8x128xf32>
    %15 = tpu.concatenate %8, %2, %14 in 0 : vector<1x8x128xf32>, vector<8x8x128xf32>, vector<1x8x128xf32> -> vector<10x8x128xf32>
    %cst_13 = arith.constant 0.000000e+00 : f32
    %16 = vector.broadcast %cst_13 : f32 to vector<10x1x128xf32>
    %17 = tpu.concatenate %16, %15, %16 in 1 : vector<10x1x128xf32>, vector<10x8x128xf32>, vector<10x1x128xf32> -> vector<10x10x128xf32>
    %c0_14 = arith.constant 0 : index
    %c0_15 = arith.constant 0 : index
    %18 = vector.load %arg6[%c0_14, %c0_15] : memref<9x128xf32, #tpu.memory_space<vmem>>, vector<9x128xf32>
    %cst_16 = arith.constant 0.000000e+00 : f32
    %19 = vector.broadcast %cst_16 : f32 to vector<8x8x128xf32>
    %20 = vector.extract_strided_slice %17 {offsets = [0, 0, 0], sizes = [8, 8, 128], strides = [1, 1, 1]} : vector<10x10x128xf32> to vector<8x8x128xf32>
    %21 = vector.extract_strided_slice %18 {offsets = [0, 0], sizes = [1, 128], strides = [1, 1]} : vector<9x128xf32> to vector<1x128xf32>
    %22 = vector.shape_cast %21 : vector<1x128xf32> to vector<128xf32>
    %23 = vector.shape_cast %22 : vector<128xf32> to vector<1x1x128xf32>
    %24 = vector.broadcast %23 : vector<1x1x128xf32> to vector<8x8x128xf32>
    %25 = arith.mulf %20, %24 : vector<8x8x128xf32>
    %26 = arith.addf %19, %25 : vector<8x8x128xf32>
    %27 = vector.extract_strided_slice %17 {offsets = [0, 1, 0], sizes = [8, 8, 128], strides = [1, 1, 1]} : vector<10x10x128xf32> to vector<8x8x128xf32>
    %28 = vector.extract_strided_slice %18 {offsets = [1, 0], sizes = [1, 128], strides = [1, 1]} : vector<9x128xf32> to vector<1x128xf32>
    %29 = vector.shape_cast %28 : vector<1x128xf32> to vector<128xf32>
    %30 = vector.shape_cast %29 : vector<128xf32> to vector<1x1x128xf32>
    %31 = vector.broadcast %30 : vector<1x1x128xf32> to vector<8x8x128xf32>
    %32 = arith.mulf %27, %31 : vector<8x8x128xf32>
    %33 = arith.addf %26, %32 : vector<8x8x128xf32>
    %34 = vector.extract_strided_slice %17 {offsets = [0, 2, 0], sizes = [8, 8, 128], strides = [1, 1, 1]} : vector<10x10x128xf32> to vector<8x8x128xf32>
    %35 = vector.extract_strided_slice %18 {offsets = [2, 0], sizes = [1, 128], strides = [1, 1]} : vector<9x128xf32> to vector<1x128xf32>
    %36 = vector.shape_cast %35 : vector<1x128xf32> to vector<128xf32>
    %37 = vector.shape_cast %36 : vector<128xf32> to vector<1x1x128xf32>
    %38 = vector.broadcast %37 : vector<1x1x128xf32> to vector<8x8x128xf32>
    %39 = arith.mulf %34, %38 : vector<8x8x128xf32>
    %40 = arith.addf %33, %39 : vector<8x8x128xf32>
    %41 = vector.extract_strided_slice %17 {offsets = [1, 0, 0], sizes = [8, 8, 128], strides = [1, 1, 1]} : vector<10x10x128xf32> to vector<8x8x128xf32>
    %42 = vector.extract_strided_slice %18 {offsets = [3, 0], sizes = [1, 128], strides = [1, 1]} : vector<9x128xf32> to vector<1x128xf32>
    %43 = vector.shape_cast %42 : vector<1x128xf32> to vector<128xf32>
    %44 = vector.shape_cast %43 : vector<128xf32> to vector<1x1x128xf32>
    %45 = vector.broadcast %44 : vector<1x1x128xf32> to vector<8x8x128xf32>
    %46 = arith.mulf %41, %45 : vector<8x8x128xf32>
    %47 = arith.addf %40, %46 : vector<8x8x128xf32>
    %48 = vector.extract_strided_slice %17 {offsets = [1, 1, 0], sizes = [8, 8, 128], strides = [1, 1, 1]} : vector<10x10x128xf32> to vector<8x8x128xf32>
    %49 = vector.extract_strided_slice %18 {offsets = [4, 0], sizes = [1, 128], strides = [1, 1]} : vector<9x128xf32> to vector<1x128xf32>
    %50 = vector.shape_cast %49 : vector<1x128xf32> to vector<128xf32>
    %51 = vector.shape_cast %50 : vector<128xf32> to vector<1x1x128xf32>
    %52 = vector.broadcast %51 : vector<1x1x128xf32> to vector<8x8x128xf32>
    %53 = arith.mulf %48, %52 : vector<8x8x128xf32>
    %54 = arith.addf %47, %53 : vector<8x8x128xf32>
    %55 = vector.extract_strided_slice %17 {offsets = [1, 2, 0], sizes = [8, 8, 128], strides = [1, 1, 1]} : vector<10x10x128xf32> to vector<8x8x128xf32>
    %56 = vector.extract_strided_slice %18 {offsets = [5, 0], sizes = [1, 128], strides = [1, 1]} : vector<9x128xf32> to vector<1x128xf32>
    %57 = vector.shape_cast %56 : vector<1x128xf32> to vector<128xf32>
    %58 = vector.shape_cast %57 : vector<128xf32> to vector<1x1x128xf32>
    %59 = vector.broadcast %58 : vector<1x1x128xf32> to vector<8x8x128xf32>
    %60 = arith.mulf %55, %59 : vector<8x8x128xf32>
    %61 = arith.addf %54, %60 : vector<8x8x128xf32>
    %62 = vector.extract_strided_slice %17 {offsets = [2, 0, 0], sizes = [8, 8, 128], strides = [1, 1, 1]} : vector<10x10x128xf32> to vector<8x8x128xf32>
    %63 = vector.extract_strided_slice %18 {offsets = [6, 0], sizes = [1, 128], strides = [1, 1]} : vector<9x128xf32> to vector<1x128xf32>
    %64 = vector.shape_cast %63 : vector<1x128xf32> to vector<128xf32>
    %65 = vector.shape_cast %64 : vector<128xf32> to vector<1x1x128xf32>
    %66 = vector.broadcast %65 : vector<1x1x128xf32> to vector<8x8x128xf32>
    %67 = arith.mulf %62, %66 : vector<8x8x128xf32>
    %68 = arith.addf %61, %67 : vector<8x8x128xf32>
    %69 = vector.extract_strided_slice %17 {offsets = [2, 1, 0], sizes = [8, 8, 128], strides = [1, 1, 1]} : vector<10x10x128xf32> to vector<8x8x128xf32>
    %70 = vector.extract_strided_slice %18 {offsets = [7, 0], sizes = [1, 128], strides = [1, 1]} : vector<9x128xf32> to vector<1x128xf32>
    %71 = vector.shape_cast %70 : vector<1x128xf32> to vector<128xf32>
    %72 = vector.shape_cast %71 : vector<128xf32> to vector<1x1x128xf32>
    %73 = vector.broadcast %72 : vector<1x1x128xf32> to vector<8x8x128xf32>
    %74 = arith.mulf %69, %73 : vector<8x8x128xf32>
    %75 = arith.addf %68, %74 : vector<8x8x128xf32>
    %76 = vector.extract_strided_slice %17 {offsets = [2, 2, 0], sizes = [8, 8, 128], strides = [1, 1, 1]} : vector<10x10x128xf32> to vector<8x8x128xf32>
    %77 = vector.extract_strided_slice %18 {offsets = [8, 0], sizes = [1, 128], strides = [1, 1]} : vector<9x128xf32> to vector<1x128xf32>
    %78 = vector.shape_cast %77 : vector<1x128xf32> to vector<128xf32>
    %79 = vector.shape_cast %78 : vector<128xf32> to vector<1x1x128xf32>
    %80 = vector.broadcast %79 : vector<1x1x128xf32> to vector<8x8x128xf32>
    %81 = arith.mulf %76, %80 : vector<8x8x128xf32>
    %82 = arith.addf %75, %81 : vector<8x8x128xf32>
    %c0_17 = arith.constant 0 : index
    %c0_18 = arith.constant 0 : index
    %83 = vector.load %arg7[%c0_17, %c0_18] : memref<1x128xf32, #tpu.memory_space<vmem>>, vector<1x128xf32>
    %84 = vector.shape_cast %83 : vector<1x128xf32> to vector<1x1x128xf32>
    %85 = vector.broadcast %84 : vector<1x1x128xf32> to vector<8x8x128xf32>
    %86 = arith.addf %82, %85 : vector<8x8x128xf32>
    %cst_19 = arith.constant 5.000000e-01 : f32
    %87 = vector.broadcast %cst_19 : f32 to vector<8x8x128xf32>
    %88 = arith.mulf %87, %86 : vector<8x8x128xf32>
    %cst_20 = arith.constant 0.707106769 : f32
    %89 = vector.broadcast %cst_20 : f32 to vector<8x8x128xf32>
    %90 = arith.mulf %86, %89 : vector<8x8x128xf32>
    %91 = math.erf %90 : vector<8x8x128xf32>
    %cst_21 = arith.constant 1.000000e+00 : f32
    %92 = vector.broadcast %cst_21 : f32 to vector<8x8x128xf32>
    %93 = arith.addf %92, %91 : vector<8x8x128xf32>
    %94 = arith.mulf %88, %93 : vector<8x8x128xf32>
    %95 = arith.truncf %94 : vector<8x8x128xf32> to vector<8x8x128xbf16>
    %c0_22 = arith.constant 0 : index
    %c0_23 = arith.constant 0 : index
    %c0_24 = arith.constant 0 : index
    %c0_25 = arith.constant 0 : index
    %96 = vector.load %arg8[%c0_22, %c0_23, %c0_24, %c0_25] : memref<1x8x8x128xbf16, #tpu.memory_space<vmem>>, vector<1x8x8x128xbf16>
    %97 = vector.shape_cast %96 : vector<1x8x8x128xbf16> to vector<8x8x128xbf16>
    %98 = vector.shape_cast %95 : vector<8x8x128xbf16> to vector<1x8x8x128xbf16>
    tpu.vector_store %arg8[%c0_22, %c0_23, %c0_24, %c0_25], %98 {strides = array<i32>} : memref<1x8x8x128xbf16, #tpu.memory_space<vmem>>, vector<1x8x8x128xbf16>,
    return
  }
  func.func @transform_0(%arg0: i32, %arg1: i32, %arg2: i32) -> (i32, i32, i32, i32) {
    %c0_i32 = arith.constant 0 : i32
    %c0_i32_0 = arith.constant 0 : i32
    return %arg0, %arg1, %c0_i32, %arg2 : i32, i32, i32, i32
  }
  func.func @transform_1(%arg0: i32, %arg1: i32, %arg2: i32) -> (i32, i32, i32, i32) {
    %c8_i32 = arith.constant 8 : i32
    %0 = arith.muli %arg1, %c8_i32 : i32
    %c1_i32 = arith.constant 1 : i32
    %1 = arith.subi %0, %c1_i32 : i32
    %c0_i32 = arith.constant 0 : i32
    %2 = arith.maxsi %1, %c0_i32 : i32
    %c0_i32_0 = arith.constant 0 : i32
    %c0_i32_1 = arith.constant 0 : i32
    return %arg0, %2, %c0_i32_0, %arg2 : i32, i32, i32, i32
  }
  func.func @transform_2(%arg0: i32, %arg1: i32, %arg2: i32) -> (i32, i32, i32, i32) {
    %c8_i32 = arith.constant 8 : i32
    %0 = arith.muli %arg1, %c8_i32 : i32
    %c8_i32_0 = arith.constant 8 : i32
    %1 = arith.addi %0, %c8_i32_0 : i32
    %c7_i32 = arith.constant 7 : i32
    %2 = arith.minsi %1, %c7_i32 : i32
    %c0_i32 = arith.constant 0 : i32
    %c0_i32_1 = arith.constant 0 : i32
    return %arg0, %2, %c0_i32, %arg2 : i32, i32, i32, i32
  }
  func.func @transform_3(%arg0: i32, %arg1: i32, %arg2: i32) -> (i32, i32) {
    %c0_i32 = arith.constant 0 : i32
    %c0_i32_0 = arith.constant 0 : i32
    return %c0_i32, %arg2 : i32, i32
  }
  func.func @transform_4(%arg0: i32, %arg1: i32, %arg2: i32) -> (i32, i32) {
    %c0_i32 = arith.constant 0 : i32
    %c0_i32_0 = arith.constant 0 : i32
    return %c0_i32, %arg2 : i32, i32
  }
  func.func @transform_5(%arg0: i32, %arg1: i32, %arg2: i32) -> (i32, i32, i32, i32) {
    %c0_i32 = arith.constant 0 : i32
    %c0_i32_0 = arith.constant 0 : i32
    return %arg0, %arg1, %c0_i32, %arg2 : i32, i32, i32, i32
  }
}

</mosaic_0001>

<bundles_post_ra>
// kernel: transformer_block_forward.10
= control target key start
LH: loop header
LB: loop body
LE: loop exit
PB: predicated region body
PF: predicated region fallthrough
CT: control target
= control target key end

     0   :  { %vm35_vm0 = vcmask 261120   ;;  %v324_v10 = vmov 32.0   ;;  %vm135_vm8 = vcmask 257024   ;;  %s452_s0 = inlined_call_operand.vmem [shape: bf16[32,32], index: 0, kind: input, shape index: {}]   ;;  %s453_s2 = inlined_call_operand.vmem [shape: f32[1,32], index: 2, kind: input, shape index: {}]   ;;  %s454_s1 = inlined_call_operand.vmem [shape: bf16[32,32], index: 1, kind: input, shape index: {}]   ;;  %s455_s3 = inlined_call_operand.vmem [shape: bf16[32,32], index: 3, kind: input, shape index: {}]   ;;  %s456_s4 = inlined_call_operand.vmem [shape: f32[1,32], index: 4, kind: input, shape index: {}]   ;;  %s457_s5 = inlined_call_operand.vmem [shape: bf16[32,32], index: 5, kind: output, shape index: {0}]   ;;  %s458_s6 = inlined_call_operand.vmem [shape: bf16[32,32], index: 6, kind: output, shape index: {1}]  }
   0x1   :  { %v306_v0 = vld [vmem:[%s452_s0 + $0x8] sm:$0xff]   ;;  %v299_v1 = vld [vmem:[%s452_s0] sm:$0xff]   ;;  %314 = vrcp.f32 %v324_v10 }
   0x2   :  { %v304_v2 = vunpack.c.l.bf16 %v306_v0  ;;  %v300_v3 = vunpack.c.l.bf16 %v299_v1  ;;  %v305_v6 = vunpack.c.h.bf16 %v306_v0  ;;  %v301_v7 = vunpack.c.h.bf16 %v299_v1  ;;  %v295_v43 = vld [vmem:[%s454_s1 + $0x8] sm:$0xff]  ;;  %v294_v45 = vld [vmem:[%s454_s1] sm:$0xff] }
   0x3   :  { %v297_v44 = vld [vmem:[%s455_s3 + $0x8] sm:$0xff]  ;;  %187 = vmatpush.bf16.msra.mxu0 %v295_v43  ;;  %307 = vmatpush.bf16.msra.mxu2 %v295_v43  ;;  %v296_v46 = vld [vmem:[%s455_s3] sm:$0xff] }
   0x4   :  { %v42_v4 = vsel %vm35_vm0, %v304_v2, 0.0  ;;  %v36_v5 = vsel %vm35_vm0, %v300_v3, 0.0  ;;  %v45_v8 = vsel %vm35_vm0, %v305_v6, 0.0  ;;  %v39_v9 = vsel %vm35_vm0, %v301_v7, 0.0  ;;  %235 = vmatpush.bf16.msra.mxu1 %v297_v44  ;;  %309 = vmatpush.bf16.msra.mxu3 %v297_v44 }
   0x5   :  { %43 = vadd.xlane.f32.xlu0 %v42_v4  ;;  %37 = vadd.xlane.f32.xlu1 %v36_v5 }
   0x7   :  { %v315_v11 = vpop.eup %314  ;;  %188 = vmatpush.bf16.msra.mxu0 %v294_v45  ;;  %308 = vmatpush.bf16.msra.mxu2 %v294_v45 }
   0x8   :  { %v49_v12 = vmul.f32 32.0, %v315_v11  ;;  %vm53_vm1 = vweird.f32 %v315_v11  ;;  %236 = vmatpush.bf16.msra.mxu1 %v296_v46  ;;  %310 = vmatpush.bf16.msra.mxu3 %v296_v46 }
   0xa   :  { %v50_v13 = vsub.f32 1.0, %v49_v12 }
   0xc   :  { %v51_v14 = vmul.f32 %v315_v11, %v50_v13 }
   0xd   :  { %46 = vadd.xlane.f32.xlu0 %v45_v8  ;;  %40 = vadd.xlane.f32.xlu1 %v39_v9 }
   0xe   :  { %v52_v15 = vadd.f32 %v315_v11, %v51_v14 }
  0x10   :  { %v54_v16 = vsel %vm53_vm1, %v315_v11, %v52_v15 }
  0x78   :  { %v44_v17 = vpop.xlane.xlu0 %43  ;;  %v38_v18 = vpop.xlane.xlu1 %37 }
  0x79   :  { %v57_v19 = vmul.f32 %v54_v16, %v44_v17  ;;  %v55_v20 = vmul.f32 %v54_v16, %v38_v18 }
  0x7b   :  { %v370_v21 = vsub.f32 %v304_v2, %v57_v19  ;;  %v372_v22 = vsub.f32 %v300_v3, %v55_v20 }
  0x7d   :  { %v65_v23 = vmul.f32 %v370_v21, %v370_v21  ;;  %v63_v24 = vmul.f32 %v372_v22, %v372_v22 }
  0x7f   :  { %v73_v25 = vsel %vm35_vm0, %v65_v23, 0.0  ;;  %v67_v26 = vsel %vm35_vm0, %v63_v24, 0.0 }
  0x80   :  { %74 = vadd.xlane.f32.xlu2 %v73_v25  ;;  %v47_v27 = vpop.xlane.xlu0 %46  ;;  %68 = vadd.xlane.f32.xlu0 %v67_v26  ;;  %v41_v28 = vpop.xlane.xlu1 %40 }
  0x81   :  { %v58_v29 = vmul.f32 %v54_v16, %v47_v27  ;;  %v56_v30 = vmul.f32 %v54_v16, %v41_v28  ;;  %v312_v27 = vld [vmem:[%s453_s2] ss:$0 sm:$0xff] }
  0x82   :  { %v313_v28 = vld [vmem:[%s456_s4] ss:$0 sm:$0xff] }
  0x83   :  { %v380_v31 = vsub.f32 %v305_v6, %v58_v29  ;;  %v382_v32 = vsub.f32 %v301_v7, %v56_v30 }
  0x85   :  { %v66_v33 = vmul.f32 %v380_v31, %v380_v31  ;;  %v64_v34 = vmul.f32 %v382_v32, %v382_v32 }
  0x87   :  { %v76_v35 = vsel %vm35_vm0, %v66_v33, 0.0  ;;  %v70_v36 = vsel %vm35_vm0, %v64_v34, 0.0 }
  0x88   :  { %77 = vadd.xlane.f32.xlu2 %v76_v35  ;;  %71 = vadd.xlane.f32.xlu1 %v70_v36 }
  0xf3   :  { %v75_v37 = vpop.xlane.xlu2 %74  ;;  %v69_v38 = vpop.xlane.xlu0 %68 }
  0xf4   :  { %v81_v39 = vmul.f32 %v75_v37, %v54_v16  ;;  %v79_v40 = vmul.f32 %v69_v38, %v54_v16 }
  0xf6   :  { %v85_v41 = vadd.f32 1e-05, %v81_v39  ;;  %v83_v42 = vadd.f32 1e-05, %v79_v40 }
  0xf8   :  { %316 = vrsqrt.f32 %v85_v41  ;;  %vm93_vm3 = vweird.f32 %v83_v42  ;;  %vm113_vm5 = vweird.f32 %v85_v41 }
  0xf9   :  { %318 = vrsqrt.f32 %v83_v42 }
  0xfb   :  { %v78_v47 = vpop.xlane.xlu2 %77  ;;  %v72_v48 = vpop.xlane.xlu1 %71 }
  0xfc   :  { %v82_v49 = vmul.f32 %v78_v47, %v54_v16  ;;  %v80_v50 = vmul.f32 %v72_v48, %v54_v16 }
  0xfe   :  { %v317_v51 = vpop.eup %316  ;;  %v86_v52 = vadd.f32 1e-05, %v82_v49  ;;  %v84_v53 = vadd.f32 1e-05, %v80_v50 }
  0xff   :  { %v319_v54 = vpop.eup %318  ;;  %v108_v55 = vmul.f32 %v317_v51, %v85_v41  ;;  %vm114_vm2 = vweird.f32 %v317_v51 }
 0x100   :  { %v88_v56 = vmul.f32 %v319_v54, %v83_v42  ;;  %320 = vrsqrt.f32 %v86_v52  ;;  %vm94_vm4 = vweird.f32 %v319_v54  ;;  %vm115_vm6 = vmor %vm113_vm5, %vm114_vm2  ;;  %vm103_vm10 = vweird.f32 %v84_v53 }
 0x101   :  { %v109_v57 = vmul.f32 %v317_v51, %v108_v55  ;;  %322 = vrsqrt.f32 %v84_v53  ;;  %vm95_vm7 = vmor %vm93_vm3, %vm94_vm4  ;;  %vm123_vm12 = vweird.f32 %v86_v52 }
 0x102   :  { %v89_v58 = vmul.f32 %v319_v54, %v88_v56 }
 0x103   :  { %v110_v59 = vmul.f32 0.5, %v109_v57 }
 0x104   :  { %v90_v60 = vmul.f32 0.5, %v89_v58 }
 0x105   :  { %v111_v61 = vsub.f32 1.5, %v110_v59 }
 0x106   :  { %v321_v62 = vpop.eup %320  ;;  %v91_v63 = vsub.f32 1.5, %v90_v60 }
 0x107   :  { %v323_v0 = vpop.eup %322  ;;  %v112_v1 = vmul.f32 %v317_v51, %v111_v61  ;;  %v118_v2 = vmul.f32 %v321_v62, %v86_v52  ;;  %vm124_vm9 = vweird.f32 %v321_v62 }
 0x108   :  { %v92_v3 = vmul.f32 %v319_v54, %v91_v63  ;;  %v98_v4 = vmul.f32 %v323_v0, %v84_v53  ;;  %vm104_vm11 = vweird.f32 %v323_v0  ;;  %vm125_vm13 = vmor %vm123_vm12, %vm124_vm9 }
 0x109   :  { %v116_v5 = vsel %vm115_vm6, %v317_v51, %v112_v1  ;;  %v119_v6 = vmul.f32 %v321_v62, %v118_v2  ;;  %vm105_vm14 = vmor %vm103_vm10, %vm104_vm11 }
 0x10a   :  { %v129_v7 = vmul.f32 %v116_v5, %v370_v21  ;;  %v96_v8 = vsel %vm95_vm7, %v319_v54, %v92_v3  ;;  %v99_v9 = vmul.f32 %v323_v0, %v98_v4 }
 0x10b   :  { %v127_v10 = vmul.f32 %v96_v8, %v372_v22  ;;  %v120_v11 = vmul.f32 0.5, %v119_v6 }
 0x10c   :  { %v133_v12 = vpack.c.bf16 %v129_v7, %v129_v7  ;;  %v100_v13 = vmul.f32 0.5, %v99_v9 }
 0x10d   :  { %v131_v14 = vpack.c.bf16 %v127_v10, %v127_v10  ;;  %v121_v15 = vsub.f32 1.5, %v120_v11 }
 0x10e   :  { %138 = vst.msk [vmem:[#allocation2 + $0x8] sm:$0xf] %vm135_vm8, %v133_v12  ;;  %v101_v16 = vsub.f32 1.5, %v100_v13 }
 0x10f   :  { %136 = vst.msk [vmem:[#allocation2] sm:$0xf] %vm135_vm8, %v131_v14  ;;  %v122_v17 = vmul.f32 %v321_v62, %v121_v15 }
 0x110   :  { %v102_v18 = vmul.f32 %v323_v0, %v101_v16 }
 0x111   :  { %v126_v19 = vsel %vm125_vm13, %v321_v62, %v122_v17 }
 0x112   :  { %v130_v20 = vmul.f32 %v126_v19, %v380_v31  ;;  %v106_v21 = vsel %vm105_vm14, %v323_v0, %v102_v18 }
 0x113   :  { %v128_v22 = vmul.f32 %v106_v21, %v382_v32 }
 0x114   :  { %v134_v23 = vpack.c.bf16 %v130_v20, %v130_v20 }
 0x115   :  { %v132_v24 = vpack.c.bf16 %v128_v22, %v128_v22 }
 0x116   :  { %139 = vst.msk [vmem:[#allocation2 + $0xc] sm:$0xf] %vm135_vm8, %v134_v23 }
 0x117   :  { %137 = vst.msk [vmem:[#allocation2 + $0x4] sm:$0xf] %vm135_vm8, %v132_v24 }
 0x11d   :  { %v293_v25 = vld [vmem:[#allocation2 + $0x8] sm:$0xff] }
 0x11e   :  { %v292_v26 = vld [vmem:[#allocation2] sm:$0xff]  ;;  %281 = vmatmul.msk.bf16.vlgmr.msra.gmra.mxu2 %vm35_vm0, %v293_v25  ;;  %291 = vmatmul.msk.bf16.vlgmr.msra.gmra.mxu3 %vm35_vm0, %v293_v25 }
 0x11f   :  { %280 = vmatmul.msk.bf16.vlgmr.msra.gmra.mxu0 %vm35_vm0, %v292_v26  ;;  %290 = vmatmul.msk.bf16.vlgmr.msra.gmra.mxu1 %vm35_vm0, %v292_v26 }
 0x19c   :  { %v190_v29 = vpop.f32.mrf.mxu0  ;;  %v238_v30 = vpop.f32.mrf.mxu1 }
 0x19d   :  { %v191_v31 = vadd.f32 %v312_v27, %v190_v29  ;;  %v239_v32 = vadd.f32 %v313_v28, %v238_v30 }
 0x19f   :  { %v200_v33 = vpack.c.bf16 %v191_v31, %v191_v31  ;;  %v248_v34 = vpack.c.bf16 %v239_v32, %v239_v32 }
 0x1a1   :  { %205 = vst.msk [vmem:[%s457_s5] sm:$0xf] %vm135_vm8, %v200_v33  ;;  %v195_v35 = vpop.f32.mrf.mxu2  ;;  %v243_v36 = vpop.f32.mrf.mxu3 }
 0x1a2   :  { %252 = vst.msk [vmem:[%s458_s6] sm:$0xf] %vm135_vm8, %v248_v34  ;;  %v196_v37 = vadd.f32 %v312_v27, %v195_v35  ;;  %v244_v38 = vadd.f32 %v313_v28, %v243_v36 }
 0x1a4   :  { %v202_v39 = vpack.c.bf16 %v196_v37, %v196_v37  ;;  %v250_v40 = vpack.c.bf16 %v244_v38, %v244_v38  ;;  %v192_v41 = vpop.f32.mrf.mxu0  ;;  %v240_v42 = vpop.f32.mrf.mxu1 }
 0x1a5   :  { %v193_v43 = vadd.f32 %v312_v27, %v192_v41  ;;  %v241_v44 = vadd.f32 %v313_v28, %v240_v42 }
 0x1a6   :  { %207 = vst.msk [vmem:[%s457_s5 + $0x8] sm:$0xf] %vm135_vm8, %v202_v39 }
 0x1a7   :  { %254 = vst.msk [vmem:[%s458_s6 + $0x8] sm:$0xf] %vm135_vm8, %v250_v40  ;;  %v201_v45 = vpack.c.bf16 %v193_v43, %v193_v43  ;;  %v249_v46 = vpack.c.bf16 %v241_v44, %v241_v44 }
 0x1a9   :  { %206 = vst.msk [vmem:[%s457_s5 + $0x4] sm:$0xf] %vm135_vm8, %v201_v45  ;;  %v197_v47 = vpop.f32.mrf.mxu2  ;;  %v245_v48 = vpop.f32.mrf.mxu3 }
 0x1aa   :  { %253 = vst.msk [vmem:[%s458_s6 + $0x4] sm:$0xf] %vm135_vm8, %v249_v46  ;;  %v198_v49 = vadd.f32 %v312_v27, %v197_v47  ;;  %v246_v50 = vadd.f32 %v313_v28, %v245_v48 }
 0x1ac   :  { %v203_v51 = vpack.c.bf16 %v198_v49, %v198_v49  ;;  %v251_v52 = vpack.c.bf16 %v246_v50, %v246_v50 }
 0x1ae   :  { %208 = vst.msk [vmem:[%s457_s5 + $0xc] sm:$0xf] %vm135_vm8, %v203_v51 }
 0x1af   :  { %255 = vst.msk [vmem:[%s458_s6 + $0xc] sm:$0xf] %vm135_vm8, %v251_v52 }

// kernel: transformer_block_forward.8
= control target key start
LH: loop header
LB: loop body
LE: loop exit
PB: predicated region body
PF: predicated region fallthrough
CT: control target
= control target key end

     0   :  { %vm35_vm0 = vcmask 261120   ;;  %v715_v32 = vmov 32.0   ;;  %vm411_vm2 = vcmask 257024   ;;  %s1196_s0 = inlined_call_operand.vmem [shape: f32[128,32], index: 0, kind: input, shape index: {}]   ;;  %s1197_s2 = inlined_call_operand.vmem [shape: f32[1,32], index: 2, kind: input, shape index: {}]   ;;  %s1198_s1 = inlined_call_operand.vmem [shape: bf16[32,32], index: 1, kind: input, shape index: {}]   ;;  %s1199_s3 = inlined_call_operand.vmem [shape: bf16[128,32], index: 3, kind: output, shape index: {}]  }
   0x1   :  { %v31_v0 = vld [vmem:[%s1196_s0 + $0x60] sm:$0xff]  ;;  %v754_v6 = vld [vmem:[%s1196_s0 + $0x68] sm:$0xff]  ;;  %v785_v14 = vld [vmem:[%s1196_s0 + $0x50] sm:$0xff]  ;;  %681 = vrcp.f32 %v715_v32 }
   0x2   :  { %v27_v1 = vld [vmem:[%s1196_s0 + $0x40] sm:$0xff]  ;;  %v72_v3 = vsel %vm35_vm0, %v31_v0, 0.0  ;;  %v759_v7 = vld [vmem:[%s1196_s0 + $0x48] sm:$0xff]  ;;  %v75_v9 = vsel %vm35_vm0, %v754_v6, 0.0  ;;  %v66_v17 = vsel %vm35_vm0, %v785_v14, 0.0  ;;  %v796_v18 = vld [vmem:[%s1196_s0 + $0x58] sm:$0xff] }
   0x3   :  { %v745_v2 = vld [vmem:[%s1196_s0] sm:$0xff]  ;;  %v60_v4 = vsel %vm35_vm0, %v27_v1, 0.0  ;;  %73 = vadd.xlane.f32.xlu1 %v72_v3  ;;  %v764_v8 = vld [vmem:[%s1196_s0 + $0x8] sm:$0xff]  ;;  %v63_v10 = vsel %vm35_vm0, %v759_v7, 0.0  ;;  %v801_v19 = vld [vmem:[%s1196_s0 + $0x70] sm:$0xff]  ;;  %v69_v21 = vsel %vm35_vm0, %v796_v18, 0.0 }
   0x4   :  { %v36_v5 = vsel %vm35_vm0, %v745_v2, 0.0  ;;  %61 = vadd.xlane.f32.xlu0 %v60_v4  ;;  %v39_v11 = vsel %vm35_vm0, %v764_v8, 0.0  ;;  %v775_v12 = vld [vmem:[%s1196_s0 + $0x20] sm:$0xff]  ;;  %v780_v13 = vld [vmem:[%s1196_s0 + $0x28] sm:$0xff]  ;;  %v806_v20 = vld [vmem:[%s1196_s0 + $0x78] sm:$0xff]  ;;  %v78_v22 = vsel %vm35_vm0, %v801_v19, 0.0 }
   0x5   :  { %37 = vadd.xlane.f32.xlu2 %v36_v5  ;;  %v48_v15 = vsel %vm35_vm0, %v775_v12, 0.0  ;;  %v51_v16 = vsel %vm35_vm0, %v780_v13, 0.0  ;;  %v81_v23 = vsel %vm35_vm0, %v806_v20, 0.0  ;;  %v817_v24 = vld [vmem:[%s1196_s0 + $0x10] sm:$0xff]  ;;  %v822_v25 = vld [vmem:[%s1196_s0 + $0x18] sm:$0xff] }
   0x6   :  { %v827_v26 = vld [vmem:[%s1196_s0 + $0x30] sm:$0xff]  ;;  %v42_v27 = vsel %vm35_vm0, %v817_v24, 0.0  ;;  %v45_v28 = vsel %vm35_vm0, %v822_v25, 0.0  ;;  %v838_v30 = vld [vmem:[%s1196_s0 + $0x38] sm:$0xff] }
   0x7   :  { %v54_v29 = vsel %vm35_vm0, %v827_v26, 0.0  ;;  %v57_v31 = vsel %vm35_vm0, %v838_v30, 0.0  ;;  %v682_v33 = vpop.eup %681 }
   0x8   :  { %v85_v34 = vmul.f32 32.0, %v682_v33  ;;  %vm89_vm1 = vweird.f32 %v682_v33 }
   0xa   :  { %v86_v35 = vsub.f32 1.0, %v85_v34 }
   0xb   :  { %76 = vadd.xlane.f32.xlu1 %v75_v9 }
   0xc   :  { %64 = vadd.xlane.f32.xlu0 %v63_v10  ;;  %v87_v36 = vmul.f32 %v682_v33, %v86_v35 }
   0xd   :  { %40 = vadd.xlane.f32.xlu2 %v39_v11 }
   0xe   :  { %v88_v37 = vadd.f32 %v682_v33, %v87_v36 }
  0x10   :  { %v842_v38 = vsel %vm89_vm1, %v682_v33, %v88_v37 }
  0x13   :  { %52 = vadd.xlane.f32.xlu1 %v51_v16 }
  0x14   :  { %49 = vadd.xlane.f32.xlu0 %v48_v15 }
  0x15   :  { %67 = vadd.xlane.f32.xlu2 %v66_v17 }
  0x1b   :  { %79 = vadd.xlane.f32.xlu1 %v78_v22 }
  0x1c   :  { %70 = vadd.xlane.f32.xlu0 %v69_v21 }
  0x1d   :  { %82 = vadd.xlane.f32.xlu2 %v81_v23 }
  0x23   :  { %46 = vadd.xlane.f32.xlu1 %v45_v28 }
  0x24   :  { %43 = vadd.xlane.f32.xlu0 %v42_v27 }
  0x25   :  { %55 = vadd.xlane.f32.xlu2 %v54_v29 }
  0x2c   :  { %58 = vadd.xlane.f32.xlu0 %v57_v31 }
  0x76   :  { %v74_v39 = vpop.xlane.xlu1 %73 }
  0x77   :  { %v62_v40 = vpop.xlane.xlu0 %61  ;;  %v103_v41 = vmul.f32 %v842_v38, %v74_v39 }
  0x78   :  { %v99_v42 = vmul.f32 %v842_v38, %v62_v40  ;;  %v38_v43 = vpop.xlane.xlu2 %37 }
  0x79   :  { %v846_v44 = vsub.f32 %v31_v0, %v103_v41  ;;  %v91_v56 = vmul.f32 %v842_v38, %v38_v43 }
  0x7a   :  { %v848_v45 = vsub.f32 %v27_v1, %v99_v42 }
  0x7b   :  { %v135_v47 = vmul.f32 %v846_v44, %v846_v44  ;;  %v876_v63 = vsub.f32 %v745_v2, %v91_v56 }
  0x7c   :  { %v131_v46 = vmul.f32 %v848_v45, %v848_v45 }
  0x7d   :  { %v175_v49 = vsel %vm35_vm0, %v135_v47, 0.0  ;;  %v123_v10 = vmul.f32 %v876_v63, %v876_v63 }
  0x7e   :  { %v163_v48 = vsel %vm35_vm0, %v131_v46, 0.0  ;;  %v77_v50 = vpop.xlane.xlu1 %76  ;;  %176 = vadd.xlane.f32.xlu0 %v175_v49 }
  0x7f   :  { %v65_v51 = vpop.xlane.xlu0 %64  ;;  %164 = vadd.xlane.f32.xlu1 %v163_v48  ;;  %v104_v52 = vmul.f32 %v842_v38, %v77_v50 }
  0x80   :  { %v100_v53 = vmul.f32 %v842_v38, %v65_v51  ;;  %v41_v54 = vpop.xlane.xlu2 %40 }
  0x81   :  { %v92_v55 = vmul.f32 %v842_v38, %v41_v54  ;;  %v861_v57 = vsub.f32 %v754_v6, %v104_v52 }
  0x82   :  { %v864_v58 = vsub.f32 %v759_v7, %v100_v53 }
  0x83   :  { %v867_v59 = vsub.f32 %v764_v8, %v92_v55  ;;  %v136_v60 = vmul.f32 %v861_v57, %v861_v57 }
  0x84   :  { %v132_v61 = vmul.f32 %v864_v58, %v864_v58 }
  0x85   :  { %v124_v62 = vmul.f32 %v867_v59, %v867_v59  ;;  %v178_v0 = vsel %vm35_vm0, %v136_v60, 0.0 }
  0x86   :  { %v166_v1 = vsel %vm35_vm0, %v132_v61, 0.0  ;;  %v53_v5 = vpop.xlane.xlu1 %52 }
  0x87   :  { %v50_v3 = vpop.xlane.xlu0 %49  ;;  %179 = vadd.xlane.f32.xlu1 %v178_v0  ;;  %167 = vadd.xlane.f32.xlu2 %v166_v1  ;;  %v142_v4 = vsel %vm35_vm0, %v124_v62, 0.0  ;;  %v96_v8 = vmul.f32 %v842_v38, %v53_v5 }
  0x88   :  { %v95_v6 = vmul.f32 %v842_v38, %v50_v3  ;;  %143 = vadd.xlane.f32.xlu0 %v142_v4  ;;  %v68_v7 = vpop.xlane.xlu2 %67 }
  0x89   :  { %v101_v9 = vmul.f32 %v842_v38, %v68_v7  ;;  %v893_v15 = vsub.f32 %v780_v13, %v96_v8 }
  0x8a   :  { %v885_v2 = vsub.f32 %v775_v12, %v95_v6  ;;  %v139_v12 = vsel %vm35_vm0, %v123_v10, 0.0 }
  0x8b   :  { %v890_v11 = vsub.f32 %v785_v14, %v101_v9  ;;  %v128_v29 = vmul.f32 %v893_v15, %v893_v15 }
  0x8c   :  { %v127_v16 = vmul.f32 %v885_v2, %v885_v2 }
  0x8d   :  { %v133_v17 = vmul.f32 %v890_v11, %v890_v11  ;;  %v154_v36 = vsel %vm35_vm0, %v128_v29, 0.0 }
  0x8e   :  { %v151_v21 = vsel %vm35_vm0, %v127_v16, 0.0  ;;  %v80_v14 = vpop.xlane.xlu1 %79 }
  0x8f   :  { %v71_v22 = vpop.xlane.xlu0 %70  ;;  %152 = vadd.xlane.f32.xlu1 %v151_v21  ;;  %140 = vadd.xlane.f32.xlu2 %v139_v12  ;;  %v169_v23 = vsel %vm35_vm0, %v133_v17, 0.0  ;;  %v105_v28 = vmul.f32 %v842_v38, %v80_v14 }
  0x90   :  { %v102_v27 = vmul.f32 %v842_v38, %v71_v22  ;;  %170 = vadd.xlane.f32.xlu0 %v169_v23  ;;  %v83_v13 = vpop.xlane.xlu2 %82 }
  0x91   :  { %v106_v31 = vmul.f32 %v842_v38, %v83_v13  ;;  %v914_v34 = vsub.f32 %v801_v19, %v105_v28 }
  0x92   :  { %v908_v32 = vsub.f32 %v796_v18, %v102_v27  ;;  %v672_v27 = vld [vmem:[%s1198_s1 + $0x8] sm:$0xff] }
  0x93   :  { %v911_v33 = vsub.f32 %v806_v20, %v106_v31  ;;  %v137_v43 = vmul.f32 %v914_v34, %v914_v34  ;;  %674 = vmatpush.bf16.msra.mxu2 %v672_v27  ;;  %675 = vmatpush.bf16.msra.mxu3 %v672_v27 }
  0x94   :  { %v134_v35 = vmul.f32 %v908_v32, %v908_v32  ;;  %535 = vmatpush.bf16.msra.mxu0 %v672_v27  ;;  %673 = vmatpush.bf16.msra.mxu1 %v672_v27 }
  0x95   :  { %v138_v37 = vmul.f32 %v911_v33, %v911_v33  ;;  %v181_v51 = vsel %vm35_vm0, %v137_v43, 0.0  ;;  %v671_v43 = vld [vmem:[%s1198_s1] sm:$0xff] }
  0x96   :  { %v172_v39 = vsel %vm35_vm0, %v134_v35, 0.0  ;;  %v47_v20 = vpop.xlane.xlu1 %46 }
  0x97   :  { %173 = vadd.xlane.f32.xlu1 %v172_v39  ;;  %v44_v40 = vpop.xlane.xlu0 %43  ;;  %155 = vadd.xlane.f32.xlu2 %v154_v36  ;;  %v184_v18 = vsel %vm35_vm0, %v138_v37, 0.0  ;;  %v94_v42 = vmul.f32 %v842_v38, %v47_v20 }
  0x98   :  { %v93_v41 = vmul.f32 %v842_v38, %v44_v40  ;;  %185 = vadd.xlane.f32.xlu0 %v184_v18  ;;  %v56_v19 = vpop.xlane.xlu2 %55  ;;  %677 = vmatpush.bf16.msra.mxu2 %v671_v43 }
  0x99   :  { %v97_v46 = vmul.f32 %v842_v38, %v56_v19  ;;  %v935_v49 = vsub.f32 %v822_v25, %v94_v42  ;;  %678 = vmatpush.bf16.msra.mxu3 %v671_v43  ;;  %536 = vmatpush.bf16.msra.mxu0 %v671_v43 }
  0x9a   :  { %v929_v47 = vsub.f32 %v817_v24, %v93_v41  ;;  %676 = vmatpush.bf16.msra.mxu1 %v671_v43 }
  0x9b   :  { %v932_v48 = vsub.f32 %v827_v26, %v97_v46  ;;  %v126_v25 = vmul.f32 %v935_v49, %v935_v49 }
  0x9c   :  { %v125_v50 = vmul.f32 %v929_v47, %v929_v47 }
  0x9d   :  { %v129_v52 = vmul.f32 %v932_v48, %v932_v48  ;;  %v148_v60 = vsel %vm35_vm0, %v126_v25, 0.0 }
  0x9e   :  { %v145_v53 = vsel %vm35_vm0, %v125_v50, 0.0 }
  0x9f   :  { %146 = vadd.xlane.f32.xlu1 %v145_v53  ;;  %v59_v54 = vpop.xlane.xlu0 %58  ;;  %182 = vadd.xlane.f32.xlu2 %v181_v51  ;;  %v157_v24 = vsel %vm35_vm0, %v129_v52, 0.0 }
  0xa0   :  { %v98_v26 = vmul.f32 %v842_v38, %v59_v54  ;;  %158 = vadd.xlane.f32.xlu0 %v157_v24 }
  0xa2   :  { %v948_v55 = vsub.f32 %v838_v30, %v98_v26 }
  0xa4   :  { %v130_v56 = vmul.f32 %v948_v55, %v948_v55 }
  0xa6   :  { %v160_v61 = vsel %vm35_vm0, %v130_v56, 0.0 }
  0xa7   :  { %161 = vadd.xlane.f32.xlu1 %v160_v61  ;;  %149 = vadd.xlane.f32.xlu2 %v148_v60 }
  0xf1   :  { %v177_v0 = vpop.xlane.xlu0 %176 }
  0xf2   :  { %v165_v62 = vpop.xlane.xlu1 %164  ;;  %v199_v3 = vmul.f32 %v177_v0, %v842_v38 }
  0xf3   :  { %v195_v1 = vmul.f32 %v165_v62, %v842_v38 }
  0xf4   :  { %v215_v5 = vadd.f32 1e-06, %v199_v3 }
  0xf5   :  { %v211_v4 = vadd.f32 1e-06, %v195_v1 }
  0xf6   :  { %vm345_vm6 = vweird.f32 %v215_v5 }
  0xf7   :  { %683 = vrsqrt.f32 %v211_v4  ;;  %vm305_vm4 = vweird.f32 %v211_v4 }
  0xf8   :  { %685 = vrsqrt.f32 %v215_v5 }
  0xfa   :  { %v180_v30 = vpop.xlane.xlu1 %179  ;;  %v168_v6 = vpop.xlane.xlu2 %167 }
  0xfb   :  { %v200_v7 = vmul.f32 %v180_v30, %v842_v38  ;;  %v144_v8 = vpop.xlane.xlu0 %143  ;;  %v196_v9 = vmul.f32 %v168_v6, %v842_v38 }
  0xfc   :  { %v188_v10 = vmul.f32 %v144_v8, %v842_v38 }
  0xfd   :  { %v684_v16 = vpop.eup %683  ;;  %v959_v17 = vadd.f32 1e-06, %v200_v7  ;;  %v961_v21 = vadd.f32 1e-06, %v196_v9 }
  0xfe   :  { %v686_v12 = vpop.eup %685  ;;  %v300_v22 = vmul.f32 %v684_v16, %v211_v4  ;;  %v963_v23 = vadd.f32 1e-06, %v188_v10  ;;  %vm306_vm3 = vweird.f32 %v684_v16 }
  0xff   :  { %v340_v14 = vmul.f32 %v686_v12, %v215_v5  ;;  %687 = vrsqrt.f32 %v959_v17  ;;  %vm346_vm5 = vweird.f32 %v686_v12  ;;  %vm307_vm7 = vmor %vm305_vm4, %vm306_vm3  ;;  %vm355_vm9 = vweird.f32 %v959_v17 }
 0x100   :  { %v301_v13 = vmul.f32 %v684_v16, %v300_v22  ;;  %689 = vrsqrt.f32 %v963_v23  ;;  %vm347_vm8 = vmor %vm345_vm6, %vm346_vm5  ;;  %vm235_vm10 = vweird.f32 %v963_v23  ;;  %vm315_vm15 = vweird.f32 %v961_v21 }
 0x101   :  { %v341_v28 = vmul.f32 %v686_v12, %v340_v14  ;;  %691 = vrsqrt.f32 %v961_v21 }
 0x102   :  { %v302_v29 = vmul.f32 0.5, %v301_v13  ;;  %v153_v31 = vpop.xlane.xlu1 %152  ;;  %v141_v35 = vpop.xlane.xlu2 %140 }
 0x103   :  { %v342_v36 = vmul.f32 0.5, %v341_v28  ;;  %v191_v37 = vmul.f32 %v153_v31, %v842_v38  ;;  %v171_v39 = vpop.xlane.xlu0 %170  ;;  %v187_v40 = vmul.f32 %v141_v35, %v842_v38 }
 0x104   :  { %v303_v18 = vsub.f32 1.5, %v302_v29  ;;  %v197_v20 = vmul.f32 %v171_v39, %v842_v38 }
 0x105   :  { %v974_v41 = vpop.eup %687  ;;  %v343_v19 = vsub.f32 1.5, %v342_v36  ;;  %v976_v42 = vadd.f32 1e-06, %v191_v37  ;;  %v992_v26 = vadd.f32 1e-06, %v187_v40 }
 0x106   :  { %v981_v46 = vpop.eup %689  ;;  %v304_v50 = vmul.f32 %v684_v16, %v303_v18  ;;  %v350_v51 = vmul.f32 %v974_v41, %v959_v17  ;;  %v985_v52 = vadd.f32 1e-06, %v197_v20  ;;  %vm356_vm11 = vweird.f32 %v974_v41 }
 0x107   :  { %v987_v53 = vpop.eup %691  ;;  %v344_v54 = vmul.f32 %v686_v12, %v343_v19  ;;  %v230_v24 = vmul.f32 %v981_v46, %v963_v23  ;;  %693 = vrsqrt.f32 %v976_v42  ;;  %vm236_vm12 = vweird.f32 %v981_v46  ;;  %vm357_vm14 = vmor %vm355_vm9, %vm356_vm11 }
 0x108   :  { %v308_v25 = vsel %vm307_vm7, %v684_v16, %v304_v50  ;;  %v351_v56 = vmul.f32 %v974_v41, %v350_v51  ;;  %v310_v60 = vmul.f32 %v987_v53, %v961_v21  ;;  %695 = vrsqrt.f32 %v985_v52  ;;  %vm237_vm1 = vmor %vm235_vm10, %vm236_vm12 }
 0x109   :  { %v387_v61 = vmul.f32 %v308_v25, %v848_v45  ;;  %v348_v62 = vsel %vm347_vm8, %v686_v12, %v344_v54  ;;  %v231_v0 = vmul.f32 %v981_v46, %v230_v24  ;;  %697 = vrsqrt.f32 %v992_v26 }
 0x10a   :  { %v391_v1 = vmul.f32 %v348_v62, %v846_v44  ;;  %v352_v3 = vmul.f32 0.5, %v351_v56  ;;  %v311_v4 = vmul.f32 %v987_v53, %v310_v60  ;;  %v174_v5 = vpop.xlane.xlu1 %173  ;;  %v156_v30 = vpop.xlane.xlu2 %155  ;;  %vm316_vm13 = vweird.f32 %v987_v53 }
 0x10b   :  { %v403_v6 = vpack.c.bf16 %v387_v61, %v387_v61  ;;  %v232_v7 = vmul.f32 0.5, %v231_v0  ;;  %v186_v45 = vpop.xlane.xlu0 %185  ;;  %v198_v12 = vmul.f32 %v174_v5, %v842_v38  ;;  %v192_v14 = vmul.f32 %v156_v30, %v842_v38  ;;  %vm317_vm3 = vmor %vm315_vm15, %vm316_vm13 }
 0x10c   :  { %v407_v8 = vpack.c.bf16 %v391_v1, %v391_v1  ;;  %v353_v9 = vsub.f32 1.5, %v352_v3  ;;  %v312_v10 = vmul.f32 0.5, %v311_v4  ;;  %v202_v22 = vmul.f32 %v186_v45, %v842_v38 }
 0x10d   :  { %v1008_v44 = vpop.eup %693  ;;  %420 = vst.msk [vmem:[#allocation2 + $0x20] sm:$0xf] %vm411_vm2, %v403_v6  ;;  %v233_v16 = vsub.f32 1.5, %v232_v7  ;;  %v1025_v31 = vadd.f32 1e-06, %v198_v12  ;;  %vm265_vm5 = vweird.f32 %v976_v42  ;;  %vm325_vm6 = vweird.f32 %v985_v52 }
 0x10e   :  { %424 = vst.msk [vmem:[#allocation2 + $0x30] sm:$0xf] %vm411_vm2, %v407_v8  ;;  %v354_v27 = vmul.f32 %v974_v41, %v353_v9  ;;  %v313_v13 = vsub.f32 1.5, %v312_v10  ;;  %v260_v28 = vmul.f32 %v1008_v44, %v976_v42  ;;  %v696_v35 = vpop.eup %695  ;;  %v1034_v17 = vadd.f32 1e-06, %v202_v22 }
 0x10f   :  { %v234_v29 = vmul.f32 %v981_v46, %v233_v16  ;;  %v698_v40 = vpop.eup %697  ;;  %v320_v20 = vmul.f32 %v696_v35, %v985_v52  ;;  %vm266_vm4 = vweird.f32 %v1008_v44  ;;  %699 = vrsqrt.f32 %v1025_v31 }
 0x110   :  { %v358_v36 = vsel %vm357_vm14, %v974_v41, %v354_v27  ;;  %v314_v37 = vmul.f32 %v987_v53, %v313_v13  ;;  %v261_v39 = vmul.f32 %v1008_v44, %v260_v28  ;;  %v1041_v41 = vadd.f32 1e-06, %v192_v14  ;;  %vm267_vm7 = vmor %vm265_vm5, %vm266_vm4 }
 0x111   :  { %v392_v18 = vmul.f32 %v358_v36, %v861_v57  ;;  %v238_v21 = vsel %vm237_vm1, %v981_v46, %v234_v29  ;;  %v220_v50 = vmul.f32 %v698_v40, %v992_v26  ;;  %v321_v57 = vmul.f32 %v696_v35, %v320_v20 }
 0x112   :  { %v380_v23 = vmul.f32 %v238_v21, %v867_v59  ;;  %v318_v19 = vsel %vm317_vm3, %v987_v53, %v314_v37  ;;  %v262_v43 = vmul.f32 0.5, %v261_v39  ;;  %v147_v56 = vpop.xlane.xlu1 %146  ;;  %701 = vrsqrt.f32 %v1034_v17  ;;  %v183_v61 = vpop.xlane.xlu2 %182 }
 0x113   :  { %v408_v51 = vpack.c.bf16 %v392_v18, %v392_v18  ;;  %v388_v54 = vmul.f32 %v318_v19, %v864_v58  ;;  %v221_v25 = vmul.f32 %v698_v40, %v220_v50  ;;  %v159_v60 = vpop.xlane.xlu0 %158  ;;  %v322_v53 = vmul.f32 0.5, %v321_v57 }
 0x114   :  { %v396_v46 = vpack.c.bf16 %v380_v23, %v380_v23  ;;  %v263_v24 = vsub.f32 1.5, %v262_v43  ;;  %703 = vrsqrt.f32 %v1041_v41  ;;  %vm326_vm8 = vweird.f32 %v696_v35 }
 0x115   :  { %425 = vst.msk [vmem:[#allocation2 + $0x34] sm:$0xf] %vm411_vm2, %v408_v51  ;;  %v404_v59 = vpack.c.bf16 %v388_v54, %v388_v54  ;;  %v222_v62 = vmul.f32 0.5, %v221_v25  ;;  %v323_v0 = vsub.f32 1.5, %v322_v53  ;;  %v189_v42 = vmul.f32 %v147_v56, %v842_v38  ;;  %v700_v7 = vpop.eup %699  ;;  %vm327_vm10 = vmor %vm325_vm6, %vm326_vm8 }
 0x116   :  { %413 = vst.msk [vmem:[#allocation2 + $0x4] sm:$0xf] %vm411_vm2, %v396_v46  ;;  %v264_v58 = vmul.f32 %v1008_v44, %v263_v24  ;;  %v193_v1 = vmul.f32 %v159_v60, %v842_v38  ;;  %vm226_vm9 = vweird.f32 %v698_v40  ;;  %v201_v5 = vmul.f32 %v183_v61, %v842_v38 }
 0x117   :  { %421 = vst.msk [vmem:[#allocation2 + $0x24] sm:$0xf] %vm411_vm2, %v404_v59  ;;  %v223_v4 = vsub.f32 1.5, %v222_v62  ;;  %v324_v6 = vmul.f32 %v696_v35, %v323_v0  ;;  %vm225_vm11 = vweird.f32 %v992_v26  ;;  %v1067_v8 = vadd.f32 1e-06, %v189_v42 }
 0x118   :  { %v268_v3 = vsel %vm267_vm7, %v1008_v44, %v264_v58  ;;  %v702_v9 = vpop.eup %701  ;;  %vm227_vm12 = vmor %vm225_vm11, %vm226_vm9  ;;  %v330_v44 = vmul.f32 %v700_v7, %v1025_v31  ;;  %v1070_v12 = vadd.f32 1e-06, %v193_v1  ;;  %v1074_v27 = vadd.f32 1e-06, %v201_v5 }
 0x119   :  { %v383_v30 = vmul.f32 %v268_v3, %v885_v2  ;;  %v224_v45 = vmul.f32 %v698_v40, %v223_v4  ;;  %v328_v16 = vsel %vm327_vm10, %v696_v35, %v324_v6  ;;  %v370_v52 = vmul.f32 %v702_v9, %v1034_v17 }
 0x11a   :  { %v704_v22 = vpop.eup %703  ;;  %v389_v2 = vmul.f32 %v328_v16, %v890_v11  ;;  %v331_v28 = vmul.f32 %v700_v7, %v330_v44  ;;  %705 = vrsqrt.f32 %v1067_v8  ;;  %v162_v37 = vpop.xlane.xlu1 %161  ;;  %vm336_vm13 = vweird.f32 %v700_v7 }
 0x11b   :  { %v399_v10 = vpack.c.bf16 %v383_v30, %v383_v30  ;;  %v228_v14 = vsel %vm227_vm12, %v698_v40, %v224_v45  ;;  %v270_v29 = vmul.f32 %v704_v22, %v1041_v41  ;;  %v371_v36 = vmul.f32 %v702_v9, %v370_v52  ;;  %v150_v21 = vpop.xlane.xlu2 %149 }
 0x11c   :  { %v669_v13 = vld [vmem:[#allocation2 + $0x30] sm:$0xff]  ;;  %v379_v26 = vmul.f32 %v228_v14, %v876_v63  ;;  %v405_v35 = vpack.c.bf16 %v389_v2, %v389_v2  ;;  %v332_v40 = vmul.f32 0.5, %v331_v28  ;;  %707 = vrsqrt.f32 %v1070_v12 }
 0x11d   :  { %416 = vst.msk [vmem:[#allocation2 + $0x10] sm:$0xf] %vm411_vm2, %v399_v10  ;;  %661 = vmatmul.msk.bf16.vlgmr.msra.gmra.mxu3 %vm35_vm0, %v669_v13  ;;  %v271_v18 = vmul.f32 %v704_v22, %v270_v29  ;;  %v372_v63 = vmul.f32 0.5, %v371_v36  ;;  %709 = vrsqrt.f32 %v1074_v27  ;;  %v194_v19 = vmul.f32 %v162_v37, %v842_v38 }
 0x11e   :  { %v667_v39 = vld [vmem:[#allocation2 + $0x20] sm:$0xff]  ;;  %v395_v11 = vpack.c.bf16 %v379_v26, %v379_v26  ;;  %422 = vst.msk [vmem:[#allocation2 + $0x28] sm:$0xf] %vm411_vm2, %v405_v35  ;;  %v333_v20 = vsub.f32 1.5, %v332_v40  ;;  %vm375_vm14 = vweird.f32 %v1034_v17  ;;  %vm376_vm15 = vweird.f32 %v702_v9 }
 0x11f   :  { %659 = vmatmul.msk.bf16.vlgmr.msra.gmra.mxu2 %vm35_vm0, %v667_v39  ;;  %v272_v23 = vmul.f32 0.5, %v271_v18  ;;  %v373_v43 = vsub.f32 1.5, %v372_v63  ;;  %v190_v50 = vmul.f32 %v150_v21, %v842_v38  ;;  %vm335_vm1 = vweird.f32 %v1025_v31  ;;  %vm377_vm6 = vmor %vm375_vm14, %vm376_vm15 }
 0x120   :  { %412 = vst.msk [vmem:[#allocation2] sm:$0xf] %vm411_vm2, %v395_v11  ;;  %v334_v51 = vmul.f32 %v700_v7, %v333_v20  ;;  %vm276_vm3 = vweird.f32 %v704_v22  ;;  %v706_v57 = vpop.eup %705  ;;  %vm337_vm4 = vmor %vm335_vm1, %vm336_vm13  ;;  %vm275_vm5 = vweird.f32 %v1041_v41  ;;  %v1092_v17 = vadd.f32 1e-06, %v194_v19 }
 0x121   :  { %v273_v54 = vsub.f32 1.5, %v272_v23  ;;  %v374_v46 = vmul.f32 %v702_v9, %v373_v43  ;;  %v240_v60 = vmul.f32 %v706_v57, %v1067_v8  ;;  %vm277_vm7 = vmor %vm275_vm5, %vm276_vm3  ;;  %v1096_v61 = vadd.f32 1e-06, %v190_v50 }
 0x122   :  { %v708_v24 = vpop.eup %707  ;;  %v338_v25 = vsel %vm337_vm4, %v700_v7, %v334_v51  ;;  %711 = vrsqrt.f32 %v1092_v17  ;;  %vm246_vm8 = vweird.f32 %v706_v57  ;;  %vm285_vm9 = vweird.f32 %v1070_v12 }
 0x123   :  { %v274_v56 = vmul.f32 %v704_v22, %v273_v54  ;;  %v710_v59 = vpop.eup %709  ;;  %v390_v38 = vmul.f32 %v338_v25, %v908_v32  ;;  %v378_v53 = vsel %vm377_vm6, %v702_v9, %v374_v46  ;;  %v280_v31 = vmul.f32 %v708_v24, %v1070_v12 }
 0x124   :  { %v394_v58 = vmul.f32 %v378_v53, %v911_v33  ;;  %v241_v62 = vmul.f32 %v706_v57, %v240_v60  ;;  %v360_v0 = vmul.f32 %v710_v59, %v1074_v27  ;;  %713 = vrsqrt.f32 %v1096_v61 }
 0x125   :  { %v278_v41 = vsel %vm277_vm7, %v704_v22, %v274_v56  ;;  %v406_v42 = vpack.c.bf16 %v390_v38, %v390_v38  ;;  %v281_v3 = vmul.f32 %v708_v24, %v280_v31  ;;  %vm286_vm10 = vweird.f32 %v708_v24 }
 0x126   :  { %v384_v1 = vmul.f32 %v278_v41, %v893_v15  ;;  %v410_v5 = vpack.c.bf16 %v394_v58, %v394_v58  ;;  %v242_v30 = vmul.f32 0.5, %v241_v62  ;;  %v361_v32 = vmul.f32 %v710_v59, %v360_v0  ;;  %vm287_vm14 = vmor %vm285_vm9, %vm286_vm10 }
 0x127   :  { %v663_v4 = vld [vmem:[#allocation2] sm:$0xff]  ;;  %423 = vst.msk [vmem:[#allocation2 + $0x2c] sm:$0xf] %vm411_vm2, %v406_v42  ;;  %v282_v7 = vmul.f32 0.5, %v281_v3  ;;  %vm245_vm11 = vweird.f32 %v1067_v8  ;;  %vm366_vm12 = vweird.f32 %v710_v59  ;;  %vm365_vm15 = vweird.f32 %v1074_v27 }
 0x128   :  { %v400_v6 = vpack.c.bf16 %v384_v1, %v384_v1  ;;  %655 = vmatmul.msk.bf16.vlgmr.msra.gmra.mxu0 %vm35_vm0, %v663_v4  ;;  %427 = vst.msk [vmem:[#allocation2 + $0x3c] sm:$0xf] %vm411_vm2, %v410_v5  ;;  %v243_v33 = vsub.f32 1.5, %v242_v30  ;;  %v362_v15 = vmul.f32 0.5, %v361_v32  ;;  %vm247_vm13 = vmor %vm245_vm11, %vm246_vm8  ;;  %v712_v44 = vpop.eup %711  ;;  %vm295_vm5 = vweird.f32 %v1092_v17 }
 0x129   :  { %v283_v45 = vsub.f32 1.5, %v282_v7  ;;  %vm367_vm1 = vmor %vm365_vm15, %vm366_vm12  ;;  %v290_v12 = vmul.f32 %v712_v44, %v1092_v17  ;;  %vm296_vm3 = vweird.f32 %v712_v44  ;;  %vm255_vm7 = vweird.f32 %v1096_v61 }
 0x12a   :  { %417 = vst.msk [vmem:[#allocation2 + $0x14] sm:$0xf] %vm411_vm2, %v400_v6  ;;  %v244_v9 = vmul.f32 %v706_v57, %v243_v33  ;;  %v363_v10 = vsub.f32 1.5, %v362_v15  ;;  %v714_v14 = vpop.eup %713  ;;  %vm297_vm6 = vmor %vm295_vm5, %vm296_vm3 }
 0x12b   :  { %v284_v16 = vmul.f32 %v708_v24, %v283_v45  ;;  %v250_v28 = vmul.f32 %v714_v14, %v1096_v61  ;;  %v291_v37 = vmul.f32 %v712_v44, %v290_v12  ;;  %vm256_vm4 = vweird.f32 %v714_v14 }
 0x12c   :  { %v248_v22 = vsel %vm247_vm13, %v706_v57, %v244_v9  ;;  %v364_v2 = vmul.f32 %v710_v59, %v363_v10  ;;  %vm257_vm8 = vmor %vm255_vm7, %vm256_vm4 }
 0x12d   :  { %v381_v52 = vmul.f32 %v248_v22, %v929_v47  ;;  %v288_v13 = vsel %vm287_vm14, %v708_v24, %v284_v16  ;;  %v251_v11 = vmul.f32 %v714_v14, %v250_v28  ;;  %v292_v40 = vmul.f32 0.5, %v291_v37 }
 0x12e   :  { %v385_v26 = vmul.f32 %v288_v13, %v932_v48  ;;  %v368_v8 = vsel %vm367_vm1, %v710_v59, %v364_v2  ;;  %v668_v29 = vld [vmem:[#allocation2 + $0x28] sm:$0xff] }
 0x12f   :  { %v397_v35 = vpack.c.bf16 %v381_v52, %v381_v52  ;;  %v393_v36 = vmul.f32 %v368_v8, %v914_v34  ;;  %660 = vmatmul.msk.bf16.gmra.mxu2 %vm35_vm0, %v668_v29  ;;  %v252_v48 = vmul.f32 0.5, %v251_v11  ;;  %v293_v18 = vsub.f32 1.5, %v292_v40 }
 0x130   :  { %v401_v39 = vpack.c.bf16 %v385_v26, %v385_v26 }
 0x131   :  { %v665_v27 = vld [vmem:[#allocation2 + $0x10] sm:$0xff]  ;;  %414 = vst.msk [vmem:[#allocation2 + $0x8] sm:$0xf] %vm411_vm2, %v397_v35  ;;  %v409_v47 = vpack.c.bf16 %v393_v36, %v393_v36  ;;  %v253_v34 = vsub.f32 1.5, %v252_v48  ;;  %v294_v21 = vmul.f32 %v712_v44, %v293_v18 }
 0x132   :  { %418 = vst.msk [vmem:[#allocation2 + $0x18] sm:$0xf] %vm411_vm2, %v401_v39  ;;  %657 = vmatmul.msk.bf16.vlgmr.msra.gmra.mxu1 %vm35_vm0, %v665_v27 }
 0x133   :  { %426 = vst.msk [vmem:[#allocation2 + $0x38] sm:$0xf] %vm411_vm2, %v409_v47  ;;  %v254_v63 = vmul.f32 %v714_v14, %v253_v34  ;;  %v298_v20 = vsel %vm297_vm6, %v712_v44, %v294_v21 }
 0x134   :  { %v386_v23 = vmul.f32 %v298_v20, %v948_v55  ;;  %v680_v55 = vld [vmem:[%s1197_s2] ss:$0 sm:$0xff] }
 0x135   :  { %v258_v19 = vsel %vm257_vm8, %v714_v14, %v254_v63 }
 0x136   :  { %v382_v43 = vmul.f32 %v258_v19, %v935_v49  ;;  %v402_v50 = vpack.c.bf16 %v386_v23, %v386_v23 }
 0x138   :  { %v398_v54 = vpack.c.bf16 %v382_v43, %v382_v43  ;;  %419 = vst.msk [vmem:[#allocation2 + $0x1c] sm:$0xf] %vm411_vm2, %v402_v50 }
 0x13a   :  { %v670_v51 = vld [vmem:[#allocation2 + $0x38] sm:$0xff]  ;;  %415 = vst.msk [vmem:[#allocation2 + $0xc] sm:$0xf] %vm411_vm2, %v398_v54 }
 0x13b   :  { %662 = vmatmul.msk.bf16.gmra.mxu3 %vm35_vm0, %v670_v51 }
 0x13f   :  { %v666_v57 = vld [vmem:[#allocation2 + $0x18] sm:$0xff] }
 0x141   :  { %v664_v46 = vld [vmem:[#allocation2 + $0x8] sm:$0xff] }
 0x142   :  { %658 = vmatmul.msk.bf16.gmra.mxu1 %vm35_vm0, %v666_v57  ;;  %656 = vmatmul.msk.bf16.gmra.mxu0 %vm35_vm0, %v664_v46 }
 0x1a0   :  { %v568_v49 = vpop.f32.mrf.mxu3 }
 0x1a1   :  { %v569_v24 = vadd.f32 %v680_v55, %v568_v49 }
 0x1a2   :  { %v558_v25 = vpop.f32.mrf.mxu2 }
 0x1a3   :  { %v559_v56 = vadd.f32 %v680_v55, %v558_v25  ;;  %v590_v60 = vpack.c.bf16 %v569_v24, %v569_v24 }
 0x1a5   :  { %v586_v17 = vpack.c.bf16 %v559_v56, %v559_v56  ;;  %607 = vst.msk [vmem:[%s1199_s3 + $0x30] sm:$0xf] %vm411_vm2, %v590_v60  ;;  %v538_v59 = vpop.f32.mrf.mxu0 }
 0x1a6   :  { %v539_v38 = vadd.f32 %v680_v55, %v538_v59 }
 0x1a7   :  { %603 = vst.msk [vmem:[%s1199_s3 + $0x20] sm:$0xf] %vm411_vm2, %v586_v17 }
 0x1a8   :  { %v570_v53 = vpop.f32.mrf.mxu3  ;;  %v578_v31 = vpack.c.bf16 %v539_v38, %v539_v38 }
 0x1a9   :  { %v571_v61 = vadd.f32 %v680_v55, %v570_v53 }
 0x1aa   :  { %v560_v58 = vpop.f32.mrf.mxu2  ;;  %595 = vst.msk [vmem:[%s1199_s3] sm:$0xf] %vm411_vm2, %v578_v31 }
 0x1ab   :  { %v561_v41 = vadd.f32 %v680_v55, %v560_v58  ;;  %v591_v62 = vpack.c.bf16 %v571_v61, %v571_v61 }
 0x1ad   :  { %v587_v0 = vpack.c.bf16 %v561_v41, %v561_v41  ;;  %608 = vst.msk [vmem:[%s1199_s3 + $0x34] sm:$0xf] %vm411_vm2, %v591_v62  ;;  %v540_v42 = vpop.f32.mrf.mxu0 }
 0x1ae   :  { %v541_v1 = vadd.f32 %v680_v55, %v540_v42 }
 0x1af   :  { %604 = vst.msk [vmem:[%s1199_s3 + $0x24] sm:$0xf] %vm411_vm2, %v587_v0  ;;  %v548_v4 = vpop.f32.mrf.mxu1 }
 0x1b0   :  { %v579_v3 = vpack.c.bf16 %v541_v1, %v541_v1  ;;  %v549_v5 = vadd.f32 %v680_v55, %v548_v4 }
 0x1b2   :  { %596 = vst.msk [vmem:[%s1199_s3 + $0x4] sm:$0xf] %vm411_vm2, %v579_v3  ;;  %v582_v30 = vpack.c.bf16 %v549_v5, %v549_v5  ;;  %v563_v32 = vpop.f32.mrf.mxu2 }
 0x1b3   :  { %v564_v6 = vadd.f32 %v680_v55, %v563_v32 }
 0x1b4   :  { %599 = vst.msk [vmem:[%s1199_s3 + $0x10] sm:$0xf] %vm411_vm2, %v582_v30 }
 0x1b5   :  { %v588_v7 = vpack.c.bf16 %v564_v6, %v564_v6 }
 0x1b7   :  { %v550_v33 = vpop.f32.mrf.mxu1  ;;  %605 = vst.msk [vmem:[%s1199_s3 + $0x28] sm:$0xf] %vm411_vm2, %v588_v7 }
 0x1b8   :  { %v551_v15 = vadd.f32 %v680_v55, %v550_v33 }
 0x1ba   :  { %v583_v45 = vpack.c.bf16 %v551_v15, %v551_v15  ;;  %v565_v9 = vpop.f32.mrf.mxu2 }
 0x1bb   :  { %v566_v10 = vadd.f32 %v680_v55, %v565_v9 }
 0x1bc   :  { %600 = vst.msk [vmem:[%s1199_s3 + $0x14] sm:$0xf] %vm411_vm2, %v583_v45 }
 0x1bd   :  { %v589_v16 = vpack.c.bf16 %v566_v10, %v566_v10 }
 0x1be   :  { %v573_v44 = vpop.f32.mrf.mxu3 }
 0x1bf   :  { %606 = vst.msk [vmem:[%s1199_s3 + $0x2c] sm:$0xf] %vm411_vm2, %v589_v16  ;;  %v574_v22 = vadd.f32 %v680_v55, %v573_v44  ;;  %v553_v14 = vpop.f32.mrf.mxu1  ;;  %v543_v52 = vpop.f32.mrf.mxu0 }
 0x1c0   :  { %v554_v13 = vadd.f32 %v680_v55, %v553_v14  ;;  %v544_v12 = vadd.f32 %v680_v55, %v543_v52 }
 0x1c1   :  { %v592_v2 = vpack.c.bf16 %v574_v22, %v574_v22 }
 0x1c2   :  { %v584_v26 = vpack.c.bf16 %v554_v13, %v554_v13  ;;  %v580_v8 = vpack.c.bf16 %v544_v12, %v544_v12 }
 0x1c3   :  { %609 = vst.msk [vmem:[%s1199_s3 + $0x38] sm:$0xf] %vm411_vm2, %v592_v2 }
 0x1c4   :  { %601 = vst.msk [vmem:[%s1199_s3 + $0x18] sm:$0xf] %vm411_vm2, %v584_v26 }
 0x1c5   :  { %597 = vst.msk [vmem:[%s1199_s3 + $0x8] sm:$0xf] %vm411_vm2, %v580_v8 }
 0x1c6   :  { %v575_v28 = vpop.f32.mrf.mxu3 }
 0x1c7   :  { %v576_v29 = vadd.f32 %v680_v55, %v575_v28  ;;  %v555_v36 = vpop.f32.mrf.mxu1  ;;  %v545_v37 = vpop.f32.mrf.mxu0 }
 0x1c8   :  { %v556_v39 = vadd.f32 %v680_v55, %v555_v36  ;;  %v546_v11 = vadd.f32 %v680_v55, %v545_v37 }
 0x1c9   :  { %v593_v35 = vpack.c.bf16 %v576_v29, %v576_v29 }
 0x1ca   :  { %v585_v27 = vpack.c.bf16 %v556_v39, %v556_v39  ;;  %v581_v47 = vpack.c.bf16 %v546_v11, %v546_v11 }
 0x1cb   :  { %610 = vst.msk [vmem:[%s1199_s3 + $0x3c] sm:$0xf] %vm411_vm2, %v593_v35 }
 0x1cc   :  { %602 = vst.msk [vmem:[%s1199_s3 + $0x1c] sm:$0xf] %vm411_vm2, %v585_v27 }
 0x1cd   :  { %598 = vst.msk [vmem:[%s1199_s3 + $0xc] sm:$0xf] %vm411_vm2, %v581_v47 }

// kernel: transformer_block_forward.9
= control target key start
LH: loop header
LB: loop body
LE: loop exit
PB: predicated region body
PF: predicated region fallthrough
CT: control target
= control target key end

     0   :  { %s760_s16 = smov 96   ;;  %s761_s17 = smov 64   ;;  %vm18_vm0 = vcmask 261120   ;;  %v763_v32 = vmov 32.0   ;;  %s1280_s0 = inlined_call_operand.vmem [shape: f32[32,128], index: 0, kind: input, shape index: {}]   ;;  %s1281_s2 = inlined_call_operand.vmem [shape: f32[1,32], index: 2, kind: input, shape index: {}]   ;;  %s1282_s1 = inlined_call_operand.vmem [shape: bf16[128,32], index: 1, kind: input, shape index: {}]   ;;  %s1283_s3 = inlined_call_operand.vmem [shape: bf16[32,32], index: 3, kind: output, shape index: {}]  }
   0x1   :  { %v788_v0 = vld [vmem:[%s1280_s0 + $0x10] sm:$0xff]  ;;  %v793_v1 = vld [vmem:[%s1280_s0] sm:$0xff]  ;;  %v804_v2 = vld [vmem:[%s1280_s0 + $0x18] sm:$0xff]  ;;  %s762_s22 = smov 32   ;;  %726 = vrcp.f32 %v763_v32 }
   0x2   :  { %135 = vrot.lane.b32.xlu1 %v788_v0, %s760_s16  ;;  %251 = vrot.lane.b32.xlu2 %v793_v1, %s761_s17  ;;  %v809_v3 = vld [vmem:[%s1280_s0 + $0x8] sm:$0xff]  ;;  %v28_v4 = vsel %vm18_vm0, %v793_v1, 0.0  ;;  %v34_v5 = vsel %vm18_vm0, %v788_v0, 0.0  ;;  %v37_v7 = vsel %vm18_vm0, %v804_v2, 0.0 }
   0x3   :  { %131 = vrot.lane.b32.xlu0 %v793_v1, %s760_s16  ;;  %v31_v6 = vsel %vm18_vm0, %v809_v3, 0.0 }
   0x7   :  { %v727_v33 = vpop.eup %726 }
   0x8   :  { %v41_v34 = vmul.f32 32.0, %v727_v33  ;;  %vm45_vm1 = vweird.f32 %v727_v33 }
   0xa   :  { %137 = vrot.lane.b32.xlu1 %v804_v2, %s760_s16  ;;  %253 = vrot.lane.b32.xlu2 %v809_v3, %s761_s17  ;;  %v42_v35 = vsub.f32 1.0, %v41_v34 }
   0xb   :  { %133 = vrot.lane.b32.xlu0 %v809_v3, %s760_s16 }
   0xc   :  { %v43_v36 = vmul.f32 %v727_v33, %v42_v35 }
   0xe   :  { %v44_v37 = vadd.f32 %v727_v33, %v43_v36 }
  0x10   :  { %v849_v38 = vsel %vm45_vm1, %v727_v33, %v44_v37 }
  0x12   :  { %257 = vrot.lane.b32.xlu1 %v804_v2, %s761_s17  ;;  %371 = vrot.lane.b32.xlu2 %v793_v1, %s762_s22 }
  0x13   :  { %255 = vrot.lane.b32.xlu0 %v788_v0, %s761_s17 }
  0x1a   :  { %375 = vrot.lane.b32.xlu1 %v788_v0, %s762_s22  ;;  %377 = vrot.lane.b32.xlu2 %v804_v2, %s762_s22 }
  0x1b   :  { %373 = vrot.lane.b32.xlu0 %v809_v3, %s762_s22 }
  0x43   :  { %29 = vadd.xlane.f32.xlu2 %v28_v4 }
  0x44   :  { %35 = vadd.xlane.f32.xlu1 %v34_v5 }
  0x45   :  { %32 = vadd.xlane.f32.xlu0 %v31_v6 }
  0x4b   :  { %38 = vadd.xlane.f32.xlu2 %v37_v7 }
  0x5c   :  { %v252_v8 = vpop.permute.xlu2 %251 }
  0x5d   :  { %v263_v14 = vsel %vm18_vm0, %v252_v8, 0.0 }
  0x64   :  { %v254_v17 = vpop.permute.xlu2 %253 }
  0x65   :  { %v266_v19 = vsel %vm18_vm0, %v254_v17, 0.0 }
  0x6c   :  { %v372_v24 = vpop.permute.xlu2 %371 }
  0x6d   :  { %v383_v25 = vsel %vm18_vm0, %v372_v24, 0.0 }
  0x74   :  { %v136_v9 = vpop.permute.xlu1 %135  ;;  %v378_v30 = vpop.permute.xlu2 %377 }
  0x75   :  { %v132_v10 = vpop.permute.xlu0 %131  ;;  %v149_v11 = vsel %vm18_vm0, %v136_v9, 0.0  ;;  %v392_v31 = vsel %vm18_vm0, %v378_v30, 0.0 }
  0x76   :  { %v143_v12 = vsel %vm18_vm0, %v132_v10, 0.0  ;;  %150 = vadd.xlane.f32.xlu2 %v149_v11 }
  0x77   :  { %144 = vadd.xlane.f32.xlu0 %v143_v12 }
  0x7c   :  { %v138_v13 = vpop.permute.xlu1 %137 }
  0x7d   :  { %v134_v15 = vpop.permute.xlu0 %133  ;;  %v152_v16 = vsel %vm18_vm0, %v138_v13, 0.0 }
  0x7e   :  { %v146_v18 = vsel %vm18_vm0, %v134_v15, 0.0  ;;  %153 = vadd.xlane.f32.xlu2 %v152_v16 }
  0x7f   :  { %264 = vadd.xlane.f32.xlu0 %v263_v14  ;;  %147 = vadd.xlane.f32.xlu1 %v146_v18 }
  0x84   :  { %v258_v20 = vpop.permute.xlu1 %257 }
  0x85   :  { %v272_v21 = vsel %vm18_vm0, %v258_v20, 0.0  ;;  %v256_v22 = vpop.permute.xlu0 %255 }
  0x86   :  { %v269_v23 = vsel %vm18_vm0, %v256_v22, 0.0 }
  0x87   :  { %267 = vadd.xlane.f32.xlu1 %v266_v19  ;;  %273 = vadd.xlane.f32.xlu0 %v272_v21 }
  0x88   :  { %270 = vadd.xlane.f32.xlu2 %v269_v23 }
  0x8c   :  { %v376_v26 = vpop.permute.xlu1 %375 }
  0x8d   :  { %v389_v27 = vsel %vm18_vm0, %v376_v26, 0.0  ;;  %v374_v28 = vpop.permute.xlu0 %373 }
  0x8e   :  { %v386_v29 = vsel %vm18_vm0, %v374_v28, 0.0 }
  0x8f   :  { %384 = vadd.xlane.f32.xlu1 %v383_v25  ;;  %390 = vadd.xlane.f32.xlu0 %v389_v27 }
  0x90   :  { %387 = vadd.xlane.f32.xlu2 %v386_v29 }
  0x97   :  { %393 = vadd.xlane.f32.xlu1 %v392_v31 }
  0xb6   :  { %v30_v39 = vpop.xlane.xlu2 %29 }
  0xb7   :  { %v47_v40 = vmul.f32 %v849_v38, %v30_v39  ;;  %v36_v41 = vpop.xlane.xlu1 %35 }
  0xb8   :  { %v49_v42 = vmul.f32 %v849_v38, %v36_v41  ;;  %v33_v43 = vpop.xlane.xlu0 %32 }
  0xb9   :  { %v854_v44 = vsub.f32 %v793_v1, %v47_v40  ;;  %v48_v45 = vmul.f32 %v849_v38, %v33_v43 }
  0xba   :  { %v858_v46 = vsub.f32 %v788_v0, %v49_v42 }
  0xbb   :  { %v861_v47 = vsub.f32 %v809_v3, %v48_v45  ;;  %v55_v48 = vmul.f32 %v854_v44, %v854_v44 }
  0xbc   :  { %v57_v49 = vmul.f32 %v858_v46, %v858_v46 }
  0xbd   :  { %v59_v50 = vsel %vm18_vm0, %v55_v48, 0.0  ;;  %v56_v51 = vmul.f32 %v861_v47, %v861_v47 }
  0xbe   :  { %60 = vadd.xlane.f32.xlu2 %v59_v50  ;;  %v39_v52 = vpop.xlane.xlu2 %38  ;;  %v65_v53 = vsel %vm18_vm0, %v57_v49, 0.0 }
  0xbf   :  { %v50_v54 = vmul.f32 %v849_v38, %v39_v52  ;;  %66 = vadd.xlane.f32.xlu0 %v65_v53  ;;  %v62_v55 = vsel %vm18_vm0, %v56_v51, 0.0 }
  0xc0   :  { %63 = vadd.xlane.f32.xlu1 %v62_v55 }
  0xc1   :  { %v874_v56 = vsub.f32 %v804_v2, %v50_v54 }
  0xc3   :  { %v58_v57 = vmul.f32 %v874_v56, %v874_v56 }
  0xc5   :  { %v68_v58 = vsel %vm18_vm0, %v58_v57, 0.0 }
  0xc6   :  { %69 = vadd.xlane.f32.xlu2 %v68_v58 }
  0xe9   :  { %v151_v59 = vpop.xlane.xlu2 %150 }
  0xea   :  { %v145_v60 = vpop.xlane.xlu0 %144  ;;  %v157_v61 = vmul.f32 %v151_v59, %v849_v38 }
  0xeb   :  { %v155_v62 = vmul.f32 %v145_v60, %v849_v38 }
  0xec   :  { %v882_v63 = vsub.f32 %v788_v0, %v157_v61 }
  0xed   :  { %v885_v4 = vsub.f32 %v793_v1, %v155_v62 }
  0xee   :  { %v165_v5 = vmul.f32 %v882_v63, %v882_v63 }
  0xef   :  { %v163_v6 = vmul.f32 %v885_v4, %v885_v4 }
  0xf0   :  { %175 = vrot.lane.b32.xlu2 %v165_v5, %s760_s16 }
  0xf1   :  { %171 = vrot.lane.b32.xlu0 %v163_v6, %s760_s16  ;;  %v154_v7 = vpop.xlane.xlu2 %153 }
  0xf2   :  { %v148_v8 = vpop.xlane.xlu1 %147  ;;  %v265_v9 = vpop.xlane.xlu0 %264  ;;  %v158_v10 = vmul.f32 %v154_v7, %v849_v38 }
  0xf3   :  { %v156_v11 = vmul.f32 %v148_v8, %v849_v38  ;;  %v275_v15 = vmul.f32 %v265_v9, %v849_v38 }
  0xf4   :  { %v896_v12 = vsub.f32 %v804_v2, %v158_v10 }
  0xf5   :  { %v899_v13 = vsub.f32 %v809_v3, %v156_v11  ;;  %v909_v19 = vsub.f32 %v793_v1, %v275_v15 }
  0xf6   :  { %v166_v14 = vmul.f32 %v896_v12, %v896_v12 }
  0xf7   :  { %v164_v16 = vmul.f32 %v899_v13, %v899_v13  ;;  %v283_v26 = vmul.f32 %v909_v19, %v909_v19 }
  0xf9   :  { %173 = vrot.lane.b32.xlu1 %v164_v16, %s760_s16  ;;  %177 = vrot.lane.b32.xlu0 %v166_v14, %s760_s16 }
  0xfa   :  { %v268_v17 = vpop.xlane.xlu1 %267  ;;  %v274_v18 = vpop.xlane.xlu0 %273 }
  0xfb   :  { %v276_v20 = vmul.f32 %v268_v17, %v849_v38  ;;  %v271_v21 = vpop.xlane.xlu2 %270  ;;  %v278_v24 = vmul.f32 %v274_v18, %v849_v38 }
  0xfc   :  { %v277_v22 = vmul.f32 %v271_v21, %v849_v38 }
  0xfd   :  { %v914_v23 = vsub.f32 %v809_v3, %v276_v20  ;;  %v929_v29 = vsub.f32 %v804_v2, %v278_v24 }
  0xfe   :  { %v918_v25 = vsub.f32 %v788_v0, %v277_v22 }
  0xff   :  { %v284_v27 = vmul.f32 %v914_v23, %v914_v23  ;;  %v286_v36 = vmul.f32 %v929_v29, %v929_v29 }
 0x100   :  { %v285_v28 = vmul.f32 %v918_v25, %v918_v25 }
 0x101   :  { %291 = vrot.lane.b32.xlu1 %v283_v26, %s761_s17  ;;  %293 = vrot.lane.b32.xlu0 %v284_v27, %s761_s17 }
 0x102   :  { %v385_v30 = vpop.xlane.xlu1 %384  ;;  %v391_v31 = vpop.xlane.xlu0 %390  ;;  %295 = vrot.lane.b32.xlu2 %v285_v28, %s761_s17 }
 0x103   :  { %v395_v32 = vmul.f32 %v385_v30, %v849_v38  ;;  %v388_v33 = vpop.xlane.xlu2 %387  ;;  %v397_v37 = vmul.f32 %v391_v31, %v849_v38 }
 0x104   :  { %v396_v34 = vmul.f32 %v388_v33, %v849_v38 }
 0x105   :  { %v935_v35 = vsub.f32 %v793_v1, %v395_v32  ;;  %v950_v1 = vsub.f32 %v788_v0, %v397_v37 }
 0x106   :  { %v941_v39 = vsub.f32 %v809_v3, %v396_v34 }
 0x107   :  { %v403_v40 = vmul.f32 %v935_v35, %v935_v35  ;;  %v405_v45 = vmul.f32 %v950_v1, %v950_v1 }
 0x108   :  { %v404_v41 = vmul.f32 %v941_v39, %v941_v39 }
 0x109   :  { %297 = vrot.lane.b32.xlu1 %v286_v36, %s761_s17  ;;  %411 = vrot.lane.b32.xlu0 %v403_v40, %s762_s22 }
 0x10a   :  { %v394_v42 = vpop.xlane.xlu1 %393  ;;  %413 = vrot.lane.b32.xlu2 %v404_v41, %s762_s22 }
 0x10b   :  { %v398_v43 = vmul.f32 %v394_v42, %v849_v38 }
 0x10d   :  { %v955_v3 = vsub.f32 %v804_v2, %v398_v43 }
 0x10f   :  { %v406_v48 = vmul.f32 %v955_v3, %v955_v3 }
 0x111   :  { %415 = vrot.lane.b32.xlu1 %v405_v45, %s762_s22  ;;  %417 = vrot.lane.b32.xlu0 %v406_v48, %s762_s22 }
 0x131   :  { %v61_v0 = vpop.xlane.xlu2 %60 }
 0x132   :  { %v71_v49 = vmul.f32 %v61_v0, %v849_v38  ;;  %v67_v50 = vpop.xlane.xlu0 %66 }
 0x133   :  { %v64_v51 = vpop.xlane.xlu1 %63  ;;  %v73_v52 = vmul.f32 %v67_v50, %v849_v38 }
 0x134   :  { %v75_v53 = vadd.f32 1e-06, %v71_v49  ;;  %v72_v2 = vmul.f32 %v64_v51, %v849_v38 }
 0x135   :  { %v77_v54 = vadd.f32 1e-06, %v73_v52 }
 0x136   :  { %728 = vrsqrt.f32 %v75_v53  ;;  %v76_v55 = vadd.f32 1e-06, %v72_v2  ;;  %vm85_vm2 = vweird.f32 %v75_v53 }
 0x137   :  { %730 = vrsqrt.f32 %v77_v54  ;;  %vm105_vm4 = vweird.f32 %v77_v54 }
 0x138   :  { %732 = vrsqrt.f32 %v76_v55  ;;  %vm95_vm6 = vweird.f32 %v76_v55 }
 0x139   :  { %v70_v57 = vpop.xlane.xlu2 %69 }
 0x13a   :  { %v74_v58 = vmul.f32 %v70_v57, %v849_v38 }
 0x13c   :  { %v729_v59 = vpop.eup %728  ;;  %v78_v60 = vadd.f32 1e-06, %v74_v58 }
 0x13d   :  { %v731_v61 = vpop.eup %730  ;;  %v80_v62 = vmul.f32 %v729_v59, %v75_v53  ;;  %vm86_vm3 = vweird.f32 %v729_v59 }
 0x13e   :  { %v733_v5 = vpop.eup %732  ;;  %v100_v6 = vmul.f32 %v731_v61, %v77_v54  ;;  %734 = vrsqrt.f32 %v78_v60  ;;  %vm106_vm5 = vweird.f32 %v731_v61  ;;  %vm87_vm8 = vmor %vm85_vm2, %vm86_vm3  ;;  %vm115_vm11 = vweird.f32 %v78_v60 }
 0x13f   :  { %v81_v7 = vmul.f32 %v729_v59, %v80_v62  ;;  %v90_v8 = vmul.f32 %v733_v5, %v76_v55  ;;  %vm96_vm7 = vweird.f32 %v733_v5  ;;  %vm967_vm9 = vmor %vm105_vm4, %vm106_vm5 }
 0x140   :  { %v101_v9 = vmul.f32 %v731_v61, %v100_v6  ;;  %vm97_vm10 = vmor %vm95_vm6, %vm96_vm7 }
 0x141   :  { %v82_v10 = vmul.f32 0.5, %v81_v7  ;;  %v91_v11 = vmul.f32 %v733_v5, %v90_v8 }
 0x142   :  { %v102_v14 = vmul.f32 0.5, %v101_v9 }
 0x143   :  { %v83_v15 = vsub.f32 1.5, %v82_v10  ;;  %v92_v16 = vmul.f32 0.5, %v91_v11 }
 0x144   :  { %v735_v17 = vpop.eup %734  ;;  %v103_v18 = vsub.f32 1.5, %v102_v14 }
 0x145   :  { %v84_v20 = vmul.f32 %v729_v59, %v83_v15  ;;  %v93_v21 = vsub.f32 1.5, %v92_v16  ;;  %v110_v24 = vmul.f32 %v735_v17, %v78_v60  ;;  %vm116_vm12 = vweird.f32 %v735_v17 }
 0x146   :  { %v104_v26 = vmul.f32 %v731_v61, %v103_v18  ;;  %vm117_vm13 = vmor %vm115_vm11, %vm116_vm12 }
 0x147   :  { %v88_v27 = vsel %vm87_vm8, %v729_v59, %v84_v20  ;;  %v94_v28 = vmul.f32 %v733_v5, %v93_v21  ;;  %v111_v30 = vmul.f32 %v735_v17, %v110_v24 }
 0x148   :  { %v119_v31 = vmul.f32 %v88_v27, %v854_v44  ;;  %v108_v33 = vsel %vm967_vm9, %v731_v61, %v104_v26  ;;  %v711_v26 = vld [vmem:[%s1282_s1 + $0x38] sm:$0xff] }
 0x149   :  { %v98_v32 = vsel %vm97_vm10, %v733_v5, %v94_v28  ;;  %v112_v34 = vmul.f32 0.5, %v111_v30  ;;  %v121_v48 = vmul.f32 %v108_v33, %v858_v46  ;;  %617 = vmatpush.bf16.msra.mxu0 %v711_v26  ;;  %712 = vmatpush.bf16.msra.mxu1 %v711_v26  ;;  %v710_v30 = vld [vmem:[%s1282_s1 + $0x30] sm:$0xff] }
 0x14a   :  { %v123_v36 = vpack.c.bf16 %v119_v31, %v119_v31  ;;  %v120_v37 = vmul.f32 %v98_v32, %v861_v47  ;;  %v176_v40 = vpop.permute.xlu2 %175 }
 0x14b   :  { %v113_v41 = vsub.f32 1.5, %v112_v34  ;;  %v189_v42 = vsel %vm18_vm0, %v176_v40, 0.0  ;;  %v125_v50 = vpack.c.bf16 %v121_v48, %v121_v48  ;;  %v708_v48 = vld [vmem:[%s1282_s1 + $0x20] sm:$0xff] }
 0x14c   :  { %v976_v43 = vunpack.c.l.b16 %v123_v36  ;;  %v124_v45 = vpack.c.bf16 %v120_v37, %v120_v37  ;;  %190 = vadd.xlane.f32.xlu2 %v189_v42  ;;  %v709_v36 = vld [vmem:[%s1282_s1 + $0x28] sm:$0xff] }
 0x14d   :  { %v114_v44 = vmul.f32 %v735_v17, %v113_v41  ;;  %v984_v53 = vunpack.c.l.b16 %v125_v50  ;;  %618 = vmatpush.bf16.msra.mxu0 %v710_v30  ;;  %713 = vmatpush.bf16.msra.mxu1 %v710_v30  ;;  %v704_v30 = vld [vmem:[%s1282_s1] sm:$0xff] }
 0x14e   :  { %v979_v0 = vunpack.c.l.b16 %v124_v45 }
 0x14f   :  { %v118_v49 = vsel %vm117_vm13, %v735_v17, %v114_v44 }
 0x150   :  { %v122_v51 = vmul.f32 %v118_v49, %v874_v56  ;;  %v499_v47 = vpack.c.b16 %v979_v0, %v976_v43 }
 0x151   :  { %619 = vmatpush.bf16.msra.mxu0 %v709_v36  ;;  %714 = vmatpush.bf16.msra.mxu1 %v709_v36 }
 0x152   :  { %v126_v52 = vpack.c.bf16 %v122_v51, %v122_v51 }
 0x154   :  { %v986_v2 = vunpack.c.l.b16 %v126_v52  ;;  %v707_v52 = vld [vmem:[%s1282_s1 + $0x18] sm:$0xff] }
 0x155   :  { %620 = vmatpush.bf16.msra.mxu0 %v708_v48  ;;  %715 = vmatpush.bf16.msra.mxu1 %v708_v48 }
 0x156   :  { %v500_v46 = vpack.c.b16 %v986_v2, %v984_v53 }
 0x159   :  { %621 = vmatpush.bf16.msra.mxu0 %v707_v52  ;;  %716 = vmatpush.bf16.msra.mxu1 %v707_v52 }
 0x15c   :  { %v296_v60 = vpop.permute.xlu2 %295 }
 0x15d   :  { %v309_v5 = vsel %vm18_vm0, %v296_v60, 0.0 }
 0x163   :  { %v172_v54 = vpop.permute.xlu0 %171 }
 0x164   :  { %v183_v55 = vsel %vm18_vm0, %v172_v54, 0.0  ;;  %v414_v8 = vpop.permute.xlu2 %413 }
 0x165   :  { %184 = vadd.xlane.f32.xlu1 %v183_v55  ;;  %v426_v11 = vsel %vm18_vm0, %v414_v8, 0.0 }
 0x16b   :  { %v174_v57 = vpop.permute.xlu1 %173  ;;  %v178_v58 = vpop.permute.xlu0 %177 }
 0x16c   :  { %v186_v59 = vsel %vm18_vm0, %v174_v57, 0.0  ;;  %v192_v56 = vsel %vm18_vm0, %v178_v58, 0.0 }
 0x16d   :  { %187 = vadd.xlane.f32.xlu0 %v186_v59  ;;  %193 = vadd.xlane.f32.xlu1 %v192_v56 }
 0x173   :  { %v292_v61 = vpop.permute.xlu1 %291  ;;  %v294_v62 = vpop.permute.xlu0 %293 }
 0x174   :  { %v303_v6 = vsel %vm18_vm0, %v292_v61, 0.0  ;;  %v306_v7 = vsel %vm18_vm0, %v294_v62, 0.0  ;;  %v706_v61 = vld [vmem:[%s1282_s1 + $0x10] sm:$0xff] }
 0x175   :  { %304 = vadd.xlane.f32.xlu0 %v303_v6  ;;  %307 = vadd.xlane.f32.xlu2 %v306_v7 }
 0x176   :  { %310 = vadd.xlane.f32.xlu1 %v309_v5  ;;  %622 = vmatpush.bf16.msra.mxu0 %v706_v61 }
 0x177   :  { %717 = vmatpush.bf16.msra.mxu1 %v706_v61 }
 0x17b   :  { %v298_v9 = vpop.permute.xlu1 %297  ;;  %v412_v10 = vpop.permute.xlu0 %411 }
 0x17c   :  { %v312_v14 = vsel %vm18_vm0, %v298_v9, 0.0  ;;  %v423_v15 = vsel %vm18_vm0, %v412_v10, 0.0 }
 0x17d   :  { %313 = vadd.xlane.f32.xlu0 %v312_v14  ;;  %424 = vadd.xlane.f32.xlu2 %v423_v15  ;;  %v705_v15 = vld [vmem:[%s1282_s1 + $0x8] sm:$0xff] }
 0x17e   :  { %427 = vadd.xlane.f32.xlu1 %v426_v11  ;;  %623 = vmatpush.bf16.msra.mxu0 %v705_v15 }
 0x17f   :  { %718 = vmatpush.bf16.msra.mxu1 %v705_v15 }
 0x182   :  { %624 = vmatpush.bf16.msra.mxu0 %v704_v30 }
 0x183   :  { %v416_v16 = vpop.permute.xlu1 %415  ;;  %v418_v17 = vpop.permute.xlu0 %417  ;;  %719 = vmatpush.bf16.msra.mxu1 %v704_v30 }
 0x184   :  { %v429_v18 = vsel %vm18_vm0, %v416_v16, 0.0  ;;  %v432_v20 = vsel %vm18_vm0, %v418_v17, 0.0 }
 0x185   :  { %430 = vadd.xlane.f32.xlu0 %v429_v18  ;;  %433 = vadd.xlane.f32.xlu2 %v432_v20 }
 0x1bf   :  { %v191_v21 = vpop.xlane.xlu2 %190 }
 0x1c0   :  { %v197_v22 = vmul.f32 %v191_v21, %v849_v38 }
 0x1c2   :  { %v201_v24 = vadd.f32 1e-06, %v197_v22 }
 0x1c4   :  { %736 = vrsqrt.f32 %v201_v24  ;;  %vm229_vm15 = vweird.f32 %v201_v24 }
 0x1ca   :  { %v1005_v27 = vpop.eup %736 }
 0x1cb   :  { %v224_v31 = vmul.f32 %v1005_v27, %v201_v24  ;;  %vm230_vm14 = vweird.f32 %v1005_v27 }
 0x1cc   :  { %vm231_vm1 = vmor %vm229_vm15, %vm230_vm14 }
 0x1cd   :  { %v225_v34 = vmul.f32 %v1005_v27, %v224_v31 }
 0x1cf   :  { %v226_v41 = vmul.f32 0.5, %v225_v34 }
 0x1d1   :  { %v227_v51 = vsub.f32 1.5, %v226_v41 }
 0x1d3   :  { %v228_v58 = vmul.f32 %v1005_v27, %v227_v51 }
 0x1d5   :  { %v232_v11 = vsel %vm231_vm1, %v1005_v27, %v228_v58 }
 0x1d6   :  { %v1069_v20 = vmul.f32 %v232_v11, %v882_v63 }
 0x1d8   :  { %v185_v28 = vpop.xlane.xlu1 %184 }
 0x1d9   :  { %v195_v32 = vmul.f32 %v185_v28, %v849_v38 }
 0x1db   :  { %v1012_v33 = vadd.f32 1e-06, %v195_v32 }
 0x1dd   :  { %738 = vrsqrt.f32 %v1012_v33  ;;  %vm209_vm3 = vweird.f32 %v1012_v33 }
 0x1e0   :  { %v194_v37 = vpop.xlane.xlu1 %193  ;;  %v188_v40 = vpop.xlane.xlu0 %187 }
 0x1e1   :  { %v198_v42 = vmul.f32 %v194_v37, %v849_v38  ;;  %v196_v45 = vmul.f32 %v188_v40, %v849_v38  ;;  %v249_v40 = vpack.c.bf16 %v1069_v20, %v1069_v20 }
 0x1e3   :  { %v1024_v44 = vpop.eup %738  ;;  %v1026_v49 = vadd.f32 1e-06, %v198_v42  ;;  %v1028_v50 = vadd.f32 1e-06, %v196_v45 }
 0x1e4   :  { %v204_v54 = vmul.f32 %v1024_v44, %v1012_v33  ;;  %vm210_vm2 = vweird.f32 %v1024_v44 }
 0x1e5   :  { %740 = vrsqrt.f32 %v1026_v49  ;;  %vm219_vm5 = vweird.f32 %v1028_v50  ;;  %vm1108_vm7 = vmor %vm209_vm3, %vm210_vm2  ;;  %vm239_vm8 = vweird.f32 %v1026_v49 }
 0x1e6   :  { %742 = vrsqrt.f32 %v1028_v50  ;;  %v205_v62 = vmul.f32 %v1024_v44, %v204_v54 }
 0x1e8   :  { %v305_v55 = vpop.xlane.xlu0 %304  ;;  %v308_v57 = vpop.xlane.xlu2 %307  ;;  %v206_v16 = vmul.f32 0.5, %v205_v62 }
 0x1e9   :  { %v315_v59 = vmul.f32 %v305_v55, %v849_v38  ;;  %v311_v56 = vpop.xlane.xlu1 %310  ;;  %v316_v60 = vmul.f32 %v308_v57, %v849_v38 }
 0x1ea   :  { %v317_v5 = vmul.f32 %v311_v56, %v849_v38  ;;  %v207_v31 = vsub.f32 1.5, %v206_v16 }
 0x1eb   :  { %v1046_v6 = vpop.eup %740  ;;  %v1048_v7 = vadd.f32 1e-06, %v315_v59  ;;  %v1050_v8 = vadd.f32 1e-06, %v316_v60 }
 0x1ec   :  { %v1052_v9 = vpop.eup %742  ;;  %v1054_v10 = vadd.f32 1e-06, %v317_v5  ;;  %v234_v17 = vmul.f32 %v1046_v6, %v1026_v49  ;;  %v208_v54 = vmul.f32 %v1024_v44, %v207_v31  ;;  %vm240_vm4 = vweird.f32 %v1046_v6 }
 0x1ed   :  { %v214_v14 = vmul.f32 %v1052_v9, %v1028_v50  ;;  %744 = vrsqrt.f32 %v1048_v7  ;;  %vm220_vm6 = vweird.f32 %v1052_v9  ;;  %vm329_vm9 = vweird.f32 %v1048_v7  ;;  %vm1179_vm3 = vmor %vm239_vm8, %vm240_vm4 }
 0x1ee   :  { %746 = vrsqrt.f32 %v1054_v10  ;;  %v235_v63 = vmul.f32 %v1046_v6, %v234_v17  ;;  %v212_v11 = vsel %vm1108_vm7, %v1024_v44, %v208_v54  ;;  %vm349_vm11 = vweird.f32 %v1054_v10  ;;  %vm1130_vm12 = vmor %vm219_vm5, %vm220_vm6 }
 0x1ef   :  { %v215_v18 = vmul.f32 %v1052_v9, %v214_v14  ;;  %748 = vrsqrt.f32 %v1050_v8  ;;  %vm339_vm15 = vweird.f32 %v1050_v8 }
 0x1f0   :  { %v314_v21 = vpop.xlane.xlu0 %313  ;;  %v425_v22 = vpop.xlane.xlu2 %424  ;;  %v236_v58 = vmul.f32 0.5, %v235_v63 }
 0x1f1   :  { %v216_v24 = vmul.f32 0.5, %v215_v18  ;;  %v318_v26 = vmul.f32 %v314_v21, %v849_v38  ;;  %v428_v27 = vpop.xlane.xlu1 %427  ;;  %v435_v28 = vmul.f32 %v425_v22, %v849_v38  ;;  %v764_v22 = vmov 0.0  }
 0x1f2   :  { %v436_v32 = vmul.f32 %v428_v27, %v849_v38  ;;  %v237_v17 = vsub.f32 1.5, %v236_v58  ;;  %19 = vst.msk [vmem:[#allocation2] sm:$0xff] %vm18_vm0, %v764_v22 }
 0x1f3   :  { %v1077_v34 = vpop.eup %744  ;;  %v1080_v36 = vadd.f32 1e-06, %v318_v26  ;;  %v217_v48 = vsub.f32 1.5, %v216_v24  ;;  %v1095_v52 = vadd.f32 1e-06, %v435_v28  ;;  %20 = vst.msk [vmem:[#allocation2 + $0x8] sm:$0xff] %vm18_vm0, %v764_v22 }
 0x1f4   :  { %v1082_v37 = vpop.eup %746  ;;  %v324_v41 = vmul.f32 %v1077_v34, %v1048_v7  ;;  %v1088_v42 = vadd.f32 1e-06, %v436_v32  ;;  %vm330_vm10 = vweird.f32 %v1077_v34  ;;  %21 = vst.msk [vmem:[#allocation2 + $0x10] sm:$0xff] %vm18_vm0, %v764_v22 }
 0x1f5   :  { %v1090_v45 = vpop.eup %748  ;;  %v344_v51 = vmul.f32 %v1082_v37, %v1054_v10  ;;  %750 = vrsqrt.f32 %v1080_v36  ;;  %v218_v33 = vmul.f32 %v1052_v9, %v217_v48  ;;  %vm1143_vm14 = vmor %vm329_vm9, %vm330_vm10  ;;  %vm350_vm1 = vweird.f32 %v1082_v37  ;;  %22 = vst.msk [vmem:[#allocation2 + $0x18] sm:$0xff] %vm18_vm0, %v764_v22 }
 0x1f6   :  { %v325_v55 = vmul.f32 %v1077_v34, %v324_v41  ;;  %v334_v57 = vmul.f32 %v1090_v45, %v1050_v8  ;;  %752 = vrsqrt.f32 %v1088_v42  ;;  %vm340_vm13 = vweird.f32 %v1090_v45  ;;  %vm1199_vm8 = vmor %vm349_vm11, %vm350_vm1 }
 0x1f7   :  { %v345_v5 = vmul.f32 %v1082_v37, %v344_v51  ;;  %754 = vrsqrt.f32 %v1095_v52  ;;  %v243_v41 = vmul.f32 %v212_v11, %v885_v4  ;;  %v238_v8 = vmul.f32 %v1046_v6, %v237_v17  ;;  %vm341_vm2 = vmor %vm339_vm15, %vm340_vm13 }
 0x1f8   :  { %v326_v59 = vmul.f32 0.5, %v325_v55  ;;  %v335_v56 = vmul.f32 %v1090_v45, %v334_v57  ;;  %v431_v60 = vpop.xlane.xlu0 %430  ;;  %v434_v61 = vpop.xlane.xlu2 %433  ;;  %vm359_vm5 = vweird.f32 %v1080_v36  ;;  %vm459_vm6 = vweird.f32 %v1088_v42 }
 0x1f9   :  { %v437_v18 = vmul.f32 %v431_v60, %v849_v38  ;;  %v438_v21 = vmul.f32 %v434_v61, %v849_v38  ;;  %v222_v38 = vsel %vm1130_vm12, %v1052_v9, %v218_v33  ;;  %v346_v27 = vmul.f32 0.5, %v345_v5 }
 0x1fa   :  { %v327_v14 = vsub.f32 1.5, %v326_v59  ;;  %v336_v15 = vmul.f32 0.5, %v335_v56  ;;  %v244_v48 = vmul.f32 %v222_v38, %v899_v13  ;;  %v247_v17 = vpack.c.bf16 %v243_v41, %v243_v41 }
 0x1fb   :  { %v1121_v16 = vpop.eup %750  ;;  %v1148_v28 = vadd.f32 1e-06, %v437_v18  ;;  %v1157_v7 = vadd.f32 1e-06, %v438_v21  ;;  %v347_v57 = vsub.f32 1.5, %v346_v27  ;;  %vm449_vm11 = vweird.f32 %v1095_v52  ;;  %v550_v21 = vld [vmem:[#allocation2 + $0x8] sm:$0xff] }
 0x1fc   :  { %v328_v44 = vmul.f32 %v1077_v34, %v327_v14  ;;  %v337_v24 = vsub.f32 1.5, %v336_v15  ;;  %v354_v26 = vmul.f32 %v1121_v16, %v1080_v36  ;;  %v1150_v30 = vpop.eup %752  ;;  %v248_v49 = vpack.c.bf16 %v244_v48, %v244_v48  ;;  %v551_v22 = vld [vmem:[#allocation2 + $0x10] sm:$0xff] }
 0x1fd   :  { %v1159_v63 = vpop.eup %754  ;;  %756 = vrsqrt.f32 %v1148_v28  ;;  %vm360_vm4 = vweird.f32 %v1121_v16  ;;  %v348_v62 = vmul.f32 %v1082_v37, %v347_v57  ;;  %vm460_vm7 = vweird.f32 %v1150_v30 }
 0x1fe   :  { %v332_v31 = vsel %vm1143_vm14, %v1077_v34, %v328_v44  ;;  %v338_v32 = vmul.f32 %v1090_v45, %v337_v24  ;;  %v355_v9 = vmul.f32 %v1121_v16, %v354_v26  ;;  %v454_v34 = vmul.f32 %v1150_v30, %v1088_v42  ;;  %vm1207_vm10 = vmor %vm359_vm5, %vm360_vm4 }
 0x1ff   :  { %v444_v55 = vmul.f32 %v1159_v63, %v1095_v52  ;;  %v363_v4 = vmul.f32 %v332_v31, %v909_v19  ;;  %758 = vrsqrt.f32 %v1157_v7  ;;  %v242_v19 = vsel %vm1179_vm3, %v1046_v6, %v238_v8  ;;  %vm461_vm12 = vmor %vm459_vm6, %vm460_vm7 }
 0x200   :  { %v342_v51 = vsel %vm341_vm2, %v1090_v45, %v338_v32  ;;  %v356_v54 = vmul.f32 0.5, %v355_v9  ;;  %v455_v58 = vmul.f32 %v1150_v30, %v454_v34  ;;  %vm450_vm9 = vweird.f32 %v1159_v63 }
 0x201   :  { %v364_v13 = vmul.f32 %v342_v51, %v914_v23  ;;  %v445_v56 = vmul.f32 %v1159_v63, %v444_v55  ;;  %v367_v5 = vpack.c.bf16 %v363_v4, %v363_v4  ;;  %v246_v18 = vmul.f32 %v242_v19, %v896_v12  ;;  %vm451_vm13 = vmor %vm449_vm11, %vm450_vm9 }
 0x202   :  { %v357_v45 = vsub.f32 1.5, %v356_v54  ;;  %v456_v60 = vmul.f32 0.5, %v455_v58  ;;  %v506_v24 = vunpack.c.l.b16 %v248_v49  ;;  %v352_v52 = vsel %vm1199_vm8, %v1082_v37, %v348_v62 }
 0x203   :  { %v446_v23 = vmul.f32 0.5, %v445_v56  ;;  %v368_v14 = vpack.c.bf16 %v364_v13, %v364_v13  ;;  %v757_v15 = vpop.eup %756  ;;  %v515_v50 = vunpack.c.l.b16 %v367_v5  ;;  %v505_v9 = vunpack.c.l.b16 %v247_v17 }
 0x204   :  { %v358_v61 = vmul.f32 %v1121_v16, %v357_v45  ;;  %v457_v33 = vsub.f32 1.5, %v456_v60  ;;  %v464_v36 = vmul.f32 %v757_v15, %v1148_v28  ;;  %v250_v8 = vpack.c.bf16 %v246_v18, %v246_v18 }
 0x205   :  { %v447_v11 = vsub.f32 1.5, %v446_v23  ;;  %v759_v44 = vpop.eup %758  ;;  %v516_v32 = vunpack.c.l.b16 %v368_v14  ;;  %vm537_vm14 = vcmask 523264   ;;  %v365_v51 = vmul.f32 %v352_v52, %v918_v25 }
 0x206   :  { %v458_v10 = vmul.f32 %v1150_v30, %v457_v33  ;;  %v362_v26 = vsel %vm1207_vm10, %v1121_v16, %v358_v61  ;;  %v474_v16 = vmul.f32 %v759_v44, %v1157_v7  ;;  %v465_v27 = vmul.f32 %v757_v15, %v464_v36  ;;  %v552_v36 = vld [vmem:[#allocation2 + $0x18] sm:$0xff] }
 0x207   :  { %v448_v12 = vmul.f32 %v1159_v63, %v447_v11  ;;  %v366_v37 = vmul.f32 %v362_v26, %v929_v29  ;;  %v509_v55 = vpack.c.b16 %v506_v24, %v505_v9  ;;  %vm470_vm15 = vweird.f32 %v757_v15 }
 0x208   :  { %v462_v38 = vsel %vm461_vm12, %v1150_v30, %v458_v10  ;;  %v475_v30 = vmul.f32 %v759_v44, %v474_v16  ;;  %v466_v34 = vmul.f32 0.5, %v465_v27  ;;  %vm480_vm1 = vweird.f32 %v759_v44  ;;  %v725_v10 = vld [vmem:[%s1281_s2] ss:$0 sm:$0xff] }
 0x209   :  { %v452_v42 = vsel %vm451_vm13, %v1159_v63, %v448_v12  ;;  %v484_v31 = vmul.f32 %v462_v38, %v941_v39  ;;  %v519_v39 = vpack.c.b16 %v516_v32, %v515_v50  ;;  %v370_v29 = vpack.c.bf16 %v366_v37, %v366_v37 }
 0x20a   :  { %v483_v41 = vmul.f32 %v452_v42, %v935_v35  ;;  %v476_v54 = vmul.f32 0.5, %v475_v30  ;;  %v467_v4 = vsub.f32 1.5, %v466_v34  ;;  %vm469_vm2 = vweird.f32 %v1148_v28 }
 0x20b   :  { %v488_v48 = vpack.c.bf16 %v484_v31, %v484_v31  ;;  %vm479_vm3 = vweird.f32 %v1157_v7  ;;  %vm542_vm5 = vcmask 785408   ;;  %vm471_vm6 = vmor %vm469_vm2, %vm470_vm15  ;;  %v533_v45 = vsel %vm18_vm0, %v499_v47, %v509_v55 }
 0x20c   :  { %v487_v63 = vpack.c.bf16 %v483_v41, %v483_v41  ;;  %v477_v58 = vsub.f32 1.5, %v476_v54  ;;  %v468_v13 = vmul.f32 %v757_v15, %v467_v4  ;;  %v369_v56 = vpack.c.bf16 %v365_v51, %v365_v51  ;;  %vm481_vm4 = vmor %vm479_vm3, %vm480_vm1 }
 0x20d   :  { %v526_v57 = vunpack.c.l.b16 %v488_v48  ;;  %v508_v19 = vunpack.c.l.b16 %v250_v8  ;;  %v539_v49 = vsel %vm537_vm14, %v533_v45, %v519_v39  ;;  %v518_v23 = vunpack.c.l.b16 %v370_v29 }
 0x20e   :  { %v525_v59 = vunpack.c.l.b16 %v487_v63  ;;  %v478_v35 = vmul.f32 %v759_v44, %v477_v58  ;;  %v472_v60 = vsel %vm471_vm6, %v757_v15, %v468_v13  ;;  %v507_v62 = vunpack.c.l.b16 %v249_v40  ;;  %v549_v40 = vld [vmem:[#allocation2] sm:$0xff] }
 0x20f   :  { %v485_v7 = vmul.f32 %v472_v60, %v950_v1  ;;  %v517_v47 = vunpack.c.l.b16 %v369_v56  ;;  %vm663_vm7 = vcmask 257024  }
 0x210   :  { %v529_v25 = vpack.c.b16 %v526_v57, %v525_v59  ;;  %v482_v61 = vsel %vm481_vm4, %v759_v44, %v478_v35  ;;  %v510_v5 = vpack.c.b16 %v508_v19, %v507_v62 }
 0x211   :  { %v486_v43 = vmul.f32 %v482_v61, %v955_v3  ;;  %v489_v0 = vpack.c.bf16 %v485_v7, %v485_v7  ;;  %v520_v6 = vpack.c.b16 %v518_v23, %v517_v47 }
 0x212   :  { %v544_v28 = vsel %vm542_vm5, %v539_v49, %v529_v25  ;;  %v536_v1 = vsel %vm18_vm0, %v500_v46, %v510_v5 }
 0x213   :  { %625 = vmatmul.bf16.vlgmr.msra.gmra.mxu0 %v544_v28  ;;  %v490_v33 = vpack.c.bf16 %v486_v43, %v486_v43  ;;  %v527_v11 = vunpack.c.l.b16 %v489_v0  ;;  %v541_v17 = vsel %vm537_vm14, %v536_v1, %v520_v6 }
 0x215   :  { %v528_v14 = vunpack.c.l.b16 %v490_v33 }
 0x217   :  { %v530_v15 = vpack.c.b16 %v528_v14, %v527_v11 }
 0x219   :  { %v547_v20 = vsel %vm542_vm5, %v541_v17, %v530_v15 }
 0x21a   :  { %630 = vmatmul.bf16.vlgmr.msra.gmra.mxu1 %v547_v20 }
 0x290   :  { %v626_v3 = vpop.f32.mrf.mxu0 }
 0x291   :  { %v636_v18 = vadd.f32 %v626_v3, %v549_v40 }
 0x293   :  { %640 = vst.msk [vmem:[#allocation2] sm:$0xff] %vm18_vm0, %v636_v18 }
 0x297   :  { %v631_v2 = vpop.f32.mrf.mxu1 }
 0x298   :  { %v628_v44 = vpop.f32.mrf.mxu0  ;;  %v638_v24 = vadd.f32 %v631_v2, %v551_v22 }
 0x299   :  { %v637_v53 = vadd.f32 %v628_v44, %v550_v21 }
 0x29a   :  { %v647_v46 = vld [vmem:[#allocation2] sm:$0xff]  ;;  %642 = vst.msk [vmem:[#allocation2 + $0x10] sm:$0xff] %vm18_vm0, %v638_v24 }
 0x29b   :  { %v655_v26 = vadd.f32 %v725_v10, %v647_v46  ;;  %641 = vst.msk [vmem:[#allocation2 + $0x8] sm:$0xff] %vm18_vm0, %v637_v53 }
 0x29d   :  { %v659_v12 = vpack.c.bf16 %v655_v26, %v655_v26 }
 0x29f   :  { %664 = vst.msk [vmem:[%s1283_s3] sm:$0xf] %vm663_vm7, %v659_v12  ;;  %v633_v52 = vpop.f32.mrf.mxu1 }
 0x2a0   :  { %v639_v16 = vadd.f32 %v633_v52, %v552_v36 }
 0x2a1   :  { %v649_v42 = vld [vmem:[#allocation2 + $0x10] sm:$0xff] }
 0x2a2   :  { %v648_v38 = vld [vmem:[#allocation2 + $0x8] sm:$0xff]  ;;  %v657_v27 = vadd.f32 %v725_v10, %v649_v42  ;;  %643 = vst.msk [vmem:[#allocation2 + $0x18] sm:$0xff] %vm18_vm0, %v639_v16 }
 0x2a3   :  { %v656_v50 = vadd.f32 %v725_v10, %v648_v38 }
 0x2a4   :  { %v661_v32 = vpack.c.bf16 %v657_v27, %v657_v27 }
 0x2a5   :  { %v660_v31 = vpack.c.bf16 %v656_v50, %v656_v50 }
 0x2a6   :  { %666 = vst.msk [vmem:[%s1283_s3 + $0x8] sm:$0xf] %vm663_vm7, %v661_v32 }
 0x2a7   :  { %665 = vst.msk [vmem:[%s1283_s3 + $0x4] sm:$0xf] %vm663_vm7, %v660_v31 }
 0x2a9   :  { %v650_v9 = vld [vmem:[#allocation2 + $0x18] sm:$0xff] }
 0x2aa   :  { %v658_v37 = vadd.f32 %v725_v10, %v650_v9 }
 0x2ac   :  { %v662_v30 = vpack.c.bf16 %v658_v37, %v658_v37 }
 0x2ae   :  { %667 = vst.msk [vmem:[%s1283_s3 + $0xc] sm:$0xf] %vm663_vm7, %v662_v30 }

// kernel: transformer_block_forward.11
= control target key start
LH: loop header
LB: loop body
LE: loop exit
PB: predicated region body
PF: predicated region fallthrough
CT: control target
= control target key end

     0   :  { %s1112_s12 = smov 0   ;;  %s1114_s13 = smov 0   ;;  %s1383_s0 = inlined_call_operand.vmem [shape: bf16[2,64,32], index: 0, kind: input, shape index: {}]   ;;  %s1384_s1 = inlined_call_operand.vmem [shape: bf16[2,16,32], index: 1, kind: input, shape index: {}]   ;;  %s1385_s2 = inlined_call_operand.vmem [shape: bf16[2,16,32], index: 2, kind: input, shape index: {}]   ;;  %s1386_s3 = inlined_call_operand.vmem [shape: bf16[2,64,32], index: 3, kind: output, shape index: {}]  }
   0x1   :  { %s1116_s14 = smov 0  }
   0x2 LB: > { %s25_s15 = sadd.s32 1, %s1084_s13  ;;  %p885_p0 = scmp.ge.s32.totalorder %s1088_s14, 1  ;;  %s1088_s14 = sphi %s1116_s14, %s13_s14   ;;  %s1084_s13 = sphi %s1114_s13, %s1388_s13   ;;  %s1080_s12 = sphi %s1112_s12, %s1387_s12  }
   0x3   : > { %p27_p1 = scmp.ge.s32.totalorder %s25_s15, 2  ;;  %p178_p2 = scmp.lt.s32.totalorder %s1088_s14, 3 }
   0x5   : > { %s1390_s15 = smov (%p27_p1, %s25_s15), 0  ;;  %p179_p3 = pnand %p885_p0, %p178_p2 }
   0x6   : > { %p221_p4 = scmp.lt.s32.totalorder (!%p179_p3), %s1080_s12, 1  ;;  %s1090_s24 = smov (!%p179_p3), 112  }
   0x7   : > { %182 = sbr.rel (%p179_p3) target bundleno = 871 (0x367), region = 32  ;;  %s1091_s28 = smov (!%p179_p3), 16  }
   0xc   : > { %s1392_s12 = smov (!%p221_p4, %s1080_s12), 1  ;;  %vm286_vm0 = vcmask 130048   ;;  %vm480_vm1 = vcmask 125952   ;;  %vm761_vm2 = vcmask 257152  }
   0xd   : > { %s961_s16 = sshll.u32 %s1392_s12, 3  ;;  %s960_s17 = sshll.u32 %s1392_s12, 5 }
   0xe   : > { %s234_s20 = scalar_lea.vmem %s1384_s1, %s961_s16  ;;  %s1144_s23 = scalar_lea.vmem %s1383_s0, %s960_s17 }
   0xf   : > { %v974_v0 = vld [vmem:[%s234_s20] sm:$0xff]  ;;  %v971_v1 = vld [vmem:[%s1144_s23 + $0x8] sm:$0xff]  ;;  %v973_v2 = vld [vmem:[%s1144_s23 + $0x18] sm:$0xff]  ;;  %s1225_s27 = scalar_lea.vmem %s1385_s2, %s961_s16  ;;  %s1334_s4 = scalar_lea.vmem %s1386_s3, %s960_s17 }
  0x10   : > { %532 = vrot.lane.b32.xlu0 %v974_v0, %s1090_s24  ;;  %521 = vrot.lane.b32.xlu1 %v971_v1, %s1090_s24  ;;  %v970_v3 = vld [vmem:[%s1144_s23] sm:$0xff]  ;;  %v972_v4 = vld [vmem:[%s1144_s23 + $0x10] sm:$0xff] }
  0x11   : > { %525 = vrot.lane.b32.xlu2 %v973_v2, %s1090_s24  ;;  %v968_v5 = vld [vmem:[%s234_s20] sm:$0xff]  ;;  %v965_v12 = vld [vmem:[%s1144_s23 + $0x8] sm:$0xff]  ;;  %v966_v14 = vld [vmem:[%s1144_s23 + $0x10] sm:$0xff] }
  0x12   : > { %v300_v6 = vsel %vm286_vm0, %v968_v5, 0  ;;  %v964_v7 = vld [vmem:[%s1144_s23] sm:$0xff]  ;;  %v967_v18 = vld [vmem:[%s1144_s23 + $0x18] sm:$0xff] }
  0x13   : > { %309 = vmatpush.bf16.xpose.msra.mxu0 %v300_v6 }
  0x18   : > { %519 = vrot.lane.b32.xlu0 %v970_v3, %s1090_s24  ;;  %523 = vrot.lane.b32.xlu1 %v972_v4, %s1090_s24  ;;  %v975_v3 = vld [vmem:[%s1225_s27] sm:$0xff] }
  0x1a   : > { %914 = vmatmul.msk.bf16.vlgmr.msra.gmra.mxu0 %vm286_vm0, %v964_v7 }
  0x2a   : > { %915 = vmatmul.msk.bf16.gmra.mxu0 %vm286_vm0, %v965_v12 }
  0x3a   : > { %916 = vmatmul.msk.bf16.gmra.mxu0 %vm286_vm0, %v966_v14 }
  0x4a   : > { %917 = vmatmul.msk.bf16.gmra.mxu0 %vm286_vm0, %v967_v18 }
  0x6b   : > { %v526_v15 = vpop.permute.xlu2 %525 }
  0x82   : > { %v533_v8 = vpop.permute.xlu0 %532  ;;  %v522_v11 = vpop.permute.xlu1 %521 }
  0x83   : > { %v547_v9 = vsel %vm286_vm0, %v533_v8, 0 }
  0x84   : > { %556 = vmatpush.bf16.xpose.msra.mxu2 %v547_v9 }
  0x8a   : > { %v520_v10 = vpop.permute.xlu0 %519  ;;  %v524_v13 = vpop.permute.xlu1 %523 }
  0x8b   : > { %946 = vmatmul.msk.bf16.vlgmr.msra.gmra.mxu2 %vm286_vm0, %v520_v10 }
  0x97   : > { %v1172_v23 = vpop.f32.mrf.mxu0 }
  0x98   : > { %v331_v24 = vsel %vm286_vm0, %v1172_v23, -inf }
  0x9b   : > { %947 = vmatmul.msk.bf16.gmra.mxu2 %vm286_vm0, %v522_v11 }
  0x9f   : > { %v1178_v29 = vpop.f32.mrf.mxu0 }
  0xa0   : > { %v334_v30 = vsel %vm286_vm0, %v1178_v29, -inf }
  0xa7   : > { %v1188_v34 = vpop.f32.mrf.mxu0 }
  0xa8   : > { %v337_v39 = vsel %vm286_vm0, %v1188_v34, -inf }
  0xab   : > { %948 = vmatmul.msk.bf16.gmra.mxu2 %vm286_vm0, %v524_v13 }
  0xaf   : > { %v1196_v38 = vpop.f32.mrf.mxu0 }
  0xb0   : > { %v340_v52 = vsel %vm286_vm0, %v1196_v38, -inf }
  0xb7   : > { %v1200_v40 = vpop.f32.mrf.mxu0 }
  0xb8   : > { %v343_v41 = vsel %vm286_vm0, %v1200_v40, -inf }
  0xbb   : > { %949 = vmatmul.msk.bf16.gmra.mxu2 %vm286_vm0, %v526_v15 }
  0xbf   : > { %v1216_v60 = vpop.f32.mrf.mxu0 }
  0xc0   : > { %v346_v9 = vsel %vm286_vm0, %v1216_v60, -inf }
  0xc7   : > { %v1232_v4 = vpop.f32.mrf.mxu0 }
  0xcf   : > { %v1243_v15 = vpop.f32.mrf.mxu0 }
  0xd0   : > { %v352_v18 = vsel %vm286_vm0, %v1243_v15, -inf }
 0x10e   : > { %v558_v16 = vpop.f32.mrf.mxu2 }
 0x10f   : > { %v578_v17 = vsel %vm286_vm0, %v558_v16, -inf }
 0x110   : > { %579 = vmax.xlane.f32.xlu2 %v578_v17  ;;  %v349_v17 = vsel %vm286_vm0, %v1232_v4, -inf }
 0x116   : > { %v560_v19 = vpop.f32.mrf.mxu2 }
 0x117   : > { %v581_v20 = vsel %vm286_vm0, %v560_v19, -inf }
 0x118   : > { %582 = vmax.xlane.f32.xlu0 %v581_v20 }
 0x11e   : > { %v563_v21 = vpop.f32.mrf.mxu2 }
 0x11f   : > { %v584_v22 = vsel %vm286_vm0, %v563_v21, -inf }
 0x120   : > { %585 = vmax.xlane.f32.xlu1 %v584_v22 }
 0x126   : > { %v565_v25 = vpop.f32.mrf.mxu2 }
 0x127   : > { %v587_v26 = vsel %vm286_vm0, %v565_v25, -inf }
 0x128   : > { %588 = vmax.xlane.f32.xlu2 %v587_v26  ;;  %332 = vmax.xlane.f32.xlu1 %v331_v24 }
 0x12e   : > { %v568_v27 = vpop.f32.mrf.mxu2 }
 0x12f   : > { %v590_v28 = vsel %vm286_vm0, %v568_v27, -inf }
 0x130   : > { %591 = vmax.xlane.f32.xlu2 %v590_v28 }
 0x136   : > { %v1182_v31 = vpop.f32.mrf.mxu2 }
 0x137   : > { %v593_v32 = vsel %vm286_vm0, %v1182_v31, -inf }
 0x138   : > { %594 = vmax.xlane.f32.xlu0 %v593_v32  ;;  %335 = vmax.xlane.f32.xlu2 %v334_v30 }
 0x13e   : > { %v1186_v33 = vpop.f32.mrf.mxu2 }
 0x13f   : > { %v596_v35 = vsel %vm286_vm0, %v1186_v33, -inf }
 0x140   : > { %597 = vmax.xlane.f32.xlu0 %v596_v35 }
 0x146   : > { %v1192_v36 = vpop.f32.mrf.mxu2 }
 0x147   : > { %v599_v37 = vsel %vm286_vm0, %v1192_v36, -inf }
 0x148   : > { %600 = vmax.xlane.f32.xlu1 %v599_v37 }
 0x150   : > { %338 = vmax.xlane.f32.xlu1 %v337_v39 }
 0x158   : > { %344 = vmax.xlane.f32.xlu1 %v343_v41 }
 0x183   : > { %v580_v42 = vpop.xlane.xlu2 %579 }
 0x184   : > { %v602_v43 = vsub.f32 %v558_v16, %v580_v42 }
 0x186   : > { %v610_v44 = vmul.f32 1.442695, %v602_v43 }
 0x188   : > { %1002 = vpow2.f32 %v610_v44 }
 0x18b   : > { %v583_v45 = vpop.xlane.xlu0 %582 }
 0x18c   : > { %v603_v46 = vsub.f32 %v560_v19, %v583_v45 }
 0x18e   : > { %v1204_v47 = vpop.eup %1002  ;;  %v612_v48 = vmul.f32 1.442695, %v603_v46 }
 0x18f   : > { %v626_v49 = vsel %vm286_vm0, %v1204_v47, 0.0 }
 0x190   : > { %1004 = vpow2.f32 %v612_v48  ;;  %627 = vadd.xlane.f32.xlu2 %v626_v49 }
 0x193   : > { %v586_v50 = vpop.xlane.xlu1 %585 }
 0x194   : > { %v604_v51 = vsub.f32 %v563_v21, %v586_v50 }
 0x196   : > { %v1210_v53 = vpop.eup %1004  ;;  %v614_v54 = vmul.f32 1.442695, %v604_v51 }
 0x197   : > { %v629_v55 = vsel %vm286_vm0, %v1210_v53, 0.0 }
 0x198   : > { %1006 = vpow2.f32 %v614_v54  ;;  %630 = vadd.xlane.f32.xlu0 %v629_v55  ;;  %341 = vmax.xlane.f32.xlu2 %v340_v52 }
 0x19b   : > { %v589_v56 = vpop.xlane.xlu2 %588  ;;  %v333_v5 = vpop.xlane.xlu1 %332 }
 0x19c   : > { %v605_v57 = vsub.f32 %v565_v25, %v589_v56  ;;  %v355_v8 = vsub.f32 %v1172_v23, %v333_v5 }
 0x19e   : > { %v1214_v58 = vpop.eup %1006  ;;  %v616_v59 = vmul.f32 1.442695, %v605_v57  ;;  %v363_v13 = vmul.f32 1.442695, %v355_v8 }
 0x19f   : > { %v632_v61 = vsel %vm286_vm0, %v1214_v58, 0.0 }
 0x1a0   : > { %1008 = vpow2.f32 %v616_v59  ;;  %633 = vadd.xlane.f32.xlu1 %v632_v61 }
 0x1a3   : > { %v592_v62 = vpop.xlane.xlu2 %591 }
 0x1a4   : > { %v606_v63 = vsub.f32 %v568_v27, %v592_v62  ;;  %v969_v62 = vld [vmem:[%s1225_s27] sm:$0xff] }
 0x1a5   : > { %450 = vmatpush.bf16.msra.mxu1 %v969_v62 }
 0x1a6   : > { %v1227_v0 = vpop.eup %1008  ;;  %v618_v1 = vmul.f32 1.442695, %v606_v63 }
 0x1a7   : > { %v635_v2 = vsel %vm286_vm0, %v1227_v0, 0.0 }
 0x1a8   : > { %1010 = vpow2.f32 %v618_v1  ;;  %636 = vadd.xlane.f32.xlu2 %v635_v2 }
 0x1a9   : > { %1012 = vpow2.f32 %v363_v13 }
 0x1ab   : > { %v595_v6 = vpop.xlane.xlu0 %594  ;;  %v336_v7 = vpop.xlane.xlu2 %335 }
 0x1ac   : > { %677 = vrot.lane.b32.xlu0 %v975_v3, %s1090_s24  ;;  %v356_v11 = vsub.f32 %v1178_v29, %v336_v7  ;;  %v607_v30 = vsub.f32 %v1182_v31, %v595_v6 }
 0x1ae   : > { %v1238_v10 = vpop.eup %1010  ;;  %v365_v14 = vmul.f32 1.442695, %v356_v11  ;;  %v620_v39 = vmul.f32 1.442695, %v607_v30 }
 0x1af   : > { %v638_v12 = vsel %vm286_vm0, %v1238_v10, 0.0  ;;  %v1250_v21 = vpop.eup %1012 }
 0x1b0   : > { %639 = vadd.xlane.f32.xlu1 %v638_v12  ;;  %347 = vmax.xlane.f32.xlu2 %v346_v9  ;;  %1014 = vpow2.f32 %v365_v14  ;;  %v379_v26 = vsel %vm286_vm0, %v1250_v21, 0.0 }
 0x1b3   : > { %v598_v16 = vpop.xlane.xlu0 %597 }
 0x1b4   : > { %v608_v19 = vsub.f32 %v1186_v33, %v598_v16 }
 0x1b6   : > { %v622_v20 = vmul.f32 1.442695, %v608_v19  ;;  %v1252_v23 = vpop.eup %1014 }
 0x1b7   : > { %v382_v27 = vsel %vm286_vm0, %v1252_v23, 0.0 }
 0x1b8   : > { %350 = vmax.xlane.f32.xlu2 %v349_v17  ;;  %353 = vmax.xlane.f32.xlu1 %v352_v18  ;;  %1016 = vpow2.f32 %v622_v20 }
 0x1bb   : > { %v601_v22 = vpop.xlane.xlu1 %600 }
 0x1bc   : > { %v609_v24 = vsub.f32 %v1192_v36, %v601_v22 }
 0x1be   : > { %v624_v25 = vmul.f32 1.442695, %v609_v24  ;;  %v1259_v29 = vpop.eup %1016 }
 0x1bf   : > { %v644_v36 = vsel %vm286_vm0, %v1259_v29, 0.0 }
 0x1c0   : > { %1018 = vpow2.f32 %v624_v25  ;;  %380 = vadd.xlane.f32.xlu2 %v379_v26  ;;  %383 = vadd.xlane.f32.xlu1 %v382_v27 }
 0x1c3   : > { %v339_v28 = vpop.xlane.xlu1 %338 }
 0x1c4   : > { %v357_v32 = vsub.f32 %v1188_v34, %v339_v28 }
 0x1c6   : > { %v1263_v33 = vpop.eup %1018  ;;  %v367_v35 = vmul.f32 1.442695, %v357_v32 }
 0x1c7   : > { %v647_v37 = vsel %vm286_vm0, %v1263_v33, 0.0 }
 0x1c8   : > { %1020 = vpow2.f32 %v367_v35  ;;  %645 = vadd.xlane.f32.xlu2 %v644_v36  ;;  %648 = vadd.xlane.f32.xlu1 %v647_v37 }
 0x1c9   : > { %1022 = vpow2.f32 %v620_v39 }
 0x1cb   : > { %v345_v41 = vpop.xlane.xlu1 %344 }
 0x1cc   : > { %v359_v42 = vsub.f32 %v1200_v40, %v345_v41 }
 0x1ce   : > { %v1270_v31 = vpop.eup %1020  ;;  %v371_v34 = vmul.f32 1.442695, %v359_v42 }
 0x1cf   : > { %v385_v43 = vsel %vm286_vm0, %v1270_v31, 0.0  ;;  %v1274_v44 = vpop.eup %1022 }
 0x1d0   : > { %1024 = vpow2.f32 %v371_v34  ;;  %386 = vadd.xlane.f32.xlu2 %v385_v43  ;;  %v641_v45 = vsel %vm286_vm0, %v1274_v44, 0.0 }
 0x1d6   : > { %v1278_v46 = vpop.eup %1024  ;;  %642 = vadd.xlane.f32.xlu0 %v641_v45 }
 0x1d7   : > { %v391_v48 = vsel %vm286_vm0, %v1278_v46, 0.0 }
 0x1d8   : > { %392 = vadd.xlane.f32.xlu2 %v391_v48 }
 0x203   : > { %v628_v40 = vpop.xlane.xlu2 %627 }
 0x20b   : > { %v342_v49 = vpop.xlane.xlu2 %341  ;;  %v631_v52 = vpop.xlane.xlu0 %630 }
 0x20c   : > { %v358_v50 = vsub.f32 %v1196_v38, %v342_v49 }
 0x20e   : > { %v369_v51 = vmul.f32 1.442695, %v358_v50 }
 0x210   : > { %1026 = vpow2.f32 %v369_v51 }
 0x211   : > { %1028 = vrcp.f32 %v631_v52 }
 0x212   : > { %1030 = vrcp.f32 %v628_v40 }
 0x213   : > { %v634_v59 = vpop.xlane.xlu1 %633 }
 0x216   : > { %v1283_v54 = vpop.eup %1026 }
 0x217   : > { %v388_v55 = vsel %vm286_vm0, %v1283_v54, 0.0  ;;  %v1029_v56 = vpop.eup %1028 }
 0x218   : > { %389 = vadd.xlane.f32.xlu1 %v388_v55  ;;  %v1031_v57 = vpop.eup %1030  ;;  %v659_v63 = vmul.f32 %v1029_v56, %v1210_v53 }
 0x219   : > { %v658_v1 = vmul.f32 %v1031_v57, %v1204_v47 }
 0x21b   : > { %v637_v61 = vpop.xlane.xlu2 %636  ;;  %v666_v2 = vpack.c.bf16 %v659_v63, %v658_v1 }
 0x21c   : > { %1032 = vrcp.f32 %v637_v61 }
 0x21d   : > { %1034 = vrcp.f32 %v634_v59 }
 0x21e   : > { %v678_v38 = vpop.permute.xlu0 %677 }
 0x21f   : > { %699 = vmatpush.bf16.msra.mxu3 %v678_v38 }
 0x222   : > { %954 = vmatmul.msk.bf16.vlgmr.msra.gmra.mxu3 %vm286_vm0, %v666_v2  ;;  %v1033_v8 = vpop.eup %1032 }
 0x223   : > { %v640_v3 = vpop.xlane.xlu1 %639  ;;  %v348_v5 = vpop.xlane.xlu2 %347  ;;  %v661_v13 = vmul.f32 %v1033_v8, %v1227_v0 }
 0x224   : > { %v360_v6 = vsub.f32 %v1216_v60, %v348_v5  ;;  %v1035_v9 = vpop.eup %1034 }
 0x225   : > { %v660_v18 = vmul.f32 %v1035_v9, %v1214_v58 }
 0x226   : > { %v373_v7 = vmul.f32 1.442695, %v360_v6 }
 0x227   : > { %v667_v19 = vpack.c.bf16 %v661_v13, %v660_v18 }
 0x228   : > { %1036 = vpow2.f32 %v373_v7 }
 0x22b   : > { %v351_v11 = vpop.xlane.xlu2 %350  ;;  %v354_v53 = vpop.xlane.xlu1 %353 }
 0x22c   : > { %v361_v12 = vsub.f32 %v1232_v4, %v351_v11  ;;  %v362_v47 = vsub.f32 %v1243_v15, %v354_v53 }
 0x22e   : > { %v1295_v14 = vpop.eup %1036  ;;  %v375_v16 = vmul.f32 1.442695, %v361_v12  ;;  %v377_v17 = vmul.f32 1.442695, %v362_v47 }
 0x22f   : > { %v394_v60 = vsel %vm286_vm0, %v1295_v14, 0.0 }
 0x230   : > { %1038 = vpow2.f32 %v375_v16  ;;  %395 = vadd.xlane.f32.xlu1 %v394_v60 }
 0x231   : > { %1040 = vpow2.f32 %v377_v17 }
 0x232   : > { %955 = vmatmul.msk.bf16.gmra.mxu3 %vm286_vm0, %v667_v19 }
 0x233   : > { %v381_v4 = vpop.xlane.xlu2 %380  ;;  %v384_v20 = vpop.xlane.xlu1 %383 }
 0x234   : > { %1042 = vrcp.f32 %v381_v4 }
 0x235   : > { %1044 = vrcp.f32 %v384_v20 }
 0x236   : > { %v1301_v0 = vpop.eup %1038  ;;  %1046 = vrcp.f32 %v640_v3 }
 0x237   : > { %v1303_v15 = vpop.eup %1040  ;;  %v397_v58 = vsel %vm286_vm0, %v1301_v0, 0.0 }
 0x238   : > { %398 = vadd.xlane.f32.xlu0 %v397_v58  ;;  %v400_v22 = vsel %vm286_vm0, %v1303_v15, 0.0 }
 0x239   : > { %401 = vadd.xlane.f32.xlu2 %v400_v22 }
 0x23a   : > { %v1043_v24 = vpop.eup %1042 }
 0x23b   : > { %v1045_v25 = vpop.eup %1044  ;;  %v411_v26 = vmul.f32 %v1043_v24, %v1250_v21  ;;  %v646_v39 = vpop.xlane.xlu2 %645 }
 0x23c   : > { %v412_v27 = vmul.f32 %v1045_v25, %v1252_v23  ;;  %v1047_v32 = vpop.eup %1046  ;;  %v649_v41 = vpop.xlane.xlu1 %648 }
 0x23d   : > { %v662_v36 = vmul.f32 %v1047_v32, %v1238_v10 }
 0x23e   : > { %v419_v28 = vpack.c.bf16 %v412_v27, %v411_v26 }
 0x240   : > { %922 = vmatmul.msk.bf16.vlgmr.msra.gmra.mxu1 %vm286_vm0, %v419_v28 }
 0x243   : > { %v387_v48 = vpop.xlane.xlu2 %386 }
 0x249   : > { %v643_v30 = vpop.xlane.xlu0 %642 }
 0x24a   : > { %1048 = vrcp.f32 %v643_v30 }
 0x24b   : > { %1050 = vrcp.f32 %v646_v39  ;;  %v393_v52 = vpop.xlane.xlu2 %392 }
 0x24c   : > { %1052 = vrcp.f32 %v649_v41 }
 0x24d   : > { %1054 = vrcp.f32 %v387_v48 }
 0x250   : > { %v1049_v35 = vpop.eup %1048 }
 0x251   : > { %v663_v37 = vmul.f32 %v1049_v35, %v1274_v44  ;;  %v1051_v21 = vpop.eup %1050 }
 0x252   : > { %v1053_v23 = vpop.eup %1052  ;;  %v664_v34 = vmul.f32 %v1051_v21, %v1259_v29 }
 0x253   : > { %v668_v42 = vpack.c.bf16 %v663_v37, %v662_v36  ;;  %v665_v43 = vmul.f32 %v1053_v23, %v1263_v33  ;;  %v1055_v44 = vpop.eup %1054 }
 0x254   : > { %v413_v49 = vmul.f32 %v1055_v44, %v1270_v31 }
 0x255   : > { %956 = vmatmul.msk.bf16.gmra.mxu3 %vm286_vm0, %v668_v42  ;;  %v669_v45 = vpack.c.bf16 %v665_v43, %v664_v34 }
 0x265   : > { %957 = vmatmul.msk.bf16.gmra.mxu3 %vm286_vm0, %v669_v45 }
 0x28b   : > { %v390_v10 = vpop.xlane.xlu1 %389 }
 0x28c   : > { %1056 = vrcp.f32 %v390_v10 }
 0x28d   : > { %1058 = vrcp.f32 %v393_v52 }
 0x292   : > { %v1057_v40 = vpop.eup %1056 }
 0x293   : > { %v414_v50 = vmul.f32 %v1057_v40, %v1283_v54  ;;  %v1059_v56 = vpop.eup %1058 }
 0x294   : > { %v415_v59 = vmul.f32 %v1059_v56, %v1278_v46 }
 0x295   : > { %v420_v51 = vpack.c.bf16 %v414_v50, %v413_v49 }
 0x297   : > { %923 = vmatmul.msk.bf16.gmra.mxu1 %vm286_vm0, %v420_v51 }
 0x2a3   : > { %v396_v29 = vpop.xlane.xlu1 %395 }
 0x2a4   : > { %1060 = vrcp.f32 %v396_v29 }
 0x2a5   : > { %v701_v33 = vpop.f32.mrf.mxu3 }
 0x2a6   : > { %v721_v55 = vpack.c.bf16 %v701_v33, %v701_v33 }
 0x2a8   : > { %737 = vrot.lane.b32.xlu1 %v721_v55, %s1091_s28 }
 0x2aa   : > { %v1061_v57 = vpop.eup %1060 }
 0x2ab   : > { %v416_v31 = vmul.f32 %v1061_v57, %v1295_v14  ;;  %v399_v61 = vpop.xlane.xlu0 %398 }
 0x2ac   : > { %v402_v54 = vpop.xlane.xlu2 %401  ;;  %1062 = vrcp.f32 %v399_v61 }
 0x2ad   : > { %v703_v62 = vpop.f32.mrf.mxu3  ;;  %v421_v63 = vpack.c.bf16 %v416_v31, %v415_v59  ;;  %1064 = vrcp.f32 %v402_v54 }
 0x2ae   : > { %v722_v38 = vpack.c.bf16 %v703_v62, %v703_v62 }
 0x2af   : > { %924 = vmatmul.msk.bf16.gmra.mxu1 %vm286_vm0, %v421_v63 }
 0x2b0   : > { %739 = vrot.lane.b32.xlu0 %v722_v38, %s1091_s28 }
 0x2b2   : > { %v1063_v1 = vpop.eup %1062 }
 0x2b3   : > { %v1065_v3 = vpop.eup %1064  ;;  %v417_v46 = vmul.f32 %v1063_v1, %v1301_v0 }
 0x2b4   : > { %v418_v6 = vmul.f32 %v1065_v3, %v1303_v15 }
 0x2b5   : > { %v706_v2 = vpop.f32.mrf.mxu3 }
 0x2b6   : > { %v723_v5 = vpack.c.bf16 %v706_v2, %v706_v2  ;;  %v422_v9 = vpack.c.bf16 %v418_v6, %v417_v46 }
 0x2b8   : > { %741 = vrot.lane.b32.xlu2 %v723_v5, %s1091_s28 }
 0x2bd   : > { %v452_v7 = vpop.f32.mrf.mxu1  ;;  %v708_v8 = vpop.f32.mrf.mxu3 }
 0x2be   : > { %v472_v11 = vpack.c.bf16 %v452_v7, %v452_v7  ;;  %v724_v53 = vpack.c.bf16 %v708_v8, %v708_v8 }
 0x2bf   : > { %925 = vmatmul.msk.bf16.gmra.mxu1 %vm286_vm0, %v422_v9 }
 0x2c0   : > { %481 = vst.msk [vmem:[%s1334_s4] sm:$0xf] %vm480_vm1, %v472_v11  ;;  %743 = vrot.lane.b32.xlu1 %v724_v53, %s1091_s28 }
 0x2c5   : > { %v454_v12 = vpop.f32.mrf.mxu1 }
 0x2c6   : > { %v473_v47 = vpack.c.bf16 %v454_v12, %v454_v12 }
 0x2c8   : > { %482 = vst.msk [vmem:[%s1334_s4 + $0x4] sm:$0xf] %vm480_vm1, %v473_v47 }
 0x2d8   : > { %v711_v13 = vpop.f32.mrf.mxu3 }
 0x2d9   : > { %v725_v14 = vpack.c.bf16 %v711_v13, %v711_v13 }
 0x2db   : > { %745 = vrot.lane.b32.xlu0 %v725_v14, %s1091_s28 }
 0x2e0   : > { %v713_v16 = vpop.f32.mrf.mxu3 }
 0x2e1   : > { %v726_v17 = vpack.c.bf16 %v713_v16, %v713_v16 }
 0x2e3   : > { %747 = vrot.lane.b32.xlu2 %v726_v17, %s1091_s28 }
 0x2e8   : > { %v716_v18 = vpop.f32.mrf.mxu3 }
 0x2e9   : > { %v727_v60 = vpack.c.bf16 %v716_v18, %v716_v18 }
 0x2eb   : > { %749 = vrot.lane.b32.xlu1 %v727_v60, %s1091_s28 }
 0x2f0   : > { %v718_v19 = vpop.f32.mrf.mxu3 }
 0x2f1   : > { %v728_v4 = vpack.c.bf16 %v718_v19, %v718_v19 }
 0x2f3   : > { %751 = vrot.lane.b32.xlu0 %v728_v4, %s1091_s28 }
 0x312   : > { %v742_v15 = vpop.permute.xlu2 %741 }
 0x314   : > { %v457_v20 = vpop.f32.mrf.mxu1 }
 0x315   : > { %v474_v0 = vpack.c.bf16 %v457_v20, %v457_v20 }
 0x317   : > { %483 = vst.msk [vmem:[%s1334_s4 + $0x8] sm:$0xf] %vm480_vm1, %v474_v0 }
 0x318   : > { %764 = vst.msk [vmem:[%s1334_s4 + $0x8] sm:$0xf] %vm761_vm2, %v742_v15 }
 0x31a   : > { %v738_v58 = vpop.permute.xlu1 %737 }
 0x31b   : > { %762 = vst.msk [vmem:[%s1334_s4] sm:$0xf] %vm761_vm2, %v738_v58 }
 0x31c   : > { %v459_v22 = vpop.f32.mrf.mxu1 }
 0x31d   : > { %v475_v24 = vpack.c.bf16 %v459_v22, %v459_v22 }
 0x31f   : > { %484 = vst.msk [vmem:[%s1334_s4 + $0xc] sm:$0xf] %vm480_vm1, %v475_v24 }
 0x322   : > { %v740_v25 = vpop.permute.xlu0 %739 }
 0x323   : > { %763 = vst.msk [vmem:[%s1334_s4 + $0x4] sm:$0xf] %vm761_vm2, %v740_v25 }
 0x32c   : > { %v462_v26 = vpop.f32.mrf.mxu1 }
 0x32d   : > { %v476_v27 = vpack.c.bf16 %v462_v26, %v462_v26 }
 0x32f   : > { %485 = vst.msk [vmem:[%s1334_s4 + $0x10] sm:$0xf] %vm480_vm1, %v476_v27 }
 0x332   : > { %v744_v28 = vpop.permute.xlu1 %743 }
 0x333   : > { %765 = vst.msk [vmem:[%s1334_s4 + $0xc] sm:$0xf] %vm761_vm2, %v744_v28 }
 0x334   : > { %v464_v30 = vpop.f32.mrf.mxu1 }
 0x335   : > { %v477_v32 = vpack.c.bf16 %v464_v30, %v464_v30 }
 0x337   : > { %486 = vst.msk [vmem:[%s1334_s4 + $0x14] sm:$0xf] %vm480_vm1, %v477_v32 }
 0x33c   : > { %v467_v35 = vpop.f32.mrf.mxu1 }
 0x33d   : > { %v478_v36 = vpack.c.bf16 %v467_v35, %v467_v35  ;;  %v748_v37 = vpop.permute.xlu2 %747 }
 0x33e   : > { %767 = vst.msk [vmem:[%s1334_s4 + $0x14] sm:$0xf] %vm761_vm2, %v748_v37 }
 0x33f   : > { %487 = vst.msk [vmem:[%s1334_s4 + $0x18] sm:$0xf] %vm480_vm1, %v478_v36 }
 0x344   : > { %v469_v39 = vpop.f32.mrf.mxu1 }
 0x345   : > { %v479_v41 = vpack.c.bf16 %v469_v39, %v469_v39 }
 0x347   : > { %488 = vst.msk [vmem:[%s1334_s4 + $0x1c] sm:$0xf] %vm480_vm1, %v479_v41 }
 0x34d   : > { %v746_v42 = vpop.permute.xlu0 %745 }
 0x34e   : > { %766 = vst.msk [vmem:[%s1334_s4 + $0x10] sm:$0xf] %vm761_vm2, %v746_v42 }
 0x35d   : > { %v750_v21 = vpop.permute.xlu1 %749 }
 0x35e   : > { %768 = vst.msk [vmem:[%s1334_s4 + $0x18] sm:$0xf] %vm761_vm2, %v750_v21 }
 0x365   : > { %v752_v23 = vpop.permute.xlu0 %751 }
 0x366   : > { %769 = vst.msk [vmem:[%s1334_s4 + $0x1c] sm:$0xf] %vm761_vm2, %v752_v23 }
 0x367 PF: > { %s13_s14 = sadd.s32 1, %s1088_s14   ;;  %s1387_s12 = smov %s1084_s13 }
 0x368   : > { %p10_p5 = scmp.ge.s32.totalorder %s13_s14, 4   ;;  %s1388_s13 = smov %s1390_s15 }
 0x36a   :  { %12 = sbr.rel (!%p10_p5) target bundleno = 2 (0x2), region = 68 }

// kernel: transformer_block_forward.12
= control target key start
LH: loop header
LB: loop body
LE: loop exit
PB: predicated region body
PF: predicated region fallthrough
CT: control target
= control target key end

     0   :  { %vm22_vm0 = vcmask 261120   ;;  %v390_v1 = vmov 0.0   ;;  %s619_s1 = inlined_call_operand.vmem [shape: bf16[32,32], index: 1, kind: input, shape index: {}]   ;;  %s620_s0 = inlined_call_operand.vmem [shape: bf16[128,32], index: 0, kind: input, shape index: {}]   ;;  %s621_s2 = inlined_call_operand.vmem [shape: f32[1,32], index: 2, kind: input, shape index: {}]   ;;  %s622_s3 = inlined_call_operand.vmem [shape: f32[128,32], index: 3, kind: input, shape index: {}]   ;;  %s623_s4 = inlined_call_operand.vmem [shape: f32[128,32], index: 4, kind: output, shape index: {}]  }
   0x1   :  { %v381_v0 = vld [vmem:[%s619_s1 + $0x8] sm:$0xff]  ;;  %23 = vst.msk [vmem:[#allocation2] sm:$0xff] %vm22_vm0, %v390_v1  ;;  %v380_v2 = vld [vmem:[%s619_s1] sm:$0xff]  ;;  %v374_v4 = vld [vmem:[%s620_s0 + $0x10] sm:$0xff] }
   0x2   :  { %24 = vst.msk [vmem:[#allocation2 + $0x8] sm:$0xff] %vm22_vm0, %v390_v1  ;;  %158 = vmatpush.bf16.msra.mxu0 %v381_v0  ;;  %382 = vmatpush.bf16.msra.mxu1 %v381_v0  ;;  %v372_v3 = vld [vmem:[%s620_s0] sm:$0xff]  ;;  %v378_v6 = vld [vmem:[%s620_s0 + $0x30] sm:$0xff]  ;;  %v373_v7 = vld [vmem:[%s620_s0 + $0x8] sm:$0xff] }
   0x3   :  { %25 = vst.msk [vmem:[#allocation2 + $0x10] sm:$0xff] %vm22_vm0, %v390_v1  ;;  %383 = vmatpush.bf16.msra.mxu2 %v381_v0  ;;  %384 = vmatpush.bf16.msra.mxu3 %v381_v0  ;;  %v376_v5 = vld [vmem:[%s620_s0 + $0x20] sm:$0xff]  ;;  %v375_v8 = vld [vmem:[%s620_s0 + $0x18] sm:$0xff]  ;;  %v377_v9 = vld [vmem:[%s620_s0 + $0x28] sm:$0xff] }
   0x4   :  { %26 = vst.msk [vmem:[#allocation2 + $0x18] sm:$0xff] %vm22_vm0, %v390_v1  ;;  %v379_v10 = vld [vmem:[%s620_s0 + $0x38] sm:$0xff]  ;;  %v475_v21 = vld [vmem:[%s621_s2] ss:$0 sm:$0xff]  ;;  %v273_v57 = vld [vmem:[%s622_s3 + $0x8] sm:$0xff] }
   0x5   :  { %27 = vst.msk [vmem:[#allocation2 + $0x20] sm:$0xff] %vm22_vm0, %v390_v1  ;;  %v272_v31 = vld [vmem:[%s622_s3] sm:$0xff]  ;;  %v277_v61 = vld [vmem:[%s622_s3 + $0x28] sm:$0xff] }
   0x6   :  { %28 = vst.msk [vmem:[#allocation2 + $0x28] sm:$0xff] %vm22_vm0, %v390_v1  ;;  %159 = vmatpush.bf16.msra.mxu0 %v380_v2  ;;  %385 = vmatpush.bf16.msra.mxu1 %v380_v2  ;;  %v276_v34 = vld [vmem:[%s622_s3 + $0x20] sm:$0xff] }
   0x7   :  { %29 = vst.msk [vmem:[#allocation2 + $0x30] sm:$0xff] %vm22_vm0, %v390_v1  ;;  %386 = vmatpush.bf16.msra.mxu2 %v380_v2  ;;  %387 = vmatpush.bf16.msra.mxu3 %v380_v2  ;;  %v280_v49 = vld [vmem:[%s622_s3 + $0x40] sm:$0xff] }
   0x8   :  { %30 = vst.msk [vmem:[#allocation2 + $0x38] sm:$0xff] %vm22_vm0, %v390_v1  ;;  %v39_v11 = vld [vmem:[#allocation2] sm:$0xff] }
   0x9   :  { %31 = vst.msk [vmem:[#allocation2 + $0x40] sm:$0xff] %vm22_vm0, %v390_v1  ;;  %364 = vmatmul.msk.bf16.vlgmr.msra.gmra.mxu0 %vm22_vm0, %v372_v3  ;;  %366 = vmatmul.msk.bf16.vlgmr.msra.gmra.mxu1 %vm22_vm0, %v374_v4  ;;  %v40_v19 = vld [vmem:[#allocation2 + $0x8] sm:$0xff]  ;;  %v284_v54 = vld [vmem:[%s622_s3 + $0x60] sm:$0xff] }
   0xa   :  { %32 = vst.msk [vmem:[#allocation2 + $0x48] sm:$0xff] %vm22_vm0, %v390_v1  ;;  %368 = vmatmul.msk.bf16.vlgmr.msra.gmra.mxu2 %vm22_vm0, %v376_v5  ;;  %370 = vmatmul.msk.bf16.vlgmr.msra.gmra.mxu3 %vm22_vm0, %v378_v6  ;;  %v41_v40 = vld [vmem:[#allocation2 + $0x10] sm:$0xff] }
   0xb   :  { %33 = vst.msk [vmem:[#allocation2 + $0x50] sm:$0xff] %vm22_vm0, %v390_v1  ;;  %v42_v3 = vld [vmem:[#allocation2 + $0x18] sm:$0xff] }
   0xc   :  { %34 = vst.msk [vmem:[#allocation2 + $0x58] sm:$0xff] %vm22_vm0, %v390_v1  ;;  %v43_v12 = vld [vmem:[#allocation2 + $0x20] sm:$0xff] }
   0xd   :  { %35 = vst.msk [vmem:[#allocation2 + $0x60] sm:$0xff] %vm22_vm0, %v390_v1  ;;  %v44_v20 = vld [vmem:[#allocation2 + $0x28] sm:$0xff] }
   0xe   :  { %36 = vst.msk [vmem:[#allocation2 + $0x68] sm:$0xff] %vm22_vm0, %v390_v1  ;;  %v45_v41 = vld [vmem:[#allocation2 + $0x30] sm:$0xff] }
   0xf   :  { %37 = vst.msk [vmem:[#allocation2 + $0x70] sm:$0xff] %vm22_vm0, %v390_v1  ;;  %v46_v4 = vld [vmem:[#allocation2 + $0x38] sm:$0xff] }
  0x10   :  { %38 = vst.msk [vmem:[#allocation2 + $0x78] sm:$0xff] %vm22_vm0, %v390_v1  ;;  %v47_v17 = vld [vmem:[#allocation2 + $0x40] sm:$0xff] }
  0x11   :  { %v48_v37 = vld [vmem:[#allocation2 + $0x48] sm:$0xff] }
  0x12   :  { %v49_v0 = vld [vmem:[#allocation2 + $0x50] sm:$0xff] }
  0x14   :  { %v51_v18 = vld [vmem:[#allocation2 + $0x60] sm:$0xff] }
  0x15   :  { %v52_v38 = vld [vmem:[#allocation2 + $0x68] sm:$0xff] }
  0x16   :  { %v53_v1 = vld [vmem:[#allocation2 + $0x70] sm:$0xff] }
  0x19   :  { %365 = vmatmul.msk.bf16.gmra.mxu0 %vm22_vm0, %v373_v7  ;;  %367 = vmatmul.msk.bf16.gmra.mxu1 %vm22_vm0, %v375_v8 }
  0x1a   :  { %369 = vmatmul.msk.bf16.gmra.mxu2 %vm22_vm0, %v377_v9  ;;  %371 = vmatmul.msk.bf16.gmra.mxu3 %vm22_vm0, %v379_v10 }
  0x86   :  { %v161_v13 = vpop.f32.mrf.mxu0  ;;  %v171_v14 = vpop.f32.mrf.mxu1 }
  0x87   :  { %v201_v15 = vadd.f32 %v161_v13, %v39_v11  ;;  %v205_v16 = vadd.f32 %v171_v14, %v43_v12  ;;  %v281_v13 = vld [vmem:[%s622_s3 + $0x48] sm:$0xff] }
  0x89   :  { %217 = vst.msk [vmem:[#allocation2] sm:$0xff] %vm22_vm0, %v201_v15 }
  0x8a   :  { %221 = vst.msk [vmem:[#allocation2 + $0x20] sm:$0xff] %vm22_vm0, %v205_v16 }
  0x8d   :  { %v181_v22 = vpop.f32.mrf.mxu2  ;;  %v191_v23 = vpop.f32.mrf.mxu3 }
  0x8e   :  { %v209_v24 = vadd.f32 %v181_v22, %v47_v17  ;;  %v213_v25 = vadd.f32 %v191_v23, %v51_v18  ;;  %v163_v26 = vpop.f32.mrf.mxu0  ;;  %v173_v27 = vpop.f32.mrf.mxu1  ;;  %v285_v18 = vld [vmem:[%s622_s3 + $0x68] sm:$0xff]  ;;  %v274_v22 = vld [vmem:[%s622_s3 + $0x10] sm:$0xff] }
  0x8f   :  { %v202_v28 = vadd.f32 %v163_v26, %v40_v19  ;;  %v206_v29 = vadd.f32 %v173_v27, %v44_v20  ;;  %v278_v26 = vld [vmem:[%s622_s3 + $0x30] sm:$0xff] }
  0x90   :  { %v236_v30 = vld [vmem:[#allocation2] sm:$0xff]  ;;  %225 = vst.msk [vmem:[#allocation2 + $0x40] sm:$0xff] %vm22_vm0, %v209_v24 }
  0x91   :  { %v256_v32 = vadd.f32 %v475_v21, %v236_v30  ;;  %v240_v33 = vld [vmem:[#allocation2 + $0x20] sm:$0xff]  ;;  %229 = vst.msk [vmem:[#allocation2 + $0x60] sm:$0xff] %vm22_vm0, %v213_v25  ;;  %v54_v30 = vld [vmem:[#allocation2 + $0x78] sm:$0xff] }
  0x92   :  { %v260_v35 = vadd.f32 %v475_v21, %v240_v33  ;;  %218 = vst.msk [vmem:[#allocation2 + $0x8] sm:$0xff] %vm22_vm0, %v202_v28 }
  0x93   :  { %v288_v36 = vadd.f32 %v272_v31, %v256_v32  ;;  %222 = vst.msk [vmem:[#allocation2 + $0x28] sm:$0xff] %vm22_vm0, %v206_v29  ;;  %v50_v29 = vld [vmem:[#allocation2 + $0x58] sm:$0xff] }
  0x94   :  { %v292_v39 = vadd.f32 %v276_v34, %v260_v35 }
  0x95   :  { %304 = vst.msk [vmem:[%s623_s4] sm:$0xff] %vm22_vm0, %v288_v36  ;;  %v183_v42 = vpop.f32.mrf.mxu2  ;;  %v193_v43 = vpop.f32.mrf.mxu3 }
  0x96   :  { %308 = vst.msk [vmem:[%s623_s4 + $0x20] sm:$0xff] %vm22_vm0, %v292_v39  ;;  %v210_v44 = vadd.f32 %v183_v42, %v48_v37  ;;  %v214_v45 = vadd.f32 %v193_v43, %v52_v38  ;;  %v166_v46 = vpop.f32.mrf.mxu0  ;;  %v176_v47 = vpop.f32.mrf.mxu1  ;;  %v282_v38 = vld [vmem:[%s622_s3 + $0x50] sm:$0xff] }
  0x97   :  { %v244_v48 = vld [vmem:[#allocation2 + $0x40] sm:$0xff]  ;;  %v203_v50 = vadd.f32 %v166_v46, %v41_v40  ;;  %v207_v51 = vadd.f32 %v176_v47, %v45_v41  ;;  %v286_v41 = vld [vmem:[%s622_s3 + $0x70] sm:$0xff] }
  0x98   :  { %v264_v52 = vadd.f32 %v475_v21, %v244_v48  ;;  %v248_v53 = vld [vmem:[#allocation2 + $0x60] sm:$0xff]  ;;  %226 = vst.msk [vmem:[#allocation2 + $0x48] sm:$0xff] %vm22_vm0, %v210_v44  ;;  %v275_v44 = vld [vmem:[%s622_s3 + $0x18] sm:$0xff] }
  0x99   :  { %v268_v55 = vadd.f32 %v475_v21, %v248_v53  ;;  %v237_v56 = vld [vmem:[#allocation2 + $0x8] sm:$0xff]  ;;  %230 = vst.msk [vmem:[#allocation2 + $0x68] sm:$0xff] %vm22_vm0, %v214_v45  ;;  %v279_v48 = vld [vmem:[%s622_s3 + $0x38] sm:$0xff] }
  0x9a   :  { %v296_v58 = vadd.f32 %v280_v49, %v264_v52  ;;  %v257_v59 = vadd.f32 %v475_v21, %v237_v56  ;;  %v241_v60 = vld [vmem:[#allocation2 + $0x28] sm:$0xff]  ;;  %219 = vst.msk [vmem:[#allocation2 + $0x10] sm:$0xff] %vm22_vm0, %v203_v50 }
  0x9b   :  { %v300_v62 = vadd.f32 %v284_v54, %v268_v55  ;;  %v261_v63 = vadd.f32 %v475_v21, %v241_v60  ;;  %223 = vst.msk [vmem:[#allocation2 + $0x30] sm:$0xff] %vm22_vm0, %v207_v51  ;;  %v283_v54 = vld [vmem:[%s622_s3 + $0x58] sm:$0xff] }
  0x9c   :  { %312 = vst.msk [vmem:[%s623_s4 + $0x40] sm:$0xff] %vm22_vm0, %v296_v58  ;;  %v289_v2 = vadd.f32 %v273_v57, %v257_v59  ;;  %v287_v57 = vld [vmem:[%s622_s3 + $0x78] sm:$0xff] }
  0x9d   :  { %316 = vst.msk [vmem:[%s623_s4 + $0x60] sm:$0xff] %vm22_vm0, %v300_v62  ;;  %v293_v5 = vadd.f32 %v277_v61, %v261_v63  ;;  %v186_v6 = vpop.f32.mrf.mxu2  ;;  %v196_v7 = vpop.f32.mrf.mxu3 }
  0x9e   :  { %305 = vst.msk [vmem:[%s623_s4 + $0x8] sm:$0xff] %vm22_vm0, %v289_v2  ;;  %v211_v8 = vadd.f32 %v186_v6, %v49_v0  ;;  %v215_v9 = vadd.f32 %v196_v7, %v53_v1  ;;  %v168_v10 = vpop.f32.mrf.mxu0  ;;  %v178_v11 = vpop.f32.mrf.mxu1 }
  0x9f   :  { %309 = vst.msk [vmem:[%s623_s4 + $0x28] sm:$0xff] %vm22_vm0, %v293_v5  ;;  %v245_v12 = vld [vmem:[#allocation2 + $0x48] sm:$0xff]  ;;  %v204_v14 = vadd.f32 %v168_v10, %v42_v3  ;;  %v208_v15 = vadd.f32 %v178_v11, %v46_v4 }
  0xa0   :  { %v265_v16 = vadd.f32 %v475_v21, %v245_v12  ;;  %v249_v17 = vld [vmem:[#allocation2 + $0x68] sm:$0xff]  ;;  %227 = vst.msk [vmem:[#allocation2 + $0x50] sm:$0xff] %vm22_vm0, %v211_v8 }
  0xa1   :  { %v269_v19 = vadd.f32 %v475_v21, %v249_v17  ;;  %v238_v20 = vld [vmem:[#allocation2 + $0x10] sm:$0xff]  ;;  %231 = vst.msk [vmem:[#allocation2 + $0x70] sm:$0xff] %vm22_vm0, %v215_v9 }
  0xa2   :  { %v297_v23 = vadd.f32 %v281_v13, %v265_v16  ;;  %v258_v24 = vadd.f32 %v475_v21, %v238_v20  ;;  %v242_v25 = vld [vmem:[#allocation2 + $0x30] sm:$0xff]  ;;  %220 = vst.msk [vmem:[#allocation2 + $0x18] sm:$0xff] %vm22_vm0, %v204_v14 }
  0xa3   :  { %v301_v27 = vadd.f32 %v285_v18, %v269_v19  ;;  %v262_v28 = vadd.f32 %v475_v21, %v242_v25  ;;  %224 = vst.msk [vmem:[#allocation2 + $0x38] sm:$0xff] %vm22_vm0, %v208_v15 }
  0xa4   :  { %313 = vst.msk [vmem:[%s623_s4 + $0x48] sm:$0xff] %vm22_vm0, %v297_v23  ;;  %v290_v31 = vadd.f32 %v274_v22, %v258_v24 }
  0xa5   :  { %317 = vst.msk [vmem:[%s623_s4 + $0x68] sm:$0xff] %vm22_vm0, %v301_v27  ;;  %v294_v32 = vadd.f32 %v278_v26, %v262_v28  ;;  %v188_v33 = vpop.f32.mrf.mxu2  ;;  %v198_v34 = vpop.f32.mrf.mxu3 }
  0xa6   :  { %306 = vst.msk [vmem:[%s623_s4 + $0x10] sm:$0xff] %vm22_vm0, %v290_v31  ;;  %v212_v35 = vadd.f32 %v188_v33, %v50_v29  ;;  %v216_v36 = vadd.f32 %v198_v34, %v54_v30 }
  0xa7   :  { %310 = vst.msk [vmem:[%s623_s4 + $0x30] sm:$0xff] %vm22_vm0, %v294_v32  ;;  %v246_v37 = vld [vmem:[#allocation2 + $0x50] sm:$0xff] }
  0xa8   :  { %v266_v39 = vadd.f32 %v475_v21, %v246_v37  ;;  %v250_v40 = vld [vmem:[#allocation2 + $0x70] sm:$0xff]  ;;  %228 = vst.msk [vmem:[#allocation2 + $0x58] sm:$0xff] %vm22_vm0, %v212_v35 }
  0xa9   :  { %v270_v42 = vadd.f32 %v475_v21, %v250_v40  ;;  %v239_v43 = vld [vmem:[#allocation2 + $0x18] sm:$0xff]  ;;  %232 = vst.msk [vmem:[#allocation2 + $0x78] sm:$0xff] %vm22_vm0, %v216_v36 }
  0xaa   :  { %v298_v45 = vadd.f32 %v282_v38, %v266_v39  ;;  %v259_v46 = vadd.f32 %v475_v21, %v239_v43  ;;  %v243_v47 = vld [vmem:[#allocation2 + $0x38] sm:$0xff] }
  0xab   :  { %v302_v49 = vadd.f32 %v286_v41, %v270_v42  ;;  %v263_v50 = vadd.f32 %v475_v21, %v243_v47 }
  0xac   :  { %314 = vst.msk [vmem:[%s623_s4 + $0x50] sm:$0xff] %vm22_vm0, %v298_v45  ;;  %v291_v51 = vadd.f32 %v275_v44, %v259_v46 }
  0xad   :  { %318 = vst.msk [vmem:[%s623_s4 + $0x70] sm:$0xff] %vm22_vm0, %v302_v49  ;;  %v295_v52 = vadd.f32 %v279_v48, %v263_v50 }
  0xae   :  { %307 = vst.msk [vmem:[%s623_s4 + $0x18] sm:$0xff] %vm22_vm0, %v291_v51 }
  0xaf   :  { %311 = vst.msk [vmem:[%s623_s4 + $0x38] sm:$0xff] %vm22_vm0, %v295_v52  ;;  %v247_v53 = vld [vmem:[#allocation2 + $0x58] sm:$0xff] }
  0xb0   :  { %v267_v55 = vadd.f32 %v475_v21, %v247_v53  ;;  %v251_v56 = vld [vmem:[#allocation2 + $0x78] sm:$0xff] }
  0xb1   :  { %v271_v58 = vadd.f32 %v475_v21, %v251_v56 }
  0xb2   :  { %v299_v59 = vadd.f32 %v283_v54, %v267_v55 }
  0xb3   :  { %v303_v60 = vadd.f32 %v287_v57, %v271_v58 }
  0xb4   :  { %315 = vst.msk [vmem:[%s623_s4 + $0x58] sm:$0xff] %vm22_vm0, %v299_v59 }
  0xb5   :  { %319 = vst.msk [vmem:[%s623_s4 + $0x78] sm:$0xff] %vm22_vm0, %v303_v60 }

// kernel: transformer_block_forward.13
= control target key start
LH: loop header
LB: loop body
LE: loop exit
PB: predicated region body
PF: predicated region fallthrough
CT: control target
= control target key end

     0   :  { %vm35_vm0 = vcmask 261120   ;;  %v761_v32 = vmov 32.0   ;;  %vm411_vm2 = vcmask 257024   ;;  %s1202_s0 = inlined_call_operand.vmem [shape: f32[128,32], index: 0, kind: input, shape index: {}]   ;;  %s1203_s2 = inlined_call_operand.vmem [shape: f32[1,128], index: 2, kind: input, shape index: {}]   ;;  %s1204_s1 = inlined_call_operand.vmem [shape: bf16[32,128], index: 1, kind: input, shape index: {}]   ;;  %s1205_s3 = inlined_call_operand.vmem [shape: bf16[128,128], index: 3, kind: output, shape index: {}]  }
   0x1   :  { %v31_v0 = vld [vmem:[%s1202_s0 + $0x60] sm:$0xff]  ;;  %v800_v6 = vld [vmem:[%s1202_s0 + $0x68] sm:$0xff]  ;;  %v831_v14 = vld [vmem:[%s1202_s0 + $0x50] sm:$0xff]  ;;  %727 = vrcp.f32 %v761_v32 }
   0x2   :  { %v27_v1 = vld [vmem:[%s1202_s0 + $0x40] sm:$0xff]  ;;  %v72_v3 = vsel %vm35_vm0, %v31_v0, 0.0  ;;  %v805_v7 = vld [vmem:[%s1202_s0 + $0x48] sm:$0xff]  ;;  %v75_v9 = vsel %vm35_vm0, %v800_v6, 0.0  ;;  %v66_v17 = vsel %vm35_vm0, %v831_v14, 0.0  ;;  %v842_v18 = vld [vmem:[%s1202_s0 + $0x58] sm:$0xff] }
   0x3   :  { %v791_v2 = vld [vmem:[%s1202_s0] sm:$0xff]  ;;  %v60_v4 = vsel %vm35_vm0, %v27_v1, 0.0  ;;  %73 = vadd.xlane.f32.xlu1 %v72_v3  ;;  %v810_v8 = vld [vmem:[%s1202_s0 + $0x8] sm:$0xff]  ;;  %v63_v10 = vsel %vm35_vm0, %v805_v7, 0.0  ;;  %v847_v19 = vld [vmem:[%s1202_s0 + $0x70] sm:$0xff]  ;;  %v69_v21 = vsel %vm35_vm0, %v842_v18, 0.0 }
   0x4   :  { %v36_v5 = vsel %vm35_vm0, %v791_v2, 0.0  ;;  %61 = vadd.xlane.f32.xlu0 %v60_v4  ;;  %v39_v11 = vsel %vm35_vm0, %v810_v8, 0.0  ;;  %v821_v12 = vld [vmem:[%s1202_s0 + $0x20] sm:$0xff]  ;;  %v826_v13 = vld [vmem:[%s1202_s0 + $0x28] sm:$0xff]  ;;  %v852_v20 = vld [vmem:[%s1202_s0 + $0x78] sm:$0xff]  ;;  %v78_v22 = vsel %vm35_vm0, %v847_v19, 0.0 }
   0x5   :  { %37 = vadd.xlane.f32.xlu2 %v36_v5  ;;  %v48_v15 = vsel %vm35_vm0, %v821_v12, 0.0  ;;  %v51_v16 = vsel %vm35_vm0, %v826_v13, 0.0  ;;  %v81_v23 = vsel %vm35_vm0, %v852_v20, 0.0  ;;  %v863_v24 = vld [vmem:[%s1202_s0 + $0x10] sm:$0xff]  ;;  %v868_v25 = vld [vmem:[%s1202_s0 + $0x18] sm:$0xff] }
   0x6   :  { %v873_v26 = vld [vmem:[%s1202_s0 + $0x30] sm:$0xff]  ;;  %v42_v27 = vsel %vm35_vm0, %v863_v24, 0.0  ;;  %v45_v28 = vsel %vm35_vm0, %v868_v25, 0.0  ;;  %v884_v30 = vld [vmem:[%s1202_s0 + $0x38] sm:$0xff] }
   0x7   :  { %v54_v29 = vsel %vm35_vm0, %v873_v26, 0.0  ;;  %v57_v31 = vsel %vm35_vm0, %v884_v30, 0.0  ;;  %v728_v33 = vpop.eup %727 }
   0x8   :  { %v85_v34 = vmul.f32 32.0, %v728_v33  ;;  %vm89_vm1 = vweird.f32 %v728_v33 }
   0xa   :  { %v86_v35 = vsub.f32 1.0, %v85_v34 }
   0xb   :  { %76 = vadd.xlane.f32.xlu1 %v75_v9 }
   0xc   :  { %64 = vadd.xlane.f32.xlu0 %v63_v10  ;;  %v87_v36 = vmul.f32 %v728_v33, %v86_v35 }
   0xd   :  { %40 = vadd.xlane.f32.xlu2 %v39_v11 }
   0xe   :  { %v88_v37 = vadd.f32 %v728_v33, %v87_v36 }
  0x10   :  { %v888_v38 = vsel %vm89_vm1, %v728_v33, %v88_v37 }
  0x13   :  { %52 = vadd.xlane.f32.xlu1 %v51_v16 }
  0x14   :  { %49 = vadd.xlane.f32.xlu0 %v48_v15 }
  0x15   :  { %67 = vadd.xlane.f32.xlu2 %v66_v17 }
  0x1b   :  { %79 = vadd.xlane.f32.xlu1 %v78_v22 }
  0x1c   :  { %70 = vadd.xlane.f32.xlu0 %v69_v21 }
  0x1d   :  { %82 = vadd.xlane.f32.xlu2 %v81_v23 }
  0x23   :  { %46 = vadd.xlane.f32.xlu1 %v45_v28 }
  0x24   :  { %43 = vadd.xlane.f32.xlu0 %v42_v27 }
  0x25   :  { %55 = vadd.xlane.f32.xlu2 %v54_v29 }
  0x2c   :  { %58 = vadd.xlane.f32.xlu0 %v57_v31 }
  0x76   :  { %v74_v39 = vpop.xlane.xlu1 %73 }
  0x77   :  { %v62_v40 = vpop.xlane.xlu0 %61  ;;  %v103_v41 = vmul.f32 %v888_v38, %v74_v39 }
  0x78   :  { %v99_v42 = vmul.f32 %v888_v38, %v62_v40  ;;  %v38_v43 = vpop.xlane.xlu2 %37 }
  0x79   :  { %v892_v44 = vsub.f32 %v31_v0, %v103_v41  ;;  %v91_v56 = vmul.f32 %v888_v38, %v38_v43 }
  0x7a   :  { %v894_v45 = vsub.f32 %v27_v1, %v99_v42 }
  0x7b   :  { %v135_v47 = vmul.f32 %v892_v44, %v892_v44  ;;  %v922_v63 = vsub.f32 %v791_v2, %v91_v56 }
  0x7c   :  { %v131_v46 = vmul.f32 %v894_v45, %v894_v45 }
  0x7d   :  { %v175_v49 = vsel %vm35_vm0, %v135_v47, 0.0  ;;  %v123_v10 = vmul.f32 %v922_v63, %v922_v63 }
  0x7e   :  { %v163_v48 = vsel %vm35_vm0, %v131_v46, 0.0  ;;  %v77_v50 = vpop.xlane.xlu1 %76  ;;  %176 = vadd.xlane.f32.xlu0 %v175_v49 }
  0x7f   :  { %v65_v51 = vpop.xlane.xlu0 %64  ;;  %164 = vadd.xlane.f32.xlu1 %v163_v48  ;;  %v104_v52 = vmul.f32 %v888_v38, %v77_v50 }
  0x80   :  { %v100_v53 = vmul.f32 %v888_v38, %v65_v51  ;;  %v41_v54 = vpop.xlane.xlu2 %40 }
  0x81   :  { %v92_v55 = vmul.f32 %v888_v38, %v41_v54  ;;  %v907_v57 = vsub.f32 %v800_v6, %v104_v52 }
  0x82   :  { %v910_v58 = vsub.f32 %v805_v7, %v100_v53 }
  0x83   :  { %v913_v59 = vsub.f32 %v810_v8, %v92_v55  ;;  %v136_v60 = vmul.f32 %v907_v57, %v907_v57 }
  0x84   :  { %v132_v61 = vmul.f32 %v910_v58, %v910_v58 }
  0x85   :  { %v124_v62 = vmul.f32 %v913_v59, %v913_v59  ;;  %v178_v0 = vsel %vm35_vm0, %v136_v60, 0.0 }
  0x86   :  { %v166_v1 = vsel %vm35_vm0, %v132_v61, 0.0  ;;  %v53_v5 = vpop.xlane.xlu1 %52 }
  0x87   :  { %v50_v3 = vpop.xlane.xlu0 %49  ;;  %179 = vadd.xlane.f32.xlu1 %v178_v0  ;;  %167 = vadd.xlane.f32.xlu2 %v166_v1  ;;  %v142_v4 = vsel %vm35_vm0, %v124_v62, 0.0  ;;  %v96_v8 = vmul.f32 %v888_v38, %v53_v5 }
  0x88   :  { %v95_v6 = vmul.f32 %v888_v38, %v50_v3  ;;  %143 = vadd.xlane.f32.xlu0 %v142_v4  ;;  %v68_v7 = vpop.xlane.xlu2 %67 }
  0x89   :  { %v101_v9 = vmul.f32 %v888_v38, %v68_v7  ;;  %v939_v15 = vsub.f32 %v826_v13, %v96_v8 }
  0x8a   :  { %v931_v2 = vsub.f32 %v821_v12, %v95_v6  ;;  %v139_v12 = vsel %vm35_vm0, %v123_v10, 0.0 }
  0x8b   :  { %v936_v11 = vsub.f32 %v831_v14, %v101_v9  ;;  %v128_v29 = vmul.f32 %v939_v15, %v939_v15 }
  0x8c   :  { %v127_v16 = vmul.f32 %v931_v2, %v931_v2 }
  0x8d   :  { %v133_v17 = vmul.f32 %v936_v11, %v936_v11  ;;  %v154_v36 = vsel %vm35_vm0, %v128_v29, 0.0 }
  0x8e   :  { %v151_v21 = vsel %vm35_vm0, %v127_v16, 0.0  ;;  %v80_v14 = vpop.xlane.xlu1 %79 }
  0x8f   :  { %v71_v22 = vpop.xlane.xlu0 %70  ;;  %152 = vadd.xlane.f32.xlu1 %v151_v21  ;;  %140 = vadd.xlane.f32.xlu2 %v139_v12  ;;  %v169_v23 = vsel %vm35_vm0, %v133_v17, 0.0  ;;  %v105_v28 = vmul.f32 %v888_v38, %v80_v14 }
  0x90   :  { %v102_v27 = vmul.f32 %v888_v38, %v71_v22  ;;  %170 = vadd.xlane.f32.xlu0 %v169_v23  ;;  %v83_v13 = vpop.xlane.xlu2 %82 }
  0x91   :  { %v106_v31 = vmul.f32 %v888_v38, %v83_v13  ;;  %v960_v34 = vsub.f32 %v847_v19, %v105_v28 }
  0x92   :  { %v954_v32 = vsub.f32 %v842_v18, %v102_v27  ;;  %v671_v27 = vld [vmem:[%s1204_s1 + $0x8] sm:$0xff] }
  0x93   :  { %v957_v33 = vsub.f32 %v852_v20, %v106_v31  ;;  %v137_v43 = vmul.f32 %v960_v34, %v960_v34  ;;  %720 = vmatpush.bf16.msra.mxu2 %v671_v27  ;;  %721 = vmatpush.bf16.msra.mxu3 %v671_v27 }
  0x94   :  { %v134_v35 = vmul.f32 %v954_v32, %v954_v32  ;;  %535 = vmatpush.bf16.msra.mxu0 %v671_v27  ;;  %719 = vmatpush.bf16.msra.mxu1 %v671_v27 }
  0x95   :  { %v138_v37 = vmul.f32 %v957_v33, %v957_v33  ;;  %v181_v51 = vsel %vm35_vm0, %v137_v43, 0.0  ;;  %v670_v43 = vld [vmem:[%s1204_s1] sm:$0xff] }
  0x96   :  { %v172_v39 = vsel %vm35_vm0, %v134_v35, 0.0  ;;  %v47_v20 = vpop.xlane.xlu1 %46 }
  0x97   :  { %173 = vadd.xlane.f32.xlu1 %v172_v39  ;;  %v44_v40 = vpop.xlane.xlu0 %43  ;;  %155 = vadd.xlane.f32.xlu2 %v154_v36  ;;  %v184_v18 = vsel %vm35_vm0, %v138_v37, 0.0  ;;  %v94_v42 = vmul.f32 %v888_v38, %v47_v20 }
  0x98   :  { %v93_v41 = vmul.f32 %v888_v38, %v44_v40  ;;  %185 = vadd.xlane.f32.xlu0 %v184_v18  ;;  %v56_v19 = vpop.xlane.xlu2 %55  ;;  %723 = vmatpush.bf16.msra.mxu2 %v670_v43 }
  0x99   :  { %v97_v46 = vmul.f32 %v888_v38, %v56_v19  ;;  %v981_v49 = vsub.f32 %v868_v25, %v94_v42  ;;  %724 = vmatpush.bf16.msra.mxu3 %v670_v43  ;;  %536 = vmatpush.bf16.msra.mxu0 %v670_v43 }
  0x9a   :  { %v975_v47 = vsub.f32 %v863_v24, %v93_v41  ;;  %722 = vmatpush.bf16.msra.mxu1 %v670_v43 }
  0x9b   :  { %v978_v48 = vsub.f32 %v873_v26, %v97_v46  ;;  %v126_v25 = vmul.f32 %v981_v49, %v981_v49 }
  0x9c   :  { %v125_v50 = vmul.f32 %v975_v47, %v975_v47 }
  0x9d   :  { %v129_v52 = vmul.f32 %v978_v48, %v978_v48  ;;  %v148_v60 = vsel %vm35_vm0, %v126_v25, 0.0 }
  0x9e   :  { %v145_v53 = vsel %vm35_vm0, %v125_v50, 0.0 }
  0x9f   :  { %146 = vadd.xlane.f32.xlu1 %v145_v53  ;;  %v59_v54 = vpop.xlane.xlu0 %58  ;;  %182 = vadd.xlane.f32.xlu2 %v181_v51  ;;  %v157_v24 = vsel %vm35_vm0, %v129_v52, 0.0 }
  0xa0   :  { %v98_v26 = vmul.f32 %v888_v38, %v59_v54  ;;  %158 = vadd.xlane.f32.xlu0 %v157_v24 }
  0xa2   :  { %v994_v55 = vsub.f32 %v884_v30, %v98_v26 }
  0xa4   :  { %v130_v56 = vmul.f32 %v994_v55, %v994_v55 }
  0xa6   :  { %v160_v61 = vsel %vm35_vm0, %v130_v56, 0.0 }
  0xa7   :  { %161 = vadd.xlane.f32.xlu1 %v160_v61  ;;  %149 = vadd.xlane.f32.xlu2 %v148_v60 }
  0xf1   :  { %v177_v0 = vpop.xlane.xlu0 %176 }
  0xf2   :  { %v165_v62 = vpop.xlane.xlu1 %164  ;;  %v199_v3 = vmul.f32 %v177_v0, %v888_v38 }
  0xf3   :  { %v195_v1 = vmul.f32 %v165_v62, %v888_v38 }
  0xf4   :  { %v215_v5 = vadd.f32 1e-06, %v199_v3 }
  0xf5   :  { %v211_v4 = vadd.f32 1e-06, %v195_v1 }
  0xf6   :  { %vm345_vm6 = vweird.f32 %v215_v5 }
  0xf7   :  { %729 = vrsqrt.f32 %v211_v4  ;;  %vm305_vm4 = vweird.f32 %v211_v4 }
  0xf8   :  { %731 = vrsqrt.f32 %v215_v5 }
  0xfa   :  { %v180_v30 = vpop.xlane.xlu1 %179  ;;  %v168_v6 = vpop.xlane.xlu2 %167 }
  0xfb   :  { %v200_v7 = vmul.f32 %v180_v30, %v888_v38  ;;  %v144_v8 = vpop.xlane.xlu0 %143  ;;  %v196_v9 = vmul.f32 %v168_v6, %v888_v38 }
  0xfc   :  { %v188_v10 = vmul.f32 %v144_v8, %v888_v38 }
  0xfd   :  { %v730_v16 = vpop.eup %729  ;;  %v1005_v17 = vadd.f32 1e-06, %v200_v7  ;;  %v1007_v21 = vadd.f32 1e-06, %v196_v9 }
  0xfe   :  { %v732_v12 = vpop.eup %731  ;;  %v300_v22 = vmul.f32 %v730_v16, %v211_v4  ;;  %v1009_v23 = vadd.f32 1e-06, %v188_v10  ;;  %vm306_vm3 = vweird.f32 %v730_v16 }
  0xff   :  { %v340_v14 = vmul.f32 %v732_v12, %v215_v5  ;;  %733 = vrsqrt.f32 %v1005_v17  ;;  %vm346_vm5 = vweird.f32 %v732_v12  ;;  %vm307_vm7 = vmor %vm305_vm4, %vm306_vm3  ;;  %vm355_vm9 = vweird.f32 %v1005_v17 }
 0x100   :  { %v301_v13 = vmul.f32 %v730_v16, %v300_v22  ;;  %735 = vrsqrt.f32 %v1009_v23  ;;  %vm347_vm8 = vmor %vm345_vm6, %vm346_vm5  ;;  %vm235_vm10 = vweird.f32 %v1009_v23  ;;  %vm315_vm15 = vweird.f32 %v1007_v21 }
 0x101   :  { %v341_v28 = vmul.f32 %v732_v12, %v340_v14  ;;  %737 = vrsqrt.f32 %v1007_v21 }
 0x102   :  { %v302_v29 = vmul.f32 0.5, %v301_v13  ;;  %v153_v31 = vpop.xlane.xlu1 %152  ;;  %v141_v35 = vpop.xlane.xlu2 %140 }
 0x103   :  { %v342_v36 = vmul.f32 0.5, %v341_v28  ;;  %v191_v37 = vmul.f32 %v153_v31, %v888_v38  ;;  %v171_v39 = vpop.xlane.xlu0 %170  ;;  %v187_v40 = vmul.f32 %v141_v35, %v888_v38 }
 0x104   :  { %v303_v18 = vsub.f32 1.5, %v302_v29  ;;  %v197_v20 = vmul.f32 %v171_v39, %v888_v38 }
 0x105   :  { %v1020_v41 = vpop.eup %733  ;;  %v343_v19 = vsub.f32 1.5, %v342_v36  ;;  %v1022_v42 = vadd.f32 1e-06, %v191_v37  ;;  %v1038_v26 = vadd.f32 1e-06, %v187_v40 }
 0x106   :  { %v1027_v46 = vpop.eup %735  ;;  %v304_v50 = vmul.f32 %v730_v16, %v303_v18  ;;  %v350_v51 = vmul.f32 %v1020_v41, %v1005_v17  ;;  %v1031_v52 = vadd.f32 1e-06, %v197_v20  ;;  %vm356_vm11 = vweird.f32 %v1020_v41 }
 0x107   :  { %v1033_v53 = vpop.eup %737  ;;  %v344_v54 = vmul.f32 %v732_v12, %v343_v19  ;;  %v230_v24 = vmul.f32 %v1027_v46, %v1009_v23  ;;  %739 = vrsqrt.f32 %v1022_v42  ;;  %vm236_vm12 = vweird.f32 %v1027_v46  ;;  %vm357_vm14 = vmor %vm355_vm9, %vm356_vm11 }
 0x108   :  { %v308_v25 = vsel %vm307_vm7, %v730_v16, %v304_v50  ;;  %v351_v56 = vmul.f32 %v1020_v41, %v350_v51  ;;  %v310_v60 = vmul.f32 %v1033_v53, %v1007_v21  ;;  %741 = vrsqrt.f32 %v1031_v52  ;;  %vm237_vm1 = vmor %vm235_vm10, %vm236_vm12 }
 0x109   :  { %v387_v61 = vmul.f32 %v308_v25, %v894_v45  ;;  %v348_v62 = vsel %vm347_vm8, %v732_v12, %v344_v54  ;;  %v231_v0 = vmul.f32 %v1027_v46, %v230_v24  ;;  %743 = vrsqrt.f32 %v1038_v26 }
 0x10a   :  { %v391_v1 = vmul.f32 %v348_v62, %v892_v44  ;;  %v352_v3 = vmul.f32 0.5, %v351_v56  ;;  %v311_v4 = vmul.f32 %v1033_v53, %v310_v60  ;;  %v174_v5 = vpop.xlane.xlu1 %173  ;;  %v156_v30 = vpop.xlane.xlu2 %155  ;;  %vm316_vm13 = vweird.f32 %v1033_v53 }
 0x10b   :  { %v403_v6 = vpack.c.bf16 %v387_v61, %v387_v61  ;;  %v232_v7 = vmul.f32 0.5, %v231_v0  ;;  %v186_v45 = vpop.xlane.xlu0 %185  ;;  %v198_v12 = vmul.f32 %v174_v5, %v888_v38  ;;  %v192_v14 = vmul.f32 %v156_v30, %v888_v38  ;;  %vm317_vm3 = vmor %vm315_vm15, %vm316_vm13 }
 0x10c   :  { %v407_v8 = vpack.c.bf16 %v391_v1, %v391_v1  ;;  %v353_v9 = vsub.f32 1.5, %v352_v3  ;;  %v312_v10 = vmul.f32 0.5, %v311_v4  ;;  %v202_v22 = vmul.f32 %v186_v45, %v888_v38 }
 0x10d   :  { %v1054_v44 = vpop.eup %739  ;;  %420 = vst.msk [vmem:[#allocation2 + $0x20] sm:$0xf] %vm411_vm2, %v403_v6  ;;  %v233_v16 = vsub.f32 1.5, %v232_v7  ;;  %v1071_v31 = vadd.f32 1e-06, %v198_v12  ;;  %vm265_vm5 = vweird.f32 %v1022_v42  ;;  %vm325_vm6 = vweird.f32 %v1031_v52 }
 0x10e   :  { %424 = vst.msk [vmem:[#allocation2 + $0x30] sm:$0xf] %vm411_vm2, %v407_v8  ;;  %v354_v27 = vmul.f32 %v1020_v41, %v353_v9  ;;  %v313_v13 = vsub.f32 1.5, %v312_v10  ;;  %v260_v28 = vmul.f32 %v1054_v44, %v1022_v42  ;;  %v742_v35 = vpop.eup %741  ;;  %v1080_v17 = vadd.f32 1e-06, %v202_v22 }
 0x10f   :  { %v234_v29 = vmul.f32 %v1027_v46, %v233_v16  ;;  %v744_v40 = vpop.eup %743  ;;  %v320_v20 = vmul.f32 %v742_v35, %v1031_v52  ;;  %vm266_vm4 = vweird.f32 %v1054_v44  ;;  %745 = vrsqrt.f32 %v1071_v31 }
 0x110   :  { %v358_v36 = vsel %vm357_vm14, %v1020_v41, %v354_v27  ;;  %v314_v37 = vmul.f32 %v1033_v53, %v313_v13  ;;  %v261_v39 = vmul.f32 %v1054_v44, %v260_v28  ;;  %v1087_v41 = vadd.f32 1e-06, %v192_v14  ;;  %vm267_vm7 = vmor %vm265_vm5, %vm266_vm4 }
 0x111   :  { %v392_v18 = vmul.f32 %v358_v36, %v907_v57  ;;  %v238_v21 = vsel %vm237_vm1, %v1027_v46, %v234_v29  ;;  %v220_v50 = vmul.f32 %v744_v40, %v1038_v26  ;;  %v321_v57 = vmul.f32 %v742_v35, %v320_v20 }
 0x112   :  { %v380_v23 = vmul.f32 %v238_v21, %v913_v59  ;;  %v318_v19 = vsel %vm317_vm3, %v1033_v53, %v314_v37  ;;  %v262_v43 = vmul.f32 0.5, %v261_v39  ;;  %v147_v56 = vpop.xlane.xlu1 %146  ;;  %747 = vrsqrt.f32 %v1080_v17  ;;  %v183_v61 = vpop.xlane.xlu2 %182 }
 0x113   :  { %v408_v51 = vpack.c.bf16 %v392_v18, %v392_v18  ;;  %v388_v54 = vmul.f32 %v318_v19, %v910_v58  ;;  %v221_v25 = vmul.f32 %v744_v40, %v220_v50  ;;  %v159_v60 = vpop.xlane.xlu0 %158  ;;  %v322_v53 = vmul.f32 0.5, %v321_v57 }
 0x114   :  { %v396_v46 = vpack.c.bf16 %v380_v23, %v380_v23  ;;  %v263_v24 = vsub.f32 1.5, %v262_v43  ;;  %749 = vrsqrt.f32 %v1087_v41  ;;  %vm326_vm8 = vweird.f32 %v742_v35 }
 0x115   :  { %425 = vst.msk [vmem:[#allocation2 + $0x34] sm:$0xf] %vm411_vm2, %v408_v51  ;;  %v404_v59 = vpack.c.bf16 %v388_v54, %v388_v54  ;;  %v222_v62 = vmul.f32 0.5, %v221_v25  ;;  %v323_v0 = vsub.f32 1.5, %v322_v53  ;;  %v189_v42 = vmul.f32 %v147_v56, %v888_v38  ;;  %v746_v7 = vpop.eup %745  ;;  %vm327_vm10 = vmor %vm325_vm6, %vm326_vm8 }
 0x116   :  { %413 = vst.msk [vmem:[#allocation2 + $0x4] sm:$0xf] %vm411_vm2, %v396_v46  ;;  %v264_v58 = vmul.f32 %v1054_v44, %v263_v24  ;;  %v193_v1 = vmul.f32 %v159_v60, %v888_v38  ;;  %vm226_vm9 = vweird.f32 %v744_v40  ;;  %v201_v5 = vmul.f32 %v183_v61, %v888_v38 }
 0x117   :  { %421 = vst.msk [vmem:[#allocation2 + $0x24] sm:$0xf] %vm411_vm2, %v404_v59  ;;  %v223_v4 = vsub.f32 1.5, %v222_v62  ;;  %v324_v6 = vmul.f32 %v742_v35, %v323_v0  ;;  %vm225_vm11 = vweird.f32 %v1038_v26  ;;  %v1113_v8 = vadd.f32 1e-06, %v189_v42 }
 0x118   :  { %v268_v3 = vsel %vm267_vm7, %v1054_v44, %v264_v58  ;;  %v748_v9 = vpop.eup %747  ;;  %vm227_vm12 = vmor %vm225_vm11, %vm226_vm9  ;;  %v330_v44 = vmul.f32 %v746_v7, %v1071_v31  ;;  %v1116_v12 = vadd.f32 1e-06, %v193_v1  ;;  %v1120_v27 = vadd.f32 1e-06, %v201_v5 }
 0x119   :  { %v383_v30 = vmul.f32 %v268_v3, %v931_v2  ;;  %v224_v45 = vmul.f32 %v744_v40, %v223_v4  ;;  %v328_v16 = vsel %vm327_vm10, %v742_v35, %v324_v6  ;;  %v370_v52 = vmul.f32 %v748_v9, %v1080_v17 }
 0x11a   :  { %v750_v22 = vpop.eup %749  ;;  %v389_v2 = vmul.f32 %v328_v16, %v936_v11  ;;  %v331_v28 = vmul.f32 %v746_v7, %v330_v44  ;;  %751 = vrsqrt.f32 %v1113_v8  ;;  %v162_v37 = vpop.xlane.xlu1 %161  ;;  %vm336_vm13 = vweird.f32 %v746_v7 }
 0x11b   :  { %v399_v10 = vpack.c.bf16 %v383_v30, %v383_v30  ;;  %v228_v14 = vsel %vm227_vm12, %v744_v40, %v224_v45  ;;  %v270_v29 = vmul.f32 %v750_v22, %v1087_v41  ;;  %v371_v36 = vmul.f32 %v748_v9, %v370_v52  ;;  %v150_v21 = vpop.xlane.xlu2 %149 }
 0x11c   :  { %v668_v13 = vld [vmem:[#allocation2 + $0x30] sm:$0xff]  ;;  %v379_v26 = vmul.f32 %v228_v14, %v922_v63  ;;  %v405_v35 = vpack.c.bf16 %v389_v2, %v389_v2  ;;  %v332_v40 = vmul.f32 0.5, %v331_v28  ;;  %753 = vrsqrt.f32 %v1116_v12 }
 0x11d   :  { %416 = vst.msk [vmem:[#allocation2 + $0x10] sm:$0xf] %vm411_vm2, %v399_v10  ;;  %660 = vmatmul.msk.bf16.vlgmr.msra.gmra.mxu3 %vm35_vm0, %v668_v13  ;;  %v271_v18 = vmul.f32 %v750_v22, %v270_v29  ;;  %v372_v63 = vmul.f32 0.5, %v371_v36  ;;  %755 = vrsqrt.f32 %v1120_v27  ;;  %v194_v19 = vmul.f32 %v162_v37, %v888_v38 }
 0x11e   :  { %v666_v39 = vld [vmem:[#allocation2 + $0x20] sm:$0xff]  ;;  %v395_v11 = vpack.c.bf16 %v379_v26, %v379_v26  ;;  %422 = vst.msk [vmem:[#allocation2 + $0x28] sm:$0xf] %vm411_vm2, %v405_v35  ;;  %v333_v20 = vsub.f32 1.5, %v332_v40  ;;  %vm375_vm14 = vweird.f32 %v1080_v17  ;;  %vm376_vm15 = vweird.f32 %v748_v9 }
 0x11f   :  { %658 = vmatmul.msk.bf16.vlgmr.msra.gmra.mxu2 %vm35_vm0, %v666_v39  ;;  %v272_v23 = vmul.f32 0.5, %v271_v18  ;;  %v373_v43 = vsub.f32 1.5, %v372_v63  ;;  %v190_v50 = vmul.f32 %v150_v21, %v888_v38  ;;  %vm335_vm1 = vweird.f32 %v1071_v31  ;;  %vm377_vm6 = vmor %vm375_vm14, %vm376_vm15 }
 0x120   :  { %412 = vst.msk [vmem:[#allocation2] sm:$0xf] %vm411_vm2, %v395_v11  ;;  %v334_v51 = vmul.f32 %v746_v7, %v333_v20  ;;  %vm276_vm3 = vweird.f32 %v750_v22  ;;  %v752_v57 = vpop.eup %751  ;;  %vm337_vm4 = vmor %vm335_vm1, %vm336_vm13  ;;  %vm275_vm5 = vweird.f32 %v1087_v41  ;;  %v1138_v17 = vadd.f32 1e-06, %v194_v19 }
 0x121   :  { %v273_v54 = vsub.f32 1.5, %v272_v23  ;;  %v374_v46 = vmul.f32 %v748_v9, %v373_v43  ;;  %v240_v60 = vmul.f32 %v752_v57, %v1113_v8  ;;  %vm277_vm7 = vmor %vm275_vm5, %vm276_vm3  ;;  %v1142_v61 = vadd.f32 1e-06, %v190_v50 }
 0x122   :  { %v754_v24 = vpop.eup %753  ;;  %v338_v25 = vsel %vm337_vm4, %v746_v7, %v334_v51  ;;  %757 = vrsqrt.f32 %v1138_v17  ;;  %vm246_vm8 = vweird.f32 %v752_v57  ;;  %vm285_vm9 = vweird.f32 %v1116_v12 }
 0x123   :  { %v274_v56 = vmul.f32 %v750_v22, %v273_v54  ;;  %v756_v59 = vpop.eup %755  ;;  %v390_v38 = vmul.f32 %v338_v25, %v954_v32  ;;  %v378_v53 = vsel %vm377_vm6, %v748_v9, %v374_v46  ;;  %v280_v31 = vmul.f32 %v754_v24, %v1116_v12 }
 0x124   :  { %v394_v58 = vmul.f32 %v378_v53, %v957_v33  ;;  %v241_v62 = vmul.f32 %v752_v57, %v240_v60  ;;  %v360_v0 = vmul.f32 %v756_v59, %v1120_v27  ;;  %759 = vrsqrt.f32 %v1142_v61 }
 0x125   :  { %v278_v41 = vsel %vm277_vm7, %v750_v22, %v274_v56  ;;  %v406_v42 = vpack.c.bf16 %v390_v38, %v390_v38  ;;  %v281_v3 = vmul.f32 %v754_v24, %v280_v31  ;;  %vm286_vm10 = vweird.f32 %v754_v24 }
 0x126   :  { %v384_v1 = vmul.f32 %v278_v41, %v939_v15  ;;  %v410_v5 = vpack.c.bf16 %v394_v58, %v394_v58  ;;  %v242_v30 = vmul.f32 0.5, %v241_v62  ;;  %v361_v32 = vmul.f32 %v756_v59, %v360_v0  ;;  %vm287_vm14 = vmor %vm285_vm9, %vm286_vm10 }
 0x127   :  { %v662_v4 = vld [vmem:[#allocation2] sm:$0xff]  ;;  %423 = vst.msk [vmem:[#allocation2 + $0x2c] sm:$0xf] %vm411_vm2, %v406_v42  ;;  %v282_v7 = vmul.f32 0.5, %v281_v3  ;;  %vm245_vm11 = vweird.f32 %v1113_v8  ;;  %vm366_vm12 = vweird.f32 %v756_v59  ;;  %vm365_vm15 = vweird.f32 %v1120_v27 }
 0x128   :  { %v400_v6 = vpack.c.bf16 %v384_v1, %v384_v1  ;;  %654 = vmatmul.msk.bf16.vlgmr.msra.gmra.mxu0 %vm35_vm0, %v662_v4  ;;  %427 = vst.msk [vmem:[#allocation2 + $0x3c] sm:$0xf] %vm411_vm2, %v410_v5  ;;  %v243_v33 = vsub.f32 1.5, %v242_v30  ;;  %v362_v15 = vmul.f32 0.5, %v361_v32  ;;  %vm247_vm13 = vmor %vm245_vm11, %vm246_vm8  ;;  %v758_v44 = vpop.eup %757  ;;  %vm295_vm5 = vweird.f32 %v1138_v17 }
 0x129   :  { %v283_v45 = vsub.f32 1.5, %v282_v7  ;;  %vm367_vm1 = vmor %vm365_vm15, %vm366_vm12  ;;  %v290_v12 = vmul.f32 %v758_v44, %v1138_v17  ;;  %vm296_vm3 = vweird.f32 %v758_v44  ;;  %vm255_vm7 = vweird.f32 %v1142_v61 }
 0x12a   :  { %417 = vst.msk [vmem:[#allocation2 + $0x14] sm:$0xf] %vm411_vm2, %v400_v6  ;;  %v244_v9 = vmul.f32 %v752_v57, %v243_v33  ;;  %v363_v10 = vsub.f32 1.5, %v362_v15  ;;  %v760_v14 = vpop.eup %759  ;;  %vm297_vm6 = vmor %vm295_vm5, %vm296_vm3 }
 0x12b   :  { %v284_v16 = vmul.f32 %v754_v24, %v283_v45  ;;  %v250_v28 = vmul.f32 %v760_v14, %v1142_v61  ;;  %v291_v37 = vmul.f32 %v758_v44, %v290_v12  ;;  %vm256_vm4 = vweird.f32 %v760_v14 }
 0x12c   :  { %v248_v22 = vsel %vm247_vm13, %v752_v57, %v244_v9  ;;  %v364_v2 = vmul.f32 %v756_v59, %v363_v10  ;;  %vm257_vm8 = vmor %vm255_vm7, %vm256_vm4 }
 0x12d   :  { %v381_v52 = vmul.f32 %v248_v22, %v975_v47  ;;  %v288_v13 = vsel %vm287_vm14, %v754_v24, %v284_v16  ;;  %v251_v11 = vmul.f32 %v760_v14, %v250_v28  ;;  %v292_v40 = vmul.f32 0.5, %v291_v37 }
 0x12e   :  { %v385_v26 = vmul.f32 %v288_v13, %v978_v48  ;;  %v368_v8 = vsel %vm367_vm1, %v756_v59, %v364_v2  ;;  %v667_v29 = vld [vmem:[#allocation2 + $0x28] sm:$0xff] }
 0x12f   :  { %v397_v35 = vpack.c.bf16 %v381_v52, %v381_v52  ;;  %v393_v36 = vmul.f32 %v368_v8, %v960_v34  ;;  %659 = vmatmul.msk.bf16.gmra.mxu2 %vm35_vm0, %v667_v29  ;;  %v252_v48 = vmul.f32 0.5, %v251_v11  ;;  %v293_v18 = vsub.f32 1.5, %v292_v40 }
 0x130   :  { %v401_v39 = vpack.c.bf16 %v385_v26, %v385_v26 }
 0x131   :  { %v664_v27 = vld [vmem:[#allocation2 + $0x10] sm:$0xff]  ;;  %414 = vst.msk [vmem:[#allocation2 + $0x8] sm:$0xf] %vm411_vm2, %v397_v35  ;;  %v409_v47 = vpack.c.bf16 %v393_v36, %v393_v36  ;;  %v253_v34 = vsub.f32 1.5, %v252_v48  ;;  %v294_v21 = vmul.f32 %v758_v44, %v293_v18 }
 0x132   :  { %418 = vst.msk [vmem:[#allocation2 + $0x18] sm:$0xf] %vm411_vm2, %v401_v39  ;;  %656 = vmatmul.msk.bf16.vlgmr.msra.gmra.mxu1 %vm35_vm0, %v664_v27 }
 0x133   :  { %426 = vst.msk [vmem:[#allocation2 + $0x38] sm:$0xf] %vm411_vm2, %v409_v47  ;;  %v254_v63 = vmul.f32 %v760_v14, %v253_v34  ;;  %v298_v20 = vsel %vm297_vm6, %v758_v44, %v294_v21 }
 0x134   :  { %v386_v23 = vmul.f32 %v298_v20, %v994_v55 }
 0x135   :  { %v258_v19 = vsel %vm257_vm8, %v760_v14, %v254_v63 }
 0x136   :  { %v382_v43 = vmul.f32 %v258_v19, %v981_v49  ;;  %v402_v50 = vpack.c.bf16 %v386_v23, %v386_v23  ;;  %v726_v49 = vld [vmem:[%s1203_s2] ss:$0 sm:$0xff] }
 0x138   :  { %v398_v54 = vpack.c.bf16 %v382_v43, %v382_v43  ;;  %419 = vst.msk [vmem:[#allocation2 + $0x1c] sm:$0xf] %vm411_vm2, %v402_v50 }
 0x13a   :  { %v669_v51 = vld [vmem:[#allocation2 + $0x38] sm:$0xff]  ;;  %415 = vst.msk [vmem:[#allocation2 + $0xc] sm:$0xf] %vm411_vm2, %v398_v54 }
 0x13b   :  { %661 = vmatmul.msk.bf16.gmra.mxu3 %vm35_vm0, %v669_v51 }
 0x13f   :  { %v665_v57 = vld [vmem:[#allocation2 + $0x18] sm:$0xff] }
 0x141   :  { %v663_v46 = vld [vmem:[#allocation2 + $0x8] sm:$0xff] }
 0x142   :  { %657 = vmatmul.msk.bf16.gmra.mxu1 %vm35_vm0, %v665_v57  ;;  %655 = vmatmul.msk.bf16.gmra.mxu0 %vm35_vm0, %v663_v46 }
 0x1a0   :  { %v568_v24 = vpop.f32.mrf.mxu3 }
 0x1a1   :  { %v569_v60 = vadd.f32 %v726_v49, %v568_v24 }
 0x1a2   :  { %v558_v55 = vpop.f32.mrf.mxu2 }
 0x1a3   :  { %v559_v38 = vadd.f32 %v726_v49, %v558_v55 }
 0x1a5   :  { %v538_v25 = vpop.f32.mrf.mxu0 }
 0x1a6   :  { %v539_v41 = vadd.f32 %v726_v49, %v538_v25 }
 0x1a8   :  { %v570_v56 = vpop.f32.mrf.mxu3 }
 0x1a9   :  { %v571_v17 = vadd.f32 %v726_v49, %v570_v56 }
 0x1aa   :  { %v560_v59 = vpop.f32.mrf.mxu2 }
 0x1ab   :  { %v561_v53 = vadd.f32 %v726_v49, %v560_v59  ;;  %v705_v31 = vpack.c.bf16 %v571_v17, %v569_v60 }
 0x1ad   :  { %v695_v61 = vpack.c.bf16 %v561_v53, %v559_v38  ;;  %717 = vst [vmem:[%s1205_s3 + $0x30] sm:$0xff] %v705_v31   ;;  %v540_v58 = vpop.f32.mrf.mxu0 }
 0x1ae   :  { %v541_v62 = vadd.f32 %v726_v49, %v540_v58 }
 0x1af   :  { %715 = vst [vmem:[%s1205_s3 + $0x20] sm:$0xff] %v695_v61   ;;  %v548_v42 = vpop.f32.mrf.mxu1 }
 0x1b0   :  { %v675_v0 = vpack.c.bf16 %v541_v62, %v539_v41  ;;  %v549_v4 = vadd.f32 %v726_v49, %v548_v42 }
 0x1b2   :  { %676 = vst [vmem:[%s1205_s3] sm:$0xff] %v675_v0   ;;  %v563_v1 = vpop.f32.mrf.mxu2 }
 0x1b3   :  { %v564_v6 = vadd.f32 %v726_v49, %v563_v1 }
 0x1b7   :  { %v550_v3 = vpop.f32.mrf.mxu1 }
 0x1b8   :  { %v551_v5 = vadd.f32 %v726_v49, %v550_v3 }
 0x1ba   :  { %v685_v30 = vpack.c.bf16 %v551_v5, %v549_v4  ;;  %v565_v32 = vpop.f32.mrf.mxu2 }
 0x1bb   :  { %v566_v7 = vadd.f32 %v726_v49, %v565_v32 }
 0x1bc   :  { %713 = vst [vmem:[%s1205_s3 + $0x10] sm:$0xff] %v685_v30  }
 0x1bd   :  { %v700_v33 = vpack.c.bf16 %v566_v7, %v564_v6 }
 0x1be   :  { %v573_v15 = vpop.f32.mrf.mxu3 }
 0x1bf   :  { %716 = vst [vmem:[%s1205_s3 + $0x28] sm:$0xff] %v700_v33   ;;  %v553_v45 = vpop.f32.mrf.mxu1  ;;  %v543_v9 = vpop.f32.mrf.mxu0  ;;  %v574_v16 = vadd.f32 %v726_v49, %v573_v15 }
 0x1c0   :  { %v554_v14 = vadd.f32 %v726_v49, %v553_v45  ;;  %v544_v12 = vadd.f32 %v726_v49, %v543_v9 }
 0x1c6   :  { %v575_v10 = vpop.f32.mrf.mxu3 }
 0x1c7   :  { %v576_v44 = vadd.f32 %v726_v49, %v575_v10  ;;  %v555_v2 = vpop.f32.mrf.mxu1  ;;  %v545_v52 = vpop.f32.mrf.mxu0 }
 0x1c8   :  { %v556_v13 = vadd.f32 %v726_v49, %v555_v2  ;;  %v546_v26 = vadd.f32 %v726_v49, %v545_v52 }
 0x1c9   :  { %v710_v22 = vpack.c.bf16 %v576_v44, %v574_v16 }
 0x1ca   :  { %v690_v8 = vpack.c.bf16 %v556_v13, %v554_v14  ;;  %v680_v28 = vpack.c.bf16 %v546_v26, %v544_v12 }
 0x1cb   :  { %718 = vst [vmem:[%s1205_s3 + $0x38] sm:$0xff] %v710_v22  }
 0x1cc   :  { %714 = vst [vmem:[%s1205_s3 + $0x18] sm:$0xff] %v690_v8  }
 0x1cd   :  { %712 = vst [vmem:[%s1205_s3 + $0x8] sm:$0xff] %v680_v28  }

// kernel: transformer_block_forward.15
= control target key start
LH: loop header
LB: loop body
LE: loop exit
PB: predicated region body
PF: predicated region fallthrough
CT: control target
= control target key end

     0   :  { %vm21_vm0 = vcmask 261120   ;;  %v461_v6 = vmov 0.0   ;;  %s700_s1 = inlined_call_operand.vmem [shape: bf16[128,32], index: 1, kind: input, shape index: {}]   ;;  %s701_s2 = inlined_call_operand.vmem [shape: f32[1,32], index: 2, kind: input, shape index: {}]   ;;  %s702_s0 = inlined_call_operand.vmem [shape: bf16[128,128], index: 0, kind: input, shape index: {}]   ;;  %s703_s3 = inlined_call_operand.vmem [shape: f32[128,32], index: 3, kind: input, shape index: {}]   ;;  %s704_s4 = inlined_call_operand.vmem [shape: f32[128,32], index: 4, kind: output, shape index: {}]  }
   0x1   :  { %v434_v0 = vld [vmem:[%s700_s1 + $0x38] sm:$0xff]  ;;  %v433_v1 = vld [vmem:[%s700_s1 + $0x30] sm:$0xff]  ;;  %v432_v2 = vld [vmem:[%s700_s1 + $0x28] sm:$0xff]  ;;  %22 = vst.msk [vmem:[#allocation2] sm:$0xff] %vm21_vm0, %v461_v6 }
   0x2   :  { %182 = vmatpush.bf16.msra.mxu0 %v434_v0  ;;  %435 = vmatpush.bf16.msra.mxu1 %v434_v0  ;;  %v431_v3 = vld [vmem:[%s700_s1 + $0x20] sm:$0xff]  ;;  %v430_v4 = vld [vmem:[%s700_s1 + $0x18] sm:$0xff]  ;;  %v429_v5 = vld [vmem:[%s700_s1 + $0x10] sm:$0xff]  ;;  %23 = vst.msk [vmem:[#allocation2 + $0x8] sm:$0xff] %vm21_vm0, %v461_v6 }
   0x3   :  { %436 = vmatpush.bf16.msra.mxu2 %v434_v0  ;;  %437 = vmatpush.bf16.msra.mxu3 %v434_v0  ;;  %24 = vst.msk [vmem:[#allocation2 + $0x10] sm:$0xff] %vm21_vm0, %v461_v6  ;;  %v428_v7 = vld [vmem:[%s700_s1 + $0x8] sm:$0xff]  ;;  %v427_v8 = vld [vmem:[%s700_s1] sm:$0xff]  ;;  %v421_v10 = vld [vmem:[%s702_s0 + $0x10] sm:$0xff] }
   0x4   :  { %25 = vst.msk [vmem:[#allocation2 + $0x18] sm:$0xff] %vm21_vm0, %v461_v6  ;;  %v419_v9 = vld [vmem:[%s702_s0] sm:$0xff]  ;;  %v425_v12 = vld [vmem:[%s702_s0 + $0x30] sm:$0xff]  ;;  %v420_v13 = vld [vmem:[%s702_s0 + $0x8] sm:$0xff] }
   0x5   :  { %26 = vst.msk [vmem:[#allocation2 + $0x20] sm:$0xff] %vm21_vm0, %v461_v6  ;;  %v423_v11 = vld [vmem:[%s702_s0 + $0x20] sm:$0xff]  ;;  %v422_v14 = vld [vmem:[%s702_s0 + $0x18] sm:$0xff]  ;;  %v424_v15 = vld [vmem:[%s702_s0 + $0x28] sm:$0xff] }
   0x6   :  { %183 = vmatpush.bf16.msra.mxu0 %v433_v1  ;;  %438 = vmatpush.bf16.msra.mxu1 %v433_v1  ;;  %27 = vst.msk [vmem:[#allocation2 + $0x28] sm:$0xff] %vm21_vm0, %v461_v6  ;;  %v426_v16 = vld [vmem:[%s702_s0 + $0x38] sm:$0xff]  ;;  %v556_v27 = vld [vmem:[%s701_s2] ss:$0 sm:$0xff]  ;;  %v304_v63 = vld [vmem:[%s703_s3 + $0x8] sm:$0xff] }
   0x7   :  { %439 = vmatpush.bf16.msra.mxu2 %v433_v1  ;;  %440 = vmatpush.bf16.msra.mxu3 %v433_v1  ;;  %28 = vst.msk [vmem:[#allocation2 + $0x30] sm:$0xff] %vm21_vm0, %v461_v6  ;;  %v303_v37 = vld [vmem:[%s703_s3] sm:$0xff] }
   0x8   :  { %29 = vst.msk [vmem:[#allocation2 + $0x38] sm:$0xff] %vm21_vm0, %v461_v6  ;;  %v38_v17 = vld [vmem:[#allocation2] sm:$0xff] }
   0x9   :  { %30 = vst.msk [vmem:[#allocation2 + $0x40] sm:$0xff] %vm21_vm0, %v461_v6  ;;  %v39_v25 = vld [vmem:[#allocation2 + $0x8] sm:$0xff]  ;;  %v307_v40 = vld [vmem:[%s703_s3 + $0x20] sm:$0xff] }
   0xa   :  { %184 = vmatpush.bf16.msra.mxu0 %v432_v2  ;;  %441 = vmatpush.bf16.msra.mxu1 %v432_v2  ;;  %31 = vst.msk [vmem:[#allocation2 + $0x48] sm:$0xff] %vm21_vm0, %v461_v6  ;;  %v40_v46 = vld [vmem:[#allocation2 + $0x10] sm:$0xff]  ;;  %v311_v55 = vld [vmem:[%s703_s3 + $0x40] sm:$0xff] }
   0xb   :  { %442 = vmatpush.bf16.msra.mxu2 %v432_v2  ;;  %443 = vmatpush.bf16.msra.mxu3 %v432_v2  ;;  %32 = vst.msk [vmem:[#allocation2 + $0x50] sm:$0xff] %vm21_vm0, %v461_v6  ;;  %v315_v60 = vld [vmem:[%s703_s3 + $0x60] sm:$0xff] }
   0xc   :  { %33 = vst.msk [vmem:[#allocation2 + $0x58] sm:$0xff] %vm21_vm0, %v461_v6  ;;  %v42_v18 = vld [vmem:[#allocation2 + $0x20] sm:$0xff] }
   0xd   :  { %34 = vst.msk [vmem:[#allocation2 + $0x60] sm:$0xff] %vm21_vm0, %v461_v6  ;;  %v43_v26 = vld [vmem:[#allocation2 + $0x28] sm:$0xff] }
   0xe   :  { %185 = vmatpush.bf16.msra.mxu0 %v431_v3  ;;  %444 = vmatpush.bf16.msra.mxu1 %v431_v3  ;;  %35 = vst.msk [vmem:[#allocation2 + $0x68] sm:$0xff] %vm21_vm0, %v461_v6  ;;  %v44_v47 = vld [vmem:[#allocation2 + $0x30] sm:$0xff] }
   0xf   :  { %445 = vmatpush.bf16.msra.mxu2 %v431_v3  ;;  %446 = vmatpush.bf16.msra.mxu3 %v431_v3  ;;  %36 = vst.msk [vmem:[#allocation2 + $0x70] sm:$0xff] %vm21_vm0, %v461_v6  ;;  %v308_v3 = vld [vmem:[%s703_s3 + $0x28] sm:$0xff] }
  0x10   :  { %37 = vst.msk [vmem:[#allocation2 + $0x78] sm:$0xff] %vm21_vm0, %v461_v6  ;;  %v46_v23 = vld [vmem:[#allocation2 + $0x40] sm:$0xff] }
  0x11   :  { %v47_v43 = vld [vmem:[#allocation2 + $0x48] sm:$0xff] }
  0x12   :  { %186 = vmatpush.bf16.msra.mxu0 %v430_v4  ;;  %447 = vmatpush.bf16.msra.mxu1 %v430_v4  ;;  %v48_v6 = vld [vmem:[#allocation2 + $0x50] sm:$0xff] }
  0x13   :  { %448 = vmatpush.bf16.msra.mxu2 %v430_v4  ;;  %449 = vmatpush.bf16.msra.mxu3 %v430_v4 }
  0x14   :  { %v50_v24 = vld [vmem:[#allocation2 + $0x60] sm:$0xff] }
  0x15   :  { %v51_v44 = vld [vmem:[#allocation2 + $0x68] sm:$0xff] }
  0x16   :  { %187 = vmatpush.bf16.msra.mxu0 %v429_v5  ;;  %450 = vmatpush.bf16.msra.mxu1 %v429_v5 }
  0x17   :  { %451 = vmatpush.bf16.msra.mxu2 %v429_v5  ;;  %452 = vmatpush.bf16.msra.mxu3 %v429_v5 }
  0x1a   :  { %188 = vmatpush.bf16.msra.mxu0 %v428_v7  ;;  %453 = vmatpush.bf16.msra.mxu1 %v428_v7 }
  0x1b   :  { %454 = vmatpush.bf16.msra.mxu2 %v428_v7  ;;  %455 = vmatpush.bf16.msra.mxu3 %v428_v7  ;;  %v52_v7 = vld [vmem:[#allocation2 + $0x70] sm:$0xff] }
  0x1e   :  { %189 = vmatpush.bf16.msra.mxu0 %v427_v8  ;;  %456 = vmatpush.bf16.msra.mxu1 %v427_v8 }
  0x1f   :  { %457 = vmatpush.bf16.msra.mxu2 %v427_v8  ;;  %458 = vmatpush.bf16.msra.mxu3 %v427_v8 }
  0x21   :  { %190 = vmatmul.bf16.vlgmr.msra.gmra.mxu0 %v419_v9  ;;  %200 = vmatmul.bf16.vlgmr.msra.gmra.mxu1 %v421_v10  ;;  %v41_v9 = vld [vmem:[#allocation2 + $0x18] sm:$0xff] }
  0x22   :  { %210 = vmatmul.bf16.vlgmr.msra.gmra.mxu2 %v423_v11  ;;  %220 = vmatmul.bf16.vlgmr.msra.gmra.mxu3 %v425_v12  ;;  %v45_v10 = vld [vmem:[#allocation2 + $0x38] sm:$0xff] }
  0x31   :  { %195 = vmatmul.bf16.gmra.mxu0 %v420_v13  ;;  %205 = vmatmul.bf16.gmra.mxu1 %v422_v14 }
  0x32   :  { %215 = vmatmul.bf16.gmra.mxu2 %v424_v15  ;;  %225 = vmatmul.bf16.gmra.mxu3 %v426_v16 }
  0x9e   :  { %v191_v19 = vpop.f32.mrf.mxu0  ;;  %v201_v20 = vpop.f32.mrf.mxu1 }
  0x9f   :  { %v231_v21 = vadd.f32 %v191_v19, %v38_v17  ;;  %v235_v22 = vadd.f32 %v201_v20, %v42_v18  ;;  %v312_v19 = vld [vmem:[%s703_s3 + $0x48] sm:$0xff] }
  0xa1   :  { %248 = vst.msk [vmem:[#allocation2] sm:$0xff] %vm21_vm0, %v231_v21 }
  0xa2   :  { %252 = vst.msk [vmem:[#allocation2 + $0x20] sm:$0xff] %vm21_vm0, %v235_v22 }
  0xa5   :  { %v211_v28 = vpop.f32.mrf.mxu2  ;;  %v221_v29 = vpop.f32.mrf.mxu3 }
  0xa6   :  { %v239_v30 = vadd.f32 %v211_v28, %v46_v23  ;;  %v243_v31 = vadd.f32 %v221_v29, %v50_v24  ;;  %v193_v32 = vpop.f32.mrf.mxu0  ;;  %v203_v33 = vpop.f32.mrf.mxu1  ;;  %v316_v24 = vld [vmem:[%s703_s3 + $0x68] sm:$0xff]  ;;  %v305_v28 = vld [vmem:[%s703_s3 + $0x10] sm:$0xff] }
  0xa7   :  { %v232_v34 = vadd.f32 %v193_v32, %v39_v25  ;;  %v236_v35 = vadd.f32 %v203_v33, %v43_v26  ;;  %v309_v32 = vld [vmem:[%s703_s3 + $0x30] sm:$0xff] }
  0xa8   :  { %v267_v36 = vld [vmem:[#allocation2] sm:$0xff]  ;;  %256 = vst.msk [vmem:[#allocation2 + $0x40] sm:$0xff] %vm21_vm0, %v239_v30 }
  0xa9   :  { %v287_v38 = vadd.f32 %v556_v27, %v267_v36  ;;  %v271_v39 = vld [vmem:[#allocation2 + $0x20] sm:$0xff]  ;;  %260 = vst.msk [vmem:[#allocation2 + $0x60] sm:$0xff] %vm21_vm0, %v243_v31  ;;  %v53_v36 = vld [vmem:[#allocation2 + $0x78] sm:$0xff] }
  0xaa   :  { %v291_v41 = vadd.f32 %v556_v27, %v271_v39  ;;  %249 = vst.msk [vmem:[#allocation2 + $0x8] sm:$0xff] %vm21_vm0, %v232_v34 }
  0xab   :  { %v319_v42 = vadd.f32 %v303_v37, %v287_v38  ;;  %253 = vst.msk [vmem:[#allocation2 + $0x28] sm:$0xff] %vm21_vm0, %v236_v35  ;;  %v49_v35 = vld [vmem:[#allocation2 + $0x58] sm:$0xff] }
  0xac   :  { %v323_v45 = vadd.f32 %v307_v40, %v291_v41 }
  0xad   :  { %335 = vst.msk [vmem:[%s704_s4] sm:$0xff] %vm21_vm0, %v319_v42  ;;  %v213_v48 = vpop.f32.mrf.mxu2  ;;  %v223_v49 = vpop.f32.mrf.mxu3 }
  0xae   :  { %339 = vst.msk [vmem:[%s704_s4 + $0x20] sm:$0xff] %vm21_vm0, %v323_v45  ;;  %v240_v50 = vadd.f32 %v213_v48, %v47_v43  ;;  %v244_v51 = vadd.f32 %v223_v49, %v51_v44  ;;  %v196_v52 = vpop.f32.mrf.mxu0  ;;  %v206_v53 = vpop.f32.mrf.mxu1  ;;  %v313_v44 = vld [vmem:[%s703_s3 + $0x50] sm:$0xff] }
  0xaf   :  { %v275_v54 = vld [vmem:[#allocation2 + $0x40] sm:$0xff]  ;;  %v233_v56 = vadd.f32 %v196_v52, %v40_v46  ;;  %v237_v57 = vadd.f32 %v206_v53, %v44_v47  ;;  %v317_v47 = vld [vmem:[%s703_s3 + $0x70] sm:$0xff] }
  0xb0   :  { %v295_v58 = vadd.f32 %v556_v27, %v275_v54  ;;  %v279_v59 = vld [vmem:[#allocation2 + $0x60] sm:$0xff]  ;;  %257 = vst.msk [vmem:[#allocation2 + $0x48] sm:$0xff] %vm21_vm0, %v240_v50  ;;  %v306_v50 = vld [vmem:[%s703_s3 + $0x18] sm:$0xff] }
  0xb1   :  { %v299_v61 = vadd.f32 %v556_v27, %v279_v59  ;;  %v268_v62 = vld [vmem:[#allocation2 + $0x8] sm:$0xff]  ;;  %261 = vst.msk [vmem:[#allocation2 + $0x68] sm:$0xff] %vm21_vm0, %v244_v51  ;;  %v310_v54 = vld [vmem:[%s703_s3 + $0x38] sm:$0xff] }
  0xb2   :  { %v327_v0 = vadd.f32 %v311_v55, %v295_v58  ;;  %v288_v1 = vadd.f32 %v556_v27, %v268_v62  ;;  %v272_v2 = vld [vmem:[#allocation2 + $0x28] sm:$0xff]  ;;  %250 = vst.msk [vmem:[#allocation2 + $0x10] sm:$0xff] %vm21_vm0, %v233_v56 }
  0xb3   :  { %v331_v4 = vadd.f32 %v315_v60, %v299_v61  ;;  %v292_v5 = vadd.f32 %v556_v27, %v272_v2  ;;  %254 = vst.msk [vmem:[#allocation2 + $0x30] sm:$0xff] %vm21_vm0, %v237_v57  ;;  %v314_v60 = vld [vmem:[%s703_s3 + $0x58] sm:$0xff] }
  0xb4   :  { %343 = vst.msk [vmem:[%s704_s4 + $0x40] sm:$0xff] %vm21_vm0, %v327_v0  ;;  %v320_v8 = vadd.f32 %v304_v63, %v288_v1  ;;  %v318_v63 = vld [vmem:[%s703_s3 + $0x78] sm:$0xff] }
  0xb5   :  { %347 = vst.msk [vmem:[%s704_s4 + $0x60] sm:$0xff] %vm21_vm0, %v331_v4  ;;  %v324_v11 = vadd.f32 %v308_v3, %v292_v5  ;;  %v216_v12 = vpop.f32.mrf.mxu2  ;;  %v226_v13 = vpop.f32.mrf.mxu3 }
  0xb6   :  { %336 = vst.msk [vmem:[%s704_s4 + $0x8] sm:$0xff] %vm21_vm0, %v320_v8  ;;  %v241_v14 = vadd.f32 %v216_v12, %v48_v6  ;;  %v245_v15 = vadd.f32 %v226_v13, %v52_v7  ;;  %v198_v16 = vpop.f32.mrf.mxu0  ;;  %v208_v17 = vpop.f32.mrf.mxu1 }
  0xb7   :  { %340 = vst.msk [vmem:[%s704_s4 + $0x28] sm:$0xff] %vm21_vm0, %v324_v11  ;;  %v276_v18 = vld [vmem:[#allocation2 + $0x48] sm:$0xff]  ;;  %v234_v20 = vadd.f32 %v198_v16, %v41_v9  ;;  %v238_v21 = vadd.f32 %v208_v17, %v45_v10 }
  0xb8   :  { %v296_v22 = vadd.f32 %v556_v27, %v276_v18  ;;  %v280_v23 = vld [vmem:[#allocation2 + $0x68] sm:$0xff]  ;;  %258 = vst.msk [vmem:[#allocation2 + $0x50] sm:$0xff] %vm21_vm0, %v241_v14 }
  0xb9   :  { %v300_v25 = vadd.f32 %v556_v27, %v280_v23  ;;  %v269_v26 = vld [vmem:[#allocation2 + $0x10] sm:$0xff]  ;;  %262 = vst.msk [vmem:[#allocation2 + $0x70] sm:$0xff] %vm21_vm0, %v245_v15 }
  0xba   :  { %v328_v29 = vadd.f32 %v312_v19, %v296_v22  ;;  %v289_v30 = vadd.f32 %v556_v27, %v269_v26  ;;  %v273_v31 = vld [vmem:[#allocation2 + $0x30] sm:$0xff]  ;;  %251 = vst.msk [vmem:[#allocation2 + $0x18] sm:$0xff] %vm21_vm0, %v234_v20 }
  0xbb   :  { %v332_v33 = vadd.f32 %v316_v24, %v300_v25  ;;  %v293_v34 = vadd.f32 %v556_v27, %v273_v31  ;;  %255 = vst.msk [vmem:[#allocation2 + $0x38] sm:$0xff] %vm21_vm0, %v238_v21 }
  0xbc   :  { %344 = vst.msk [vmem:[%s704_s4 + $0x48] sm:$0xff] %vm21_vm0, %v328_v29  ;;  %v321_v37 = vadd.f32 %v305_v28, %v289_v30 }
  0xbd   :  { %348 = vst.msk [vmem:[%s704_s4 + $0x68] sm:$0xff] %vm21_vm0, %v332_v33  ;;  %v325_v38 = vadd.f32 %v309_v32, %v293_v34  ;;  %v218_v39 = vpop.f32.mrf.mxu2  ;;  %v228_v40 = vpop.f32.mrf.mxu3 }
  0xbe   :  { %337 = vst.msk [vmem:[%s704_s4 + $0x10] sm:$0xff] %vm21_vm0, %v321_v37  ;;  %v242_v41 = vadd.f32 %v218_v39, %v49_v35  ;;  %v246_v42 = vadd.f32 %v228_v40, %v53_v36 }
  0xbf   :  { %341 = vst.msk [vmem:[%s704_s4 + $0x30] sm:$0xff] %vm21_vm0, %v325_v38  ;;  %v277_v43 = vld [vmem:[#allocation2 + $0x50] sm:$0xff] }
  0xc0   :  { %v297_v45 = vadd.f32 %v556_v27, %v277_v43  ;;  %v281_v46 = vld [vmem:[#allocation2 + $0x70] sm:$0xff]  ;;  %259 = vst.msk [vmem:[#allocation2 + $0x58] sm:$0xff] %vm21_vm0, %v242_v41 }
  0xc1   :  { %v301_v48 = vadd.f32 %v556_v27, %v281_v46  ;;  %v270_v49 = vld [vmem:[#allocation2 + $0x18] sm:$0xff]  ;;  %263 = vst.msk [vmem:[#allocation2 + $0x78] sm:$0xff] %vm21_vm0, %v246_v42 }
  0xc2   :  { %v329_v51 = vadd.f32 %v313_v44, %v297_v45  ;;  %v290_v52 = vadd.f32 %v556_v27, %v270_v49  ;;  %v274_v53 = vld [vmem:[#allocation2 + $0x38] sm:$0xff] }
  0xc3   :  { %v333_v55 = vadd.f32 %v317_v47, %v301_v48  ;;  %v294_v56 = vadd.f32 %v556_v27, %v274_v53 }
  0xc4   :  { %345 = vst.msk [vmem:[%s704_s4 + $0x50] sm:$0xff] %vm21_vm0, %v329_v51  ;;  %v322_v57 = vadd.f32 %v306_v50, %v290_v52 }
  0xc5   :  { %349 = vst.msk [vmem:[%s704_s4 + $0x70] sm:$0xff] %vm21_vm0, %v333_v55  ;;  %v326_v58 = vadd.f32 %v310_v54, %v294_v56 }
  0xc6   :  { %338 = vst.msk [vmem:[%s704_s4 + $0x18] sm:$0xff] %vm21_vm0, %v322_v57 }
  0xc7   :  { %342 = vst.msk [vmem:[%s704_s4 + $0x38] sm:$0xff] %vm21_vm0, %v326_v58  ;;  %v278_v59 = vld [vmem:[#allocation2 + $0x58] sm:$0xff] }
  0xc8   :  { %v298_v61 = vadd.f32 %v556_v27, %v278_v59  ;;  %v282_v62 = vld [vmem:[#allocation2 + $0x78] sm:$0xff] }
  0xc9   :  { %v302_v0 = vadd.f32 %v556_v27, %v282_v62 }
  0xca   :  { %v330_v1 = vadd.f32 %v314_v60, %v298_v61 }
  0xcb   :  { %v334_v2 = vadd.f32 %v318_v63, %v302_v0 }
  0xcc   :  { %346 = vst.msk [vmem:[%s704_s4 + $0x58] sm:$0xff] %vm21_vm0, %v330_v1 }
  0xcd   :  { %350 = vst.msk [vmem:[%s704_s4 + $0x78] sm:$0xff] %vm21_vm0, %v334_v2 }

// kernel: transformer_block_forward.14
= control target key start
LH: loop header
LB: loop body
LE: loop exit
PB: predicated region body
PF: predicated region fallthrough
CT: control target
= control target key end

     0   :  { %s1757_s18 = smov 0   ;;  %s1759_s19 = smov 0   ;;  %s2538_s0 = inlined_call_operand.vmem [shape: bf16[2,8,8,128], index: 0, kind: input, shape index: {}, may-alias: {0,1,2}]   ;;  %s2539_s1 = inlined_call_operand.vmem [shape: bf16[2,8,8,128], index: 1, kind: input, shape index: {}, may-alias: {0,1,2}]   ;;  %s2540_s2 = inlined_call_operand.vmem [shape: bf16[2,8,8,128], index: 2, kind: input, shape index: {}, may-alias: {0,1,2}]   ;;  %s2541_s3 = inlined_call_operand.vmem [shape: f32[9,128], index: 3, kind: input, shape index: {}]   ;;  %s2542_s4 = inlined_call_operand.vmem [shape: f32[1,128], index: 4, kind: input, shape index: {}]   ;;  %s2543_s5 = inlined_call_operand.vmem [shape: bf16[2,8,8,128], index: 5, kind: output, shape index: {}]  }
   0x1   :  { %s1761_s20 = smov 0  }
   0x2 LB: > { %s34_s1 = sadd.s32 1, %s1720_s19  ;;  %p1593_p0 = scmp.ge.s32.totalorder %s1724_s20, 1  ;;  %s1724_s20 = sphi %s1761_s20, %s15_s20   ;;  %s1720_s19 = sphi %s1759_s19, %s2594_s19   ;;  %s1716_s18 = sphi %s1757_s18, %s2593_s18  }
   0x3   : > { %p36_p1 = scmp.ge.s32.totalorder %s34_s1, 2  ;;  %p311_p2 = scmp.lt.s32.totalorder %s1724_s20, 3 }
   0x5   : > { %s2596_s1 = smov (%p36_p1, %s34_s1), 0  ;;  %p312_p3 = pnand %p1593_p0, %p311_p2 }
   0x7   : > { %315 = sbr.rel (%p312_p3) target bundleno = 212 (0xd4), region = 40 }
   0xc   : > { %p391_p4 = scmp.lt.s32.totalorder %s1716_s18, 1  ;;  %v1726_v0 = vmov 0.0   ;;  %v1786_v2 = vld [vmem:[%s2541_s3] sm:$0xff]  ;;  %vm521_vm0 = vcmask 1040384   ;;  %vm594_vm1 = vcmask 1046528   ;;  %vm668_vm2 = vcmask 1045504  }
   0xd   : > { %v501_v1 = vrot.slane %v1726_v0, 7  ;;  %2556 = vst [vmem:[#allocation2_spill] sm:$0xff] %v1786_v2  ;;  %v1789_v6 = vperm.slane %v1786_v2, 1  ;;  %v1795_v10 = vperm.slane %v1786_v2, 2  ;;  %v1801_v14 = vperm.slane %v1786_v2, 0 }
   0xe   : > { %s2598_s18 = smov (!%p391_p4, %s1716_s18), 1  ;;  %v1822_v30 = vperm.slane %v1786_v2, 3  ;;  %v1826_v34 = vperm.slane %v1786_v2, 4 }
   0xf   : > { %s1612_s2 = sshll.u32 %s2598_s18, 5  ;;  %v1792_v9 = vsel %vm521_vm0, 0.0, %v501_v1  ;;  %v1798_v13 = vsel %vm521_vm0, %v501_v1, 0.0 }
  0x10   : > { %s401_s23 = scalar_lea.vmem %s2538_s0, %s1612_s2  ;;  %2557 = vst [vmem:[#allocation3_spill] sm:$0xff] %v1792_v9  ;;  %v1805_v19 = vmul.f32 %v1789_v6, %v1792_v9  ;;  %v563_v22 = vmul.f32 %v1789_v6, %v1798_v13  ;;  %v1811_v23 = vmul.f32 %v1795_v10, %v1792_v9  ;;  %v1815_v26 = vmul.f32 %v1801_v14, %v1792_v9  ;;  %s2499_s7 = scalar_lea.vmem %s2543_s5, %s1612_s2 }
  0x11   : > { %v1618_v3 = vld [vmem:[%s401_s23] sm:$0xff]   ;;  %v1653_v4 = vld [vmem:[%s401_s23 + $0x8] sm:$0xff]   ;;  %v1654_v5 = vld [vmem:[%s401_s23 + $0x10] sm:$0xff]   ;;  %2558 = vst [vmem:[#allocation4_spill] sm:$0xff] %v1798_v13  ;;  %v1819_v29 = vmul.f32 %v1795_v10, %v1798_v13 }
  0x12   : > { %v1619_v7 = vunpack.c.l.bf16 %v1618_v3  ;;  %v1655_v8 = vld [vmem:[%s401_s23 + $0x18] sm:$0xff]   ;;  %v1620_v11 = vunpack.c.h.bf16 %v1618_v3  ;;  %v1623_v12 = vunpack.c.l.bf16 %v1653_v4  ;;  %v1624_v15 = vunpack.c.h.bf16 %v1653_v4 }
  0x13   : > { %v1627_v16 = vunpack.c.l.bf16 %v1654_v5  ;;  %v1628_v17 = vunpack.c.h.bf16 %v1654_v5  ;;  %v1631_v18 = vunpack.c.l.bf16 %v1655_v8  ;;  %v1632_v20 = vunpack.c.h.bf16 %v1655_v8 }
  0x14   : > { %v502_v21 = vrot.slane %v1619_v7, 7  ;;  %v503_v24 = vrot.slane %v1620_v11, 7  ;;  %v504_v25 = vrot.slane %v1623_v12, 7  ;;  %v505_v27 = vrot.slane %v1624_v15, 7 }
  0x15   : > { %v506_v28 = vrot.slane %v1627_v16, 7  ;;  %v507_v31 = vrot.slane %v1628_v17, 7  ;;  %v508_v32 = vrot.slane %v1631_v18, 7  ;;  %v595_v33 = vrot.slane %v1805_v19, 1 }
  0x16   : > { %v1828_v35 = vrot.slane %v1632_v20, 7  ;;  %v1831_v36 = vsel %vm521_vm0, 0.0, %v502_v21  ;;  %v596_v37 = vrot.slane %v563_v22, 1  ;;  %v1835_v39 = vsel %vm521_vm0, 0.0, %v503_v24 }
  0x17   : > { %v1838_v40 = vsel %vm521_vm0, 0.0, %v504_v25  ;;  %v1841_v41 = vsel %vm521_vm0, %v502_v21, 0.0  ;;  %v1844_v42 = vsel %vm521_vm0, %v503_v24, 0.0  ;;  %v1847_v43 = vsel %vm521_vm0, 0.0, %v505_v27 }
  0x18   : > { %v1850_v44 = vsel %vm521_vm0, 0.0, %v506_v28  ;;  %v1853_v45 = vsel %vm521_vm0, %v504_v25, 0.0  ;;  %v1856_v46 = vsel %vm521_vm0, %v505_v27, 0.0  ;;  %v1859_v47 = vsel %vm521_vm0, 0.0, %v507_v31 }
  0x19   : > { %v1862_v48 = vsel %vm521_vm0, 0.0, %v508_v32  ;;  %v1865_v49 = vsel %vm521_vm0, %v506_v28, 0.0  ;;  %v1868_v50 = vsel %vm521_vm0, %v507_v31, 0.0  ;;  %v564_v51 = vmul.f32 %v1789_v6, %v1831_v36 }
  0x1a   : > { %2559 = vst [vmem:[#allocation5_spill] sm:$0xff] %v1865_v49  ;;  %v565_v52 = vmul.f32 %v1789_v6, %v1841_v41  ;;  %v566_v53 = vmul.f32 %v1789_v6, %v1835_v39  ;;  %v567_v54 = vmul.f32 %v1789_v6, %v1844_v42  ;;  %v568_v55 = vmul.f32 %v1789_v6, %v1838_v40 }
  0x1b   : > { %2560 = vst [vmem:[#allocation6_spill] sm:$0xff] %v1868_v50  ;;  %v569_v56 = vmul.f32 %v1789_v6, %v1853_v45  ;;  %v570_v57 = vmul.f32 %v1789_v6, %v1847_v43  ;;  %v571_v58 = vmul.f32 %v1789_v6, %v1856_v46  ;;  %v1888_v59 = vsel %vm521_vm0, 0.0, %v1828_v35 }
  0x1c   : > { %v1891_v60 = vsel %vm521_vm0, %v508_v32, 0.0  ;;  %v572_v61 = vmul.f32 %v1789_v6, %v1850_v44  ;;  %v573_v62 = vmul.f32 %v1789_v6, %v1865_v49  ;;  %v546_v63 = vmul.f32 %v1801_v14, %v1831_v36 }
  0x1d   : > { %2561 = vst [vmem:[#allocation7_spill] sm:$0xff] %v1891_v60  ;;  %v1901_v0 = vmul.f32 %v1801_v14, %v1835_v39  ;;  %v574_v1 = vmul.f32 %v1789_v6, %v1859_v47  ;;  %v575_v3 = vmul.f32 %v1789_v6, %v1868_v50  ;;  %v598_v4 = vrot.slane %v564_v51, 1 }
  0x1e   : > { %v599_v5 = vrot.slane %v565_v52, 1  ;;  %v601_v7 = vrot.slane %v566_v53, 1  ;;  %v602_v8 = vrot.slane %v567_v54, 1  ;;  %v604_v11 = vrot.slane %v568_v55, 1 }
  0x1f   : > { %v605_v12 = vrot.slane %v569_v56, 1  ;;  %v607_v15 = vrot.slane %v570_v57, 1  ;;  %v608_v16 = vrot.slane %v571_v58, 1  ;;  %v576_v17 = vmul.f32 %v1789_v6, %v1862_v48 }
  0x20   : > { %v577_v18 = vmul.f32 %v1789_v6, %v1891_v60  ;;  %v610_v19 = vrot.slane %v572_v61, 1  ;;  %v611_v20 = vrot.slane %v573_v62, 1  ;;  %v548_v21 = vmul.f32 %v1801_v14, %v1838_v40 }
  0x21   : > { %v597_v22 = vsel %vm594_vm1, %v595_v33, %v596_v37  ;;  %v613_v24 = vrot.slane %v574_v1, 1  ;;  %v614_v25 = vrot.slane %v575_v3, 1  ;;  %v549_v27 = vmul.f32 %v1801_v14, %v1847_v43 }
  0x22   : > { %v550_v28 = vmul.f32 %v1801_v14, %v1850_v44  ;;  %v551_v31 = vmul.f32 %v1801_v14, %v1859_v47  ;;  %v600_v6 = vsel %vm594_vm1, %v598_v4, %v599_v5  ;;  %v552_v32 = vmul.f32 %v1801_v14, %v1862_v48 }
  0x23   : > { %v603_v51 = vsel %vm594_vm1, %v601_v7, %v602_v8  ;;  %v606_v33 = vsel %vm594_vm1, %v604_v11, %v605_v12  ;;  %v609_v37 = vsel %vm594_vm1, %v607_v15, %v608_v16  ;;  %v612_v52 = vsel %vm594_vm1, %v610_v19, %v611_v20 }
  0x24   : > { %v616_v53 = vrot.slane %v576_v17, 1  ;;  %v617_v54 = vrot.slane %v577_v18, 1  ;;  %v627_v55 = vadd.f32 %v597_v22, %v1815_v26  ;;  %v615_v56 = vsel %vm594_vm1, %v613_v24, %v614_v25 }
  0x25   : > { %v628_v57 = vadd.f32 %v600_v6, %v546_v63  ;;  %v638_v58 = vmul.f32 %v1795_v10, %v1831_v36  ;;  %v639_v14 = vmul.f32 %v1795_v10, %v1841_v41  ;;  %v640_v61 = vmul.f32 %v1795_v10, %v1835_v39 }
  0x26   : > { %v641_v62 = vmul.f32 %v1795_v10, %v1844_v42  ;;  %v642_v1 = vmul.f32 %v1795_v10, %v1838_v40  ;;  %v643_v26 = vmul.f32 %v1795_v10, %v1853_v45  ;;  %v644_v63 = vmul.f32 %v1795_v10, %v1847_v43 }
  0x27   : > { %v645_v3 = vmul.f32 %v1795_v10, %v1856_v46  ;;  %v646_v4 = vmul.f32 %v1795_v10, %v1850_v44  ;;  %v647_v5 = vmul.f32 %v1795_v10, %v1865_v49  ;;  %v648_v7 = vmul.f32 %v1795_v10, %v1859_v47 }
  0x28   : > { %v649_v8 = vmul.f32 %v1795_v10, %v1868_v50  ;;  %v650_v11 = vmul.f32 %v1795_v10, %v1862_v48  ;;  %v651_v12 = vmul.f32 %v1795_v10, %v1891_v60  ;;  %v618_v15 = vsel %vm594_vm1, %v616_v53, %v617_v54 }
  0x29   : > { %v670_v16 = vrot.slane %v1819_v29, 2  ;;  %v672_v17 = vrot.slane %v638_v58, 2  ;;  %v673_v18 = vrot.slane %v639_v14, 2  ;;  %v675_v19 = vrot.slane %v640_v61, 2 }
  0x2a   : > { %v676_v20 = vrot.slane %v641_v62, 2  ;;  %v678_v22 = vrot.slane %v642_v1, 2  ;;  %v679_v24 = vrot.slane %v643_v26, 2  ;;  %v681_v25 = vrot.slane %v644_v63, 2 }
  0x2b   : > { %v682_v6 = vrot.slane %v645_v3, 2  ;;  %v684_v38 = vrot.slane %v646_v4, 2  ;;  %v685_v13 = vrot.slane %v647_v5, 2  ;;  %v687_v9 = vrot.slane %v648_v7, 2 }
  0x2c   : > { %v688_v2 = vrot.slane %v649_v8, 2  ;;  %v690_v50 = vrot.slane %v650_v11, 2  ;;  %v691_v49 = vrot.slane %v651_v12, 2  ;;  %v629_v10 = vadd.f32 %v603_v51, %v1901_v0 }
  0x2d   : > { %v630_v60 = vadd.f32 %v606_v33, %v548_v21  ;;  %v631_v53 = vadd.f32 %v609_v37, %v549_v27  ;;  %v2562_v29 = vrot.slane %v1811_v23, 2  ;;  %v632_v58 = vadd.f32 %v612_v52, %v550_v28 }
  0x2e   : > { %v674_v14 = vsel %vm668_vm2, %v672_v17, %v673_v18  ;;  %v677_v61 = vsel %vm668_vm2, %v675_v19, %v676_v20  ;;  %v680_v62 = vsel %vm668_vm2, %v678_v22, %v679_v24  ;;  %v633_v1 = vadd.f32 %v615_v56, %v551_v31  ;;  %v2563_v17 = vld [vmem:[#allocation5_spill] sm:$0xff]  ;;  %v2564_v20 = vld [vmem:[#allocation6_spill] sm:$0xff] }
  0x2f   : > { %v671_v54 = vsel %vm668_vm2, %v2562_v29, %v670_v16  ;;  %v634_v26 = vadd.f32 %v618_v15, %v552_v32  ;;  %v683_v63 = vsel %vm668_vm2, %v681_v25, %v682_v6  ;;  %v686_v3 = vsel %vm668_vm2, %v684_v38, %v685_v13 }
  0x30   : > { %v1970_v0 = vsel %vm521_vm0, %v1828_v35, 0.0  ;;  %v689_v23 = vsel %vm668_vm2, %v687_v9, %v688_v2  ;;  %v692_v21 = vsel %vm668_vm2, %v690_v50, %v691_v49  ;;  %v701_v27 = vadd.f32 %v671_v54, %v627_v55 }
  0x31   : > { %v702_v28 = vadd.f32 %v674_v14, %v628_v57  ;;  %v703_v51 = vadd.f32 %v677_v61, %v629_v10  ;;  %v704_v33 = vadd.f32 %v680_v62, %v630_v60  ;;  %v710_v31 = vmul.f32 %v1822_v30, %v1831_v36  ;;  %v2565_v10 = vld [vmem:[#allocation7_spill] sm:$0xff] }
  0x32   : > { %v705_v32 = vadd.f32 %v683_v63, %v631_v53  ;;  %v706_v37 = vadd.f32 %v686_v3, %v632_v58  ;;  %v711_v13 = vmul.f32 %v1822_v30, %v1835_v39  ;;  %v712_v35 = vmul.f32 %v1822_v30, %v1838_v40 }
  0x33   : > { %v707_v38 = vadd.f32 %v689_v23, %v633_v1  ;;  %v708_v52 = vadd.f32 %v692_v21, %v634_v26  ;;  %v713_v2 = vmul.f32 %v1822_v30, %v1847_v43  ;;  %v714_v9 = vmul.f32 %v1822_v30, %v1850_v44 }
  0x34   : > { %v715_v49 = vmul.f32 %v1822_v30, %v1859_v47  ;;  %v716_v50 = vmul.f32 %v1822_v30, %v1862_v48  ;;  %v727_v60 = vmul.f32 %v1826_v34, %v1831_v36  ;;  %v728_v55 = vmul.f32 %v1826_v34, %v1841_v41 }
  0x35   : > { %v717_v56 = vmul.f32 %v1822_v30, %v1888_v59  ;;  %v718_v57 = vadd.f32 %v710_v31, %v701_v27  ;;  %v729_v4 = vmul.f32 %v1826_v34, %v1835_v39  ;;  %v730_v5 = vmul.f32 %v1826_v34, %v1844_v42 }
  0x36   : > { %v719_v7 = vadd.f32 %v711_v13, %v702_v28  ;;  %v720_v8 = vadd.f32 %v712_v35, %v703_v51  ;;  %v731_v11 = vmul.f32 %v1826_v34, %v1838_v40  ;;  %v732_v12 = vmul.f32 %v1826_v34, %v1853_v45  ;;  %v2566_v13 = vld [vmem:[#allocation2_spill] sm:$0xff] }
  0x37   : > { %v733_v15 = vmul.f32 %v1826_v34, %v1847_v43  ;;  %v734_v30 = vmul.f32 %v1826_v34, %v1856_v46  ;;  %v735_v16 = vmul.f32 %v1826_v34, %v1850_v44  ;;  %v736_v18 = vmul.f32 %v1826_v34, %v2563_v17 }
  0x38   : > { %v737_v19 = vmul.f32 %v1826_v34, %v1859_v47  ;;  %v738_v22 = vmul.f32 %v1826_v34, %v2564_v20  ;;  %v759_v24 = vrot.slane %v727_v60, 1  ;;  %v760_v25 = vrot.slane %v728_v55, 1 }
  0x39   : > { %v739_v6 = vmul.f32 %v1826_v34, %v1862_v48  ;;  %v740_v53 = vmul.f32 %v1826_v34, %v2565_v10  ;;  %v762_v29 = vrot.slane %v729_v4, 1  ;;  %v763_v54 = vrot.slane %v730_v5, 1 }
  0x3a   : > { %v721_v58 = vadd.f32 %v713_v2, %v704_v33  ;;  %v741_v14 = vmul.f32 %v1826_v34, %v1888_v59  ;;  %v765_v61 = vrot.slane %v731_v11, 1  ;;  %v766_v62 = vrot.slane %v732_v12, 1 }
  0x3b   : > { %v768_v1 = vrot.slane %v733_v15, 1  ;;  %v769_v26 = vrot.slane %v734_v30, 1  ;;  %v771_v63 = vrot.slane %v735_v16, 1  ;;  %v772_v3 = vrot.slane %v736_v18, 1 }
  0x3c   : > { %v742_v23 = vmul.f32 %v1826_v34, %v1970_v0  ;;  %v761_v21 = vsel %vm594_vm1, %v759_v24, %v760_v25  ;;  %v774_v27 = vrot.slane %v737_v19, 1  ;;  %v775_v28 = vrot.slane %v738_v22, 1 }
  0x3d   : > { %v764_v51 = vsel %vm594_vm1, %v762_v29, %v763_v54  ;;  %v777_v31 = vrot.slane %v739_v6, 1  ;;  %v778_v33 = vrot.slane %v740_v53, 1  ;;  %v799_v35 = vperm.slane %v2566_v13, 5 }
  0x3e   : > { %v722_v2 = vadd.f32 %v714_v9, %v705_v32  ;;  %v723_v60 = vadd.f32 %v715_v49, %v706_v37  ;;  %v724_v55 = vadd.f32 %v716_v50, %v707_v38  ;;  %v767_v4 = vsel %vm594_vm1, %v765_v61, %v766_v62 }
  0x3f   : > { %v725_v5 = vadd.f32 %v717_v56, %v708_v52  ;;  %v770_v11 = vsel %vm594_vm1, %v768_v1, %v769_v26  ;;  %v773_v34 = vsel %vm594_vm1, %v771_v63, %v772_v3  ;;  %v780_v12 = vrot.slane %v741_v14, 1 }
  0x40   : > { %v776_v15 = vsel %vm594_vm1, %v774_v27, %v775_v28  ;;  %v781_v30 = vrot.slane %v742_v23, 1  ;;  %v791_v16 = vadd.f32 %v761_v21, %v718_v57  ;;  %v792_v18 = vadd.f32 %v764_v51, %v719_v7 }
  0x41   : > { %v779_v19 = vsel %vm594_vm1, %v777_v31, %v778_v33  ;;  %v793_v22 = vadd.f32 %v767_v4, %v720_v8  ;;  %v800_v32 = vmul.f32 %v799_v35, %v1831_v36  ;;  %v801_v37 = vmul.f32 %v799_v35, %v1841_v41 }
  0x42   : > { %v802_v38 = vmul.f32 %v799_v35, %v1835_v39  ;;  %v803_v52 = vmul.f32 %v799_v35, %v1844_v42  ;;  %v804_v9 = vmul.f32 %v799_v35, %v1838_v40  ;;  %v805_v49 = vmul.f32 %v799_v35, %v1853_v45 }
  0x43   : > { %v806_v50 = vmul.f32 %v799_v35, %v1847_v43  ;;  %v807_v56 = vmul.f32 %v799_v35, %v1856_v46  ;;  %v808_v57 = vmul.f32 %v799_v35, %v1850_v44  ;;  %v809_v7 = vmul.f32 %v799_v35, %v2563_v17 }
  0x44   : > { %v810_v36 = vmul.f32 %v799_v35, %v1859_v47  ;;  %v811_v41 = vmul.f32 %v799_v35, %v2564_v20  ;;  %v812_v8 = vmul.f32 %v799_v35, %v1862_v48  ;;  %v813_v24 = vmul.f32 %v799_v35, %v2565_v10 }
  0x45   : > { %v814_v25 = vmul.f32 %v799_v35, %v1888_v59  ;;  %v815_v6 = vmul.f32 %v799_v35, %v1970_v0  ;;  %v832_v53 = vrot.slane %v800_v32, 2  ;;  %v833_v29 = vrot.slane %v801_v37, 2  ;;  %v2050_v35 = vld [vmem:[%s2541_s3 + $0x8] ss:$0 sm:$0xff] }
  0x46   : > { %v835_v54 = vrot.slane %v802_v38, 2  ;;  %v836_v14 = vrot.slane %v803_v52, 2  ;;  %v838_v61 = vrot.slane %v804_v9, 2  ;;  %v839_v62 = vrot.slane %v805_v49, 2 }
  0x47   : > { %v841_v1 = vrot.slane %v806_v50, 2  ;;  %v842_v26 = vrot.slane %v807_v56, 2  ;;  %v844_v63 = vrot.slane %v808_v57, 2  ;;  %v845_v3 = vrot.slane %v809_v7, 2 }
  0x48   : > { %v847_v23 = vrot.slane %v810_v36, 2  ;;  %v848_v21 = vrot.slane %v811_v41, 2  ;;  %v850_v27 = vrot.slane %v812_v8, 2  ;;  %v851_v28 = vrot.slane %v813_v24, 2 }
  0x49   : > { %v782_v51 = vsel %vm594_vm1, %v780_v12, %v781_v30  ;;  %v794_v31 = vadd.f32 %v770_v11, %v721_v58  ;;  %v795_v33 = vadd.f32 %v773_v34, %v722_v2  ;;  %v796_v4 = vadd.f32 %v776_v15, %v723_v60 }
  0x4a   : > { %v797_v32 = vadd.f32 %v779_v19, %v724_v55  ;;  %v834_v37 = vsel %vm668_vm2, %v832_v53, %v833_v29  ;;  %v853_v38 = vrot.slane %v814_v25, 2  ;;  %v854_v52 = vrot.slane %v815_v6, 2 }
  0x4b   : > { %v837_v9 = vsel %vm668_vm2, %v835_v54, %v836_v14  ;;  %v840_v49 = vsel %vm668_vm2, %v838_v61, %v839_v62  ;;  %v843_v50 = vsel %vm668_vm2, %v841_v1, %v842_v26  ;;  %v872_v58 = vperm.slane %v2566_v13, 6  ;;  %v2567_v54 = vld [vmem:[#allocation3_spill] sm:$0xff] }
  0x4c   : > { %v846_v2 = vsel %vm668_vm2, %v844_v63, %v845_v3  ;;  %v849_v60 = vsel %vm668_vm2, %v847_v23, %v848_v21  ;;  %v852_v11 = vsel %vm668_vm2, %v850_v27, %v851_v28  ;;  %v2061_v55 = vperm.slane %v2566_v13, 7 }
  0x4d   : > { %v798_v34 = vadd.f32 %v782_v51, %v725_v5  ;;  %v864_v12 = vadd.f32 %v834_v37, %v791_v16  ;;  %v2065_v15 = vmul.f32 %v2050_v35, %v1835_v39  ;;  %v855_v30 = vsel %vm668_vm2, %v853_v38, %v854_v52 }
  0x4e   : > { %v865_v19 = vadd.f32 %v837_v9, %v792_v18  ;;  %v866_v56 = vadd.f32 %v840_v49, %v793_v22  ;;  %v867_v57 = vadd.f32 %v843_v50, %v794_v31  ;;  %v868_v7 = vadd.f32 %v846_v2, %v795_v33 }
  0x4f   : > { %v869_v36 = vadd.f32 %v849_v60, %v796_v4  ;;  %v2068_v41 = vadd.f32 %v852_v11, %v797_v32  ;;  %v873_v8 = vmul.f32 %v872_v58, %v1835_v39  ;;  %v890_v13 = vmul.f32 %v2061_v55, %v1835_v39 }
  0x50   : > { %v891_v5 = vmul.f32 %v2061_v55, %v1844_v42  ;;  %v892_v16 = vmul.f32 %v2061_v55, %v1838_v40  ;;  %v893_v18 = vmul.f32 %v2061_v55, %v1853_v45  ;;  %v871_v22 = vadd.f32 %v855_v30, %v798_v34 }
  0x51   : > { %v874_v24 = vmul.f32 %v872_v58, %v1838_v40  ;;  %v875_v25 = vmul.f32 %v872_v58, %v1847_v43  ;;  %v876_v6 = vmul.f32 %v872_v58, %v1850_v44  ;;  %v877_v53 = vmul.f32 %v872_v58, %v1859_v47 }
  0x52   : > { %v878_v39 = vmul.f32 %v872_v58, %v1862_v48  ;;  %v879_v29 = vmul.f32 %v872_v58, %v1888_v59  ;;  %v880_v14 = vmul.f32 %v872_v58, %v2567_v54  ;;  %v894_v61 = vmul.f32 %v2061_v55, %v1847_v43 }
  0x53   : > { %v895_v62 = vmul.f32 %v2061_v55, %v1856_v46  ;;  %v896_v1 = vmul.f32 %v2061_v55, %v1850_v44  ;;  %v897_v26 = vmul.f32 %v2061_v55, %v2563_v17  ;;  %v922_v63 = vrot.slane %v890_v13, 1 }
  0x54   : > { %v923_v3 = vrot.slane %v891_v5, 1  ;;  %v925_v23 = vrot.slane %v892_v16, 1  ;;  %v926_v21 = vrot.slane %v893_v18, 1  ;;  %v881_v27 = vadd.f32 %v873_v8, %v864_v12 }
  0x55   : > { %v882_v28 = vadd.f32 %v874_v24, %v865_v19  ;;  %v883_v51 = vadd.f32 %v875_v25, %v866_v56  ;;  %v884_v31 = vadd.f32 %v876_v6, %v867_v57  ;;  %v2094_v33 = vadd.f32 %v877_v53, %v868_v7 }
  0x56   : > { %v2096_v4 = vadd.f32 %v878_v39, %v869_v36  ;;  %v898_v32 = vmul.f32 %v2061_v55, %v1859_v47  ;;  %v899_v37 = vmul.f32 %v2061_v55, %v2564_v20  ;;  %v2104_v38 = vmul.f32 %v2061_v55, %v1862_v48 }
  0x57   : > { %v901_v52 = vmul.f32 %v2061_v55, %v2565_v10  ;;  %v928_v9 = vrot.slane %v894_v61, 1  ;;  %v929_v49 = vrot.slane %v895_v62, 1  ;;  %v924_v50 = vsel %vm594_vm1, %v922_v63, %v923_v3  ;;  %v2141_v3 = vld [vmem:[%s2542_s4] ss:$0 sm:$0xff] }
  0x58   : > { %v927_v58 = vsel %vm594_vm1, %v925_v23, %v926_v21  ;;  %v931_v2 = vrot.slane %v896_v1, 1  ;;  %v932_v60 = vrot.slane %v897_v26, 1  ;;  %v964_v11 = vmul.f32 %v2050_v35, %v1844_v42  ;;  %v2568_v23 = vld [vmem:[#allocation4_spill] sm:$0xff] }
  0x59   : > { %v965_v34 = vmul.f32 %v2050_v35, %v1838_v40  ;;  %v966_v12 = vmul.f32 %v2050_v35, %v1853_v45  ;;  %v967_v30 = vmul.f32 %v2050_v35, %v1847_v43  ;;  %v902_v19 = vmul.f32 %v2061_v55, %v1888_v59 }
  0x5a   : > { %v968_v56 = vmul.f32 %v2050_v35, %v1856_v46  ;;  %v969_v57 = vmul.f32 %v2050_v35, %v1850_v44  ;;  %v970_v42 = vmul.f32 %v2050_v35, %v2563_v17  ;;  %v903_v40 = vmul.f32 %v2061_v55, %v1970_v0 }
  0x5b   : > { %v930_v45 = vsel %vm594_vm1, %v928_v9, %v929_v49  ;;  %v934_v7 = vrot.slane %v898_v32, 1  ;;  %v935_v36 = vrot.slane %v899_v37, 1  ;;  %v933_v43 = vsel %vm594_vm1, %v931_v2, %v932_v60 }
  0x5c   : > { %v954_v8 = vadd.f32 %v924_v50, %v881_v27  ;;  %v955_v13 = vadd.f32 %v927_v58, %v882_v28  ;;  %v995_v5 = vrot.slane %v2065_v15, 2  ;;  %v996_v46 = vrot.slane %v964_v11, 2 }
  0x5d   : > { %v998_v16 = vrot.slane %v965_v34, 2  ;;  %v999_v18 = vrot.slane %v966_v12, 2  ;;  %v1001_v44 = vrot.slane %v967_v30, 2  ;;  %v956_v24 = vadd.f32 %v930_v45, %v883_v51 }
  0x5e   : > { %v1002_v25 = vrot.slane %v968_v56, 2  ;;  %v1004_v17 = vrot.slane %v969_v57, 2  ;;  %v1005_v6 = vrot.slane %v970_v42, 2  ;;  %v904_v53 = vmul.f32 %v2061_v55, %v2567_v54 }
  0x5f   : > { %v957_v39 = vadd.f32 %v933_v43, %v884_v31  ;;  %v997_v61 = vsel %vm668_vm2, %v995_v5, %v996_v46  ;;  %v1000_v62 = vsel %vm668_vm2, %v998_v16, %v999_v18  ;;  %v887_v1 = vadd.f32 %v879_v29, %v2068_v41 }
  0x60   : > { %v888_v26 = vadd.f32 %v880_v14, %v871_v22  ;;  %v1003_v15 = vsel %vm668_vm2, %v1001_v44, %v1002_v25  ;;  %v1006_v63 = vsel %vm668_vm2, %v1004_v17, %v1005_v6  ;;  %v905_v21 = vmul.f32 %v2061_v55, %v2568_v23 }
  0x61   : > { %v936_v27 = vsel %vm594_vm1, %v934_v7, %v935_v36  ;;  %v937_v28 = vrot.slane %v2104_v38, 1  ;;  %v938_v51 = vrot.slane %v901_v52, 1  ;;  %v940_v31 = vrot.slane %v902_v19, 1 }
  0x62   : > { %v1027_v41 = vadd.f32 %v997_v61, %v954_v8  ;;  %v1028_v22 = vadd.f32 %v1000_v62, %v955_v13  ;;  %v1029_v29 = vadd.f32 %v1003_v15, %v956_v24  ;;  %v941_v14 = vrot.slane %v903_v40, 1 }
  0x63   : > { %v943_v32 = vrot.slane %v904_v53, 1  ;;  %v971_v37 = vmul.f32 %v2050_v35, %v1859_v47  ;;  %v1030_v9 = vadd.f32 %v1006_v63, %v957_v39  ;;  %v972_v49 = vmul.f32 %v2050_v35, %v2564_v20 }
  0x64   : > { %v973_v55 = vmul.f32 %v2050_v35, %v1862_v48  ;;  %v974_v38 = vmul.f32 %v2050_v35, %v2565_v10  ;;  %v2156_v52 = vadd.f32 %v2141_v3, %v1027_v41  ;;  %v944_v50 = vrot.slane %v905_v21, 1 }
  0x65   : > { %v2159_v58 = vadd.f32 %v2141_v3, %v1028_v22  ;;  %v2162_v2 = vadd.f32 %v2141_v3, %v1029_v29  ;;  %v2165_v47 = vadd.f32 %v2141_v3, %v1030_v9  ;;  %v939_v20 = vsel %vm594_vm1, %v937_v28, %v938_v51 }
  0x66   : > { %v975_v48 = vmul.f32 %v2050_v35, %v1888_v59  ;;  %v976_v10 = vmul.f32 %v2050_v35, %v1970_v0  ;;  %v977_v60 = vmul.f32 %v2050_v35, %v2567_v54  ;;  %v942_v11 = vsel %vm594_vm1, %v940_v31, %v941_v14 }
  0x67   : > { %v958_v34 = vadd.f32 %v936_v27, %v2094_v33  ;;  %v978_v12 = vmul.f32 %v2050_v35, %v2568_v23  ;;  %v1007_v30 = vrot.slane %v971_v37, 2  ;;  %v1008_v19 = vrot.slane %v972_v49, 2 }
  0x68   : > { %v1010_v56 = vrot.slane %v973_v55, 2  ;;  %v1011_v57 = vrot.slane %v974_v38, 2  ;;  %v2179_v42 = vmul.f32 0.70710677, %v2156_v52  ;;  %v945_v59 = vsel %vm594_vm1, %v943_v32, %v944_v50 }
  0x69   : > { %v2183_v0 = vmul.f32 0.70710677, %v2159_v58  ;;  %v2186_v54 = vmul.f32 0.70710677, %v2162_v2  ;;  %v2189_v33 = vmul.f32 0.70710677, %v2165_v47  ;;  %v959_v5 = vadd.f32 %v939_v20, %v2096_v4 }
  0x6a   : > { %v1013_v40 = vrot.slane %v975_v48, 2  ;;  %v1014_v35 = vrot.slane %v976_v10, 2  ;;  %v1016_v45 = vrot.slane %v977_v60, 2  ;;  %v1063_v7 = vmul.f32 %v2179_v42, %v2179_v42 }
  0x6b   : > { %v1017_v36 = vrot.slane %v978_v12, 2  ;;  %v1103_v43 = vmul.f32 %v2183_v0, %v2183_v0  ;;  %v1143_v8 = vmul.f32 %v2186_v54, %v2186_v54  ;;  %v1183_v13 = vmul.f32 %v2189_v33, %v2189_v33 }
  0x6c   : > { %v960_v46 = vadd.f32 %v942_v11, %v887_v1  ;;  %v2200_v16 = vadd.f32 %v945_v59, %v888_v26  ;;  %v2202_v18 = vmin.f32 %v1063_v7, 16.0  ;;  %v1009_v44 = vsel %vm668_vm2, %v1007_v30, %v1008_v19 }
  0x6d   : > { %v1012_v24 = vsel %vm668_vm2, %v1010_v56, %v1011_v57  ;;  %v2206_v25 = vmin.f32 %v1103_v43, 16.0  ;;  %v2208_v17 = vmin.f32 %v1143_v8, 16.0  ;;  %v1015_v6 = vsel %vm668_vm2, %v1013_v40, %v1014_v35 }
  0x6e   : > { %v1065_v53 = vmul.f32 2.1237322e-06, %v2202_v18  ;;  %v1076_v39 = vmul.f32 3.8918573e-05, %v2202_v18  ;;  %v2213_v4 = vmin.f32 %v1183_v13, 16.0  ;;  %v2216_v61 = vsel %vm668_vm2, %v1016_v45, %v1017_v36 }
  0x6f   : > { %v1105_v62 = vmul.f32 2.1237322e-06, %v2206_v25  ;;  %v1116_v1 = vmul.f32 3.8918573e-05, %v2206_v25  ;;  %v1145_v26 = vmul.f32 2.1237322e-06, %v2208_v17  ;;  %v1031_v15 = vadd.f32 %v1009_v44, %v958_v34 }
  0x70   : > { %v1066_v63 = vadd.f32 0.00028619796, %v1065_v53  ;;  %v1077_v23 = vadd.f32 0.001143296, %v1076_v39  ;;  %v1156_v21 = vmul.f32 3.8918573e-05, %v2208_v17  ;;  %v1032_v27 = vadd.f32 %v1012_v24, %v959_v5 }
  0x71   : > { %v1106_v28 = vadd.f32 0.00028619796, %v1105_v62  ;;  %v1117_v51 = vadd.f32 0.001143296, %v1116_v1  ;;  %v1146_v31 = vadd.f32 0.00028619796, %v1145_v26  ;;  %v2231_v48 = vadd.f32 %v2141_v3, %v1031_v15 }
  0x72   : > { %v1067_v41 = vmul.f32 %v1066_v63, %v2202_v18  ;;  %v1078_v22 = vmul.f32 %v1077_v23, %v2202_v18  ;;  %v1157_v29 = vadd.f32 0.001143296, %v1156_v21  ;;  %v1185_v14 = vmul.f32 2.1237322e-06, %v2213_v4 }
  0x73   : > { %v1107_v32 = vmul.f32 %v1106_v28, %v2206_v25  ;;  %v1118_v37 = vmul.f32 %v1117_v51, %v2206_v25  ;;  %v1147_v9 = vmul.f32 %v1146_v31, %v2208_v17  ;;  %v1196_v49 = vmul.f32 3.8918573e-05, %v2213_v4 }
  0x74   : > { %v1068_v55 = vadd.f32 0.0036580483, %v1067_v41  ;;  %v1079_v38 = vadd.f32 0.014752088, %v1078_v22  ;;  %v1158_v50 = vmul.f32 %v1157_v29, %v2208_v17  ;;  %v1186_v20 = vadd.f32 0.00028619796, %v1185_v14 }
  0x75   : > { %v1108_v10 = vadd.f32 0.0036580483, %v1107_v32  ;;  %v1119_v60 = vadd.f32 0.014752088, %v1118_v37  ;;  %v1148_v11 = vadd.f32 0.0036580483, %v1147_v9  ;;  %v1033_v62 = vadd.f32 %v1015_v6, %v960_v46 }
  0x76   : > { %v1069_v34 = vmul.f32 %v1068_v55, %v2202_v18  ;;  %v1080_v12 = vmul.f32 %v1079_v38, %v2202_v18  ;;  %v1159_v30 = vadd.f32 0.014752088, %v1158_v50  ;;  %v1187_v19 = vmul.f32 %v1186_v20, %v2213_v4 }
  0x77   : > { %v1109_v56 = vmul.f32 %v1108_v10, %v2206_v25  ;;  %v1120_v57 = vmul.f32 %v1119_v60, %v2206_v25  ;;  %v1149_v59 = vmul.f32 %v1148_v11, %v2208_v17  ;;  %v1197_v40 = vadd.f32 0.001143296, %v1196_v49 }
  0x78   : > { %v1070_v35 = vadd.f32 0.05243302, %v1069_v34  ;;  %v1081_v45 = vadd.f32 0.112945676, %v1080_v12  ;;  %v1160_v7 = vmul.f32 %v1159_v30, %v2208_v17  ;;  %v1188_v36 = vadd.f32 0.0036580483, %v1187_v19 }
  0x79   : > { %v1110_v43 = vadd.f32 0.05243302, %v1109_v56  ;;  %v1121_v8 = vadd.f32 0.112945676, %v1120_v57  ;;  %v1150_v13 = vadd.f32 0.05243302, %v1149_v59  ;;  %v1198_v5 = vmul.f32 %v1197_v40, %v2213_v4 }
  0x7a   : > { %v2242_v44 = vmul.f32 0.70710677, %v2231_v48  ;;  %v1071_v24 = vmul.f32 %v1070_v35, %v2202_v18  ;;  %v1082_v53 = vmul.f32 %v1081_v45, %v2202_v18  ;;  %v1161_v39 = vadd.f32 0.112945676, %v1160_v7 }
  0x7b   : > { %v2247_v1 = vadd.f32 %v2141_v3, %v1032_v27  ;;  %v1122_v26 = vmul.f32 %v1121_v8, %v2206_v25  ;;  %v1199_v15 = vadd.f32 0.014752088, %v1198_v5  ;;  %v1111_v23 = vmul.f32 %v1110_v43, %v2206_v25 }
  0x7c   : > { %v1083_v63 = vadd.f32 0.4994258, %v1082_v53  ;;  %v1162_v21 = vmul.f32 %v1161_v39, %v2208_v17  ;;  %v1189_v28 = vmul.f32 %v1188_v36, %v2213_v4  ;;  %v1151_v31 = vmul.f32 %v1150_v13, %v2208_v17 }
  0x7d   : > { %v1123_v51 = vadd.f32 0.4994258, %v1122_v26  ;;  %v1200_v41 = vmul.f32 %v1199_v15, %v2213_v4  ;;  %v1072_v22 = vadd.f32 0.18741608, %v1071_v24  ;;  %v1223_v27 = vmul.f32 %v2242_v44, %v2242_v44 }
  0x7e   : > { %v1084_v46 = vmul.f32 %v1083_v63, %v2202_v18  ;;  %v1163_v6 = vadd.f32 0.4994258, %v1162_v21  ;;  %v1034_v29 = vadd.f32 %v2216_v61, %v2200_v16  ;;  %v2261_v14 = vmul.f32 0.70710677, %v2247_v1 }
  0x7f   : > { %v1124_v32 = vmul.f32 %v1123_v51, %v2206_v25  ;;  %v1201_v37 = vadd.f32 0.112945676, %v1200_v41  ;;  %v2265_v9 = vadd.f32 %v2141_v3, %v1033_v62  ;;  %v1112_v55 = vadd.f32 0.18741608, %v1111_v23 }
  0x80   : > { %v2267_v49 = vadd.f32 1.0, %v1084_v46  ;;  %v1190_v38 = vadd.f32 0.05243302, %v1189_v28  ;;  %v1152_v20 = vadd.f32 0.18741608, %v1151_v31  ;;  %v1164_v10 = vmul.f32 %v1163_v6, %v2208_v17 }
  0x81   : > { %v2269_v50 = vadd.f32 1.0, %v1124_v32  ;;  %v1202_v16 = vmul.f32 %v1201_v37, %v2213_v4  ;;  %v1073_v61 = vmul.f32 %v1072_v22, %v2202_v18  ;;  %v2275_v60 = vmin.f32 %v1223_v27, 16.0 }
  0x82   : > { %1686 = vrcp.f32 %v2267_v49  ;;  %v2278_v11 = vadd.f32 %v2141_v3, %v1034_v29  ;;  %v1263_v34 = vmul.f32 %v2261_v14, %v2261_v14  ;;  %v2284_v12 = vmul.f32 0.70710677, %v2265_v9 }
  0x83   : > { %1688 = vrcp.f32 %v2269_v50  ;;  %v1191_v30 = vmul.f32 %v1190_v38, %v2213_v4  ;;  %v1113_v19 = vmul.f32 %v1112_v55, %v2206_v25  ;;  %v1153_v18 = vmul.f32 %v1152_v20, %v2208_v17 }
  0x84   : > { %v2289_v56 = vadd.f32 1.0, %v1164_v10  ;;  %v1203_v57 = vadd.f32 0.4994258, %v1202_v16  ;;  %v1074_v59 = vadd.f32 1.1283791, %v1073_v61  ;;  %v2294_v35 = vmul.f32 0.5, %v2156_v52 }
  0x85   : > { %v1225_v3 = vmul.f32 2.1237322e-06, %v2275_v60  ;;  %v1236_v40 = vmul.f32 3.8918573e-05, %v2275_v60  ;;  %v2297_v45 = vmul.f32 0.70710677, %v2278_v11  ;;  %v1303_v8 = vmul.f32 %v2284_v12, %v2284_v12 }
  0x86   : > { %1690 = vrcp.f32 %v2289_v56  ;;  %v2300_v7 = vmin.f32 %v1263_v34, 16.0  ;;  %v1204_v17 = vmul.f32 %v1203_v57, %v2213_v4  ;;  %v1114_v5 = vadd.f32 1.1283791, %v1113_v19 }
  0x87   : > { %v1226_v36 = vadd.f32 0.00028619796, %v1225_v3  ;;  %v1237_v43 = vadd.f32 0.001143296, %v1236_v40  ;;  %v2311_v24 = vadd.f32 1.1283791, %v1153_v18  ;;  %v2314_v39 = vmul.f32 %v1074_v59, %v2179_v42 }
  0x88   : > { %v2302_v25 = vpop.eup %1686  ;;  %v1192_v53 = vadd.f32 0.18741608, %v1191_v30  ;;  %v1095_v62 = vand.u32 2147483647, %v2267_v49  ;;  %v2319_v15 = vadd.f32 1.0, %v1204_v17  ;;  %v1097_v23 = vand.u32 2147483648, %v2267_v49 }
  0x89   : > { %v2307_v13 = vpop.eup %1688  ;;  %v1087_v52 = vmul.f32 %v2302_v25, %v2267_v49  ;;  %v1227_v21 = vmul.f32 %v1226_v36, %v2275_v60  ;;  %v1238_v28 = vmul.f32 %v1237_v43, %v2275_v60  ;;  %v1135_v31 = vand.u32 2147483647, %v2269_v50 }
  0x8a   : > { %v1127_v26 = vmul.f32 %v2307_v13, %v2269_v50  ;;  %1692 = vrcp.f32 %v2319_v15  ;;  %v1265_v42 = vmul.f32 2.1237322e-06, %v2300_v7  ;;  %vm1091_vm3 = vweird.f32 %v2267_v49 }
  0x8b   : > { %v1088_v63 = vsub.f32 1.0, %v1087_v52  ;;  %v1137_v22 = vand.u32 2147483648, %v2269_v50  ;;  %v1228_v46 = vadd.f32 0.0036580483, %v1227_v21  ;;  %v1239_v6 = vadd.f32 0.014752088, %v1238_v28 }
  0x8c   : > { %v1128_v51 = vsub.f32 1.0, %v1127_v26  ;;  %v2327_v41 = vpop.eup %1690  ;;  %v2333_v29 = vmul.f32 %v1114_v5, %v2183_v0  ;;  %vm1131_vm4 = vweird.f32 %v2269_v50  ;;  %v1098_v37 = vor.u32 1.1754944e-38, %v1097_v23 }
  0x8d   : > { %v1089_v27 = vmul.f32 %v2302_v25, %v1088_v63  ;;  %v1167_v32 = vmul.f32 %v2327_v41, %v2289_v56  ;;  %v1193_v38 = vmul.f32 %v1192_v53, %v2213_v4  ;;  %v1240_v20 = vmul.f32 %v1239_v6, %v2275_v60 }
  0x8e   : > { %v1129_v55 = vmul.f32 %v2307_v13, %v1128_v51  ;;  %vm1092_vm5 = vweird.f32 %v2302_v25  ;;  %v1229_v16 = vmul.f32 %v1228_v46, %v2275_v60  ;;  %v1266_v61 = vadd.f32 0.00028619796, %v1265_v42 }
  0x8f   : > { %v1168_v10 = vsub.f32 1.0, %v1167_v32  ;;  %vm2343_vm6 = vcmp.eq.f32.partialorder %v1095_v62, 8.507059e+37  ;;  %vm1132_vm7 = vweird.f32 %v2307_v13  ;;  %vm2348_vm8 = vcmp.eq.f32.partialorder %v1135_v31, 8.507059e+37  ;;  %vm2363_vm10 = vmor %vm1091_vm3, %vm1092_vm5 }
  0x90   : > { %v1138_v30 = vor.u32 1.1754944e-38, %v1137_v22  ;;  %v1241_v4 = vadd.f32 0.112945676, %v1240_v20  ;;  %v1276_v19 = vmul.f32 3.8918573e-05, %v2300_v7  ;;  %v2353_v18 = vpop.eup %1692  ;;  %v1090_v57 = vadd.f32 %v2302_v25, %v1089_v27  ;;  %vm2376_vm12 = vmor %vm1131_vm4, %vm1132_vm7 }
  0x91   : > { %vm1171_vm9 = vweird.f32 %v2289_v56  ;;  %v1175_v59 = vand.u32 2147483647, %v2289_v56  ;;  %v1267_v3 = vmul.f32 %v1266_v61, %v2300_v7  ;;  %v1130_v17 = vadd.f32 %v2307_v13, %v1129_v55 }
  0x92   : > { %v1177_v36 = vand.u32 2147483648, %v2289_v56  ;;  %v1207_v43 = vmul.f32 %v2353_v18, %v2319_v15  ;;  %vm1211_vm11 = vweird.f32 %v2319_v15  ;;  %v1169_v49 = vmul.f32 %v2327_v41, %v1168_v10 }
  0x93   : > { %v1215_v5 = vand.u32 2147483647, %v2319_v15  ;;  %v1230_v53 = vadd.f32 0.05243302, %v1229_v16  ;;  %v1242_v62 = vmul.f32 %v1241_v4, %v2275_v60  ;;  %v1268_v63 = vadd.f32 0.0036580483, %v1267_v3 }
  0x94   : > { %v1208_v26 = vsub.f32 1.0, %v1207_v43  ;;  %v1277_v23 = vadd.f32 0.001143296, %v1276_v19  ;;  %v2383_v21 = vmin.f32 %v1303_v8, 16.0  ;;  %v1094_v50 = vsel %vm2363_vm10, %v2302_v25, %v1090_v57 }
  0x95   : > { %vm1172_vm13 = vweird.f32 %v2327_v41  ;;  %v1217_v28 = vand.u32 2147483648, %v2319_v15  ;;  %v1243_v51 = vadd.f32 0.4994258, %v1242_v62  ;;  %v1134_v31 = vsel %vm2376_vm12, %v2307_v13, %v1130_v17 }
  0x96   : > { %v1209_v42 = vmul.f32 %v2353_v18, %v1208_v26  ;;  %vm1212_vm14 = vweird.f32 %v2353_v18  ;;  %v1278_v8 = vmul.f32 %v1277_v23, %v2300_v7  ;;  %v1170_v22 = vadd.f32 %v2327_v41, %v1169_v49  ;;  %vm2402_vm15 = vmor %vm1171_vm9, %vm1172_vm13 }
  0x97   : > { %v1231_v46 = vmul.f32 %v1230_v53, %v2275_v60  ;;  %v1244_v25 = vmul.f32 %v1243_v51, %v2275_v60  ;;  %v1305_v6 = vmul.f32 2.1237322e-06, %v2383_v21  ;;  %v1269_v32 = vmul.f32 %v1268_v63, %v2300_v7  ;;  %vm2415_vm1 = vmor %vm1211_vm11, %vm1212_vm14 }
  0x98   : > { %v1210_v13 = vadd.f32 %v2353_v18, %v1209_v42  ;;  %v1279_v55 = vadd.f32 0.014752088, %v1278_v8  ;;  %v1316_v20 = vmul.f32 3.8918573e-05, %v2383_v21  ;;  %vm2409_vm0 = vcmp.eq.f32.partialorder %v1175_v59, 8.507059e+37 }
  0x99   : > { %v1194_v16 = vadd.f32 1.1283791, %v1193_v38  ;;  %v1245_v61 = vadd.f32 1.0, %v1244_v25  ;;  %v1306_v4 = vadd.f32 0.00028619796, %v1305_v6  ;;  %v1178_v19 = vor.u32 1.1754944e-38, %v1177_v36 }
  0x9a   : > { %vm2419_vm2 = vcmp.eq.f32.partialorder %v1215_v5, 8.507059e+37  ;;  %v1280_v3 = vmul.f32 %v1279_v55, %v2300_v7  ;;  %v1317_v59 = vadd.f32 0.001143296, %v1316_v20  ;;  %v1099_v40 = vsel %vm2343_vm6, %v1098_v37, %v1094_v50 }
  0x9b   : > { %v1139_v15 = vsel %vm2348_vm8, %v1138_v30, %v1134_v31  ;;  %v1218_v38 = vor.u32 1.1754944e-38, %v1217_v28  ;;  %1694 = vrcp.f32 %v1245_v61  ;;  %v1174_v17 = vsel %vm2402_vm15, %v2327_v41, %v1170_v22 }
  0x9c   : > { %v1214_v36 = vsel %vm2415_vm1, %v2353_v18, %v1210_v13  ;;  %v1232_v43 = vadd.f32 0.18741608, %v1231_v46  ;;  %v1270_v52 = vadd.f32 0.05243302, %v1269_v32  ;;  %v1281_v49 = vadd.f32 0.112945676, %v1280_v3 }
  0x9d   : > { %v1307_v5 = vmul.f32 %v1306_v4, %v2383_v21  ;;  %v1318_v37 = vmul.f32 %v1317_v59, %v2383_v21  ;;  %v1343_v0 = vmul.f32 %v2297_v45, %v2297_v45  ;;  %v2439_v34 = vmul.f32 0.5, %v2159_v58 }
  0x9e   : > { %v2442_v30 = vmul.f32 %v1099_v40, %v2314_v39  ;;  %v1155_v41 = vmul.f32 %v2311_v24, %v2186_v54  ;;  %v1195_v18 = vmul.f32 %v1194_v16, %v2189_v33  ;;  %v2448_v53 = vmul.f32 %v1139_v15, %v2333_v29 }
  0x9f   : > { %v1282_v62 = vmul.f32 %v1281_v49, %v2300_v7  ;;  %v1319_v26 = vadd.f32 0.014752088, %v1318_v37  ;;  %v2451_v63 = vmin.f32 %v1343_v0, 16.0  ;;  %v1179_v58 = vsel %vm2409_vm0, %v1178_v19, %v1174_v17 }
  0xa0   : > { %v1219_v39 = vsel %vm2419_vm2, %v1218_v38, %v1214_v36  ;;  %v1233_v23 = vmul.f32 %v1232_v43, %v2275_v60  ;;  %v1271_v54 = vmul.f32 %v1270_v52, %v2300_v7  ;;  %v1308_v50 = vadd.f32 0.0036580483, %v1307_v5 }
  0xa1   : > { %v1695_v24 = vpop.eup %1694  ;;  %v1283_v33 = vadd.f32 0.4994258, %v1282_v62  ;;  %v1320_v29 = vmul.f32 %v1319_v26, %v2383_v21  ;;  %v1345_v28 = vmul.f32 2.1237322e-06, %v2451_v63  ;;  %vm1251_vm3 = vweird.f32 %v1245_v61 }
  0xa2   : > { %v1247_v51 = vmul.f32 %v1695_v24, %v1245_v61  ;;  %v1255_v31 = vand.u32 2147483647, %v1245_v61  ;;  %v1356_v42 = vmul.f32 3.8918573e-05, %v2451_v63  ;;  %v1257_v8 = vand.u32 2147483648, %v1245_v61 }
  0xa3   : > { %v1284_v22 = vmul.f32 %v1283_v33, %v2300_v7  ;;  %v1321_v46 = vadd.f32 0.112945676, %v1320_v29  ;;  %v1346_v25 = vadd.f32 0.00028619796, %v1345_v28  ;;  %vm1252_vm4 = vweird.f32 %v1695_v24 }
  0xa4   : > { %v1248_v60 = vsub.f32 1.0, %v1247_v51  ;;  %v1272_v6 = vadd.f32 0.18741608, %v1271_v54  ;;  %v1357_v27 = vadd.f32 0.001143296, %v1356_v42  ;;  %v1309_v32 = vmul.f32 %v1308_v50, %v2383_v21  ;;  %vm2469_vm5 = vmor %vm1251_vm3, %vm1252_vm4 }
  0xa5   : > { %v1285_v13 = vadd.f32 1.0, %v1284_v22  ;;  %v1322_v55 = vmul.f32 %v1321_v46, %v2383_v21  ;;  %v1347_v20 = vmul.f32 %v1346_v25, %v2451_v63  ;;  %v1602_v10 = vclamps-f32 %v2442_v30, 1.0 }
  0xa6   : > { %v1180_v16 = vmul.f32 %v1179_v58, %v1155_v41  ;;  %v1249_v56 = vmul.f32 %v1695_v24, %v1248_v60  ;;  %v1358_v4 = vmul.f32 %v1357_v27, %v2451_v63  ;;  %v1220_v19 = vmul.f32 %v1219_v39, %v1195_v18 }
  0xa7   : > { %v1234_v57 = vadd.f32 1.1283791, %v1233_v23  ;;  %vm2473_vm6 = vcmp.eq.f32.partialorder %v1255_v31, 8.507059e+37  ;;  %1696 = vrcp.f32 %v1285_v13  ;;  %v1258_v15 = vor.u32 1.1754944e-38, %v1257_v8 }
  0xa8   : > { %v1250_v40 = vadd.f32 %v1695_v24, %v1249_v56  ;;  %v1273_v38 = vmul.f32 %v1272_v6, %v2300_v7  ;;  %v1323_v17 = vadd.f32 0.4994258, %v1322_v55  ;;  %v1310_v36 = vadd.f32 0.05243302, %v1309_v32 }
  0xa9   : > { %v1348_v43 = vadd.f32 0.0036580483, %v1347_v20  ;;  %v1359_v52 = vadd.f32 0.014752088, %v1358_v4  ;;  %v1049_v49 = vmul.f32 0.5, %v2162_v2  ;;  %v1603_v61 = vclamps-f32 %v2448_v53, 1.0 }
  0xaa   : > { %v1254_v5 = vsel %vm2469_vm5, %v1695_v24, %v1250_v40  ;;  %v1324_v37 = vmul.f32 %v1323_v17, %v2383_v21  ;;  %v1050_v0 = vmul.f32 0.5, %v2165_v47  ;;  %v1604_v30 = vclamps-f32 %v1180_v16, 1.0 }
  0xab   : > { %v1235_v41 = vmul.f32 %v1234_v57, %v2242_v44  ;;  %v1360_v7 = vmul.f32 %v1359_v52, %v2451_v63  ;;  %v1605_v18 = vclamps-f32 %v1220_v19, 1.0  ;;  %v1259_v62 = vsel %vm2473_vm6, %v1258_v15, %v1254_v5 }
  0xac   : > { %v1274_v26 = vadd.f32 1.1283791, %v1273_v38  ;;  %v1325_v2 = vadd.f32 1.0, %v1324_v37  ;;  %v1311_v53 = vmul.f32 %v1310_v36, %v2383_v21  ;;  %v1349_v39 = vmul.f32 %v1348_v43, %v2451_v63 }
  0xad   : > { %v1697_v58 = vpop.eup %1696  ;;  %v1361_v23 = vadd.f32 0.112945676, %v1360_v7  ;;  %v1383_v54 = vadd.f32 1.0, %v1602_v10  ;;  %vm1291_vm7 = vweird.f32 %v1285_v13  ;;  %v1295_v47 = vand.u32 2147483647, %v1285_v13 }
  0xae   : > { %v1287_v24 = vmul.f32 %v1697_v58, %v1285_v13  ;;  %v1384_v33 = vadd.f32 1.0, %v1603_v61  ;;  %v1260_v44 = vmul.f32 %v1259_v62, %v1235_v41  ;;  %v1297_v50 = vand.u32 2147483648, %v1285_v13 }
  0xaf   : > { %1698 = vrcp.f32 %v1325_v2  ;;  %v1385_v29 = vadd.f32 1.0, %v1604_v30  ;;  %vm1292_vm8 = vweird.f32 %v1697_v58  ;;  %v1362_v51 = vmul.f32 %v1361_v23, %v2451_v63 }
  0xb0   : > { %v1288_v28 = vsub.f32 1.0, %v1287_v24  ;;  %v1386_v31 = vadd.f32 1.0, %v1605_v18  ;;  %v1275_v42 = vmul.f32 %v1274_v26, %v2261_v14  ;;  %v1350_v8 = vadd.f32 0.05243302, %v1349_v39  ;;  %vm2502_vm9 = vmor %vm1291_vm7, %vm1292_vm8 }
  0xb1   : > { %v1391_v22 = vmul.f32 %v1383_v54, %v2294_v35  ;;  %v1312_v25 = vadd.f32 0.18741608, %v1311_v53  ;;  %v1363_v60 = vadd.f32 0.4994258, %v1362_v51  ;;  %v1392_v6 = vmul.f32 %v1384_v33, %v2439_v34 }
  0xb2   : > { %v1289_v46 = vmul.f32 %v1697_v58, %v1288_v28  ;;  %vm2506_vm10 = vcmp.eq.f32.partialorder %v1295_v47, 8.507059e+37  ;;  %v1298_v35 = vor.u32 1.1754944e-38, %v1297_v50  ;;  %v1393_v32 = vmul.f32 %v1385_v29, %v1049_v49 }
  0xb3   : > { %v1394_v55 = vmul.f32 %v1386_v31, %v1050_v0  ;;  %v1606_v34 = vclamps-f32 %v1260_v44, 1.0  ;;  %v1364_v10 = vmul.f32 %v1363_v60, %v2451_v63  ;;  %v1636_v16 = vpack.c.bf16 %v1392_v6, %v1391_v22 }
  0xb4   : > { %v1290_v20 = vadd.f32 %v1697_v58, %v1289_v46  ;;  %v1051_v13 = vmul.f32 0.5, %v2231_v48  ;;  %v1351_v4 = vmul.f32 %v1350_v8, %v2451_v63  ;;  %v1313_v3 = vmul.f32 %v1312_v25, %v2383_v21 }
  0xb5   : > { %v1699_v56 = vpop.eup %1698  ;;  %v1641_v19 = vpack.c.bf16 %v1394_v55, %v1393_v32  ;;  %vm1331_vm11 = vweird.f32 %v1325_v2  ;;  %1637 = vst [vmem:[%s2499_s7] sm:$0xff] %v1636_v16   ;;  %v1335_v15 = vand.u32 2147483647, %v1325_v2  ;;  %v1337_v38 = vand.u32 2147483648, %v1325_v2 }
  0xb6   : > { %v1294_v57 = vsel %vm2502_vm9, %v1697_v58, %v1290_v20  ;;  %v1327_v59 = vmul.f32 %v1699_v56, %v1325_v2  ;;  %v1365_v17 = vadd.f32 1.0, %v1364_v10  ;;  %vm1332_vm12 = vweird.f32 %v1699_v56 }
  0xb7   : > { %v1299_v40 = vsel %vm2506_vm10, %v1298_v35, %v1294_v57  ;;  %1656 = vst [vmem:[%s2499_s7 + $0x8] sm:$0xff] %v1641_v19   ;;  %v1387_v43 = vadd.f32 1.0, %v1606_v34  ;;  %v1352_v52 = vadd.f32 0.18741608, %v1351_v4  ;;  %v1052_v49 = vmul.f32 0.5, %v2247_v1  ;;  %vm1333_vm13 = vmor %vm1331_vm11, %vm1332_vm12 }
  0xb8   : > { %v1300_v36 = vmul.f32 %v1299_v40, %v1275_v42  ;;  %v1328_v48 = vsub.f32 1.0, %v1327_v59  ;;  %1700 = vrcp.f32 %v1365_v17  ;;  %v1314_v21 = vadd.f32 1.1283791, %v1313_v3 }
  0xb9   : > { %v1338_v37 = vor.u32 1.1754944e-38, %v1337_v38  ;;  %vm1336_vm14 = vcmp.eq.f32.partialorder %v1335_v15, 8.507059e+37  ;;  %v1395_v41 = vmul.f32 %v1387_v43, %v1051_v13  ;;  %v1353_v7 = vmul.f32 %v1352_v52, %v2451_v63 }
  0xba   : > { %v1607_v61 = vclamps-f32 %v1300_v36, 1.0  ;;  %v1329_v5 = vmul.f32 %v1699_v56, %v1328_v48  ;;  %v1315_v18 = vmul.f32 %v1314_v21, %v2284_v12  ;;  %vm1371_vm15 = vweird.f32 %v1365_v17 }
  0xbb   : > { %v1354_v23 = vadd.f32 1.1283791, %v1353_v7  ;;  %v1377_v2 = vand.u32 2147483648, %v1365_v17  ;;  %v1375_v47 = vand.u32 2147483647, %v1365_v17  ;;  %v1053_v51 = vmul.f32 0.5, %v2265_v9 }
  0xbc   : > { %v1330_v0 = vadd.f32 %v1699_v56, %v1329_v5  ;;  %v1388_v30 = vadd.f32 1.0, %v1607_v61  ;;  %v1054_v8 = vmul.f32 0.5, %v2278_v11 }
  0xbd   : > { %v1378_v44 = vor.u32 1.1754944e-38, %v1377_v2  ;;  %v1355_v12 = vmul.f32 %v1354_v23, %v2297_v45  ;;  %vm1376_vm2 = vcmp.eq.f32.partialorder %v1375_v47, 8.507059e+37 }
  0xbe   : > { %v1334_v62 = vsel %vm1333_vm13, %v1699_v56, %v1330_v0  ;;  %v1396_v26 = vmul.f32 %v1388_v30, %v1052_v49  ;;  %v1701_v58 = vpop.eup %1700 }
  0xbf   : > { %v1339_v53 = vsel %vm1336_vm14, %v1338_v37, %v1334_v62  ;;  %v1367_v1 = vmul.f32 %v1701_v58, %v1365_v17  ;;  %vm1372_vm0 = vweird.f32 %v1701_v58 }
  0xc0   : > { %v1646_v39 = vpack.c.bf16 %v1396_v26, %v1395_v41  ;;  %v1340_v54 = vmul.f32 %v1339_v53, %v1315_v18  ;;  %vm1373_vm1 = vmor %vm1371_vm15, %vm1372_vm0 }
  0xc1   : > { %v1368_v24 = vsub.f32 1.0, %v1367_v1 }
  0xc2   : > { %1657 = vst [vmem:[%s2499_s7 + $0x10] sm:$0xff] %v1646_v39   ;;  %v1608_v63 = vclamps-f32 %v1340_v54, 1.0 }
  0xc3   : > { %v1369_v33 = vmul.f32 %v1701_v58, %v1368_v24 }
  0xc4   : > { %v1389_v42 = vadd.f32 1.0, %v1608_v63 }
  0xc5   : > { %v1370_v50 = vadd.f32 %v1701_v58, %v1369_v33 }
  0xc6   : > { %v1397_v25 = vmul.f32 %v1389_v42, %v1053_v51 }
  0xc7   : > { %v1374_v29 = vsel %vm1373_vm1, %v1701_v58, %v1370_v50 }
  0xc8   : > { %v1379_v28 = vsel %vm1376_vm2, %v1378_v44, %v1374_v29 }
  0xc9   : > { %v1380_v31 = vmul.f32 %v1379_v28, %v1355_v12 }
  0xcb   : > { %v1609_v22 = vclamps-f32 %v1380_v31, 1.0 }
  0xcd   : > { %v1390_v46 = vadd.f32 1.0, %v1609_v22 }
  0xcf   : > { %v1398_v60 = vmul.f32 %v1390_v46, %v1054_v8 }
  0xd1   : > { %v1651_v6 = vpack.c.bf16 %v1398_v60, %v1397_v25 }
  0xd3   : > { %1658 = vst [vmem:[%s2499_s7 + $0x18] sm:$0xff] %v1651_v6  }
  0xd4 PF: > { %s15_s20 = sadd.s32 1, %s1724_s20   ;;  %s2593_s18 = smov %s1720_s19 }
  0xd5   : > { %p12_p5 = scmp.ge.s32.totalorder %s15_s20, 4   ;;  %s2594_s19 = smov %s2596_s1 }
  0xd7   :  { %14 = sbr.rel (!%p12_p5) target bundleno = 2 (0x2), region = 82 }

</bundles_post_ra>
